<compile_context>
chip_gen: v7x
topology: tpu7x:2x2x1
jax: 0.10.0
libtpu: 0.0.40
codegen_flags: <defaults>
</compile_context>

<pallas_src>
import functools

import jax
import jax.numpy as jnp
from jax.experimental import pallas as pl
from jax.experimental.pallas import tpu as pltpu

_BN_EPS = 1e-5  # PyTorch BatchNorm2d default


# ----------------------------------------------------------------------------
# Fused stage kernel:  o = act( BN(W @ patch + b) [+ residual] )
# ----------------------------------------------------------------------------
def _make_stage_kernel(act, use_residual):
    """act in {'relu', 'tanh'}; one kernel invocation handles one channel tile."""

    def kernel(*refs):
        if use_residual:
            w_ref, p_ref, b_ref, g_ref, beta_ref, res_ref, o_ref = refs
        else:
            w_ref, p_ref, b_ref, g_ref, beta_ref, o_ref = refs

        # (ct, K) @ (K, N*H*W) -> (ct, N*H*W); bf16 operands, f32 accumulation.
        y = jnp.dot(w_ref[...], p_ref[...], preferred_element_type=jnp.float32)
        y = y + b_ref[...]                                    # conv bias (ct, 1)

        # Training-mode BatchNorm over the whole batch (per output channel).
        # Two-pass (mean, then centered variance) for numerical robustness.
        inv_cnt = 1.0 / y.shape[1]
        mean = jnp.sum(y, axis=1, keepdims=True) * inv_cnt
        cen = y - mean
        var = jnp.sum(cen * cen, axis=1, keepdims=True) * inv_cnt  # biased var
        y = cen * jax.lax.rsqrt(var + _BN_EPS) * g_ref[...] + beta_ref[...]

        if use_residual:
            y = y + res_ref[...]
        if act == "relu":
            y = jnp.maximum(y, 0.0)
        else:  # "tanh"
            y = jnp.tanh(y)
        o_ref[...] = y.astype(o_ref.dtype)

    return kernel


# ----------------------------------------------------------------------------
# Wrapper-side layout plumbing (no FLOPs hoisted): im2col + weight flattening
# ----------------------------------------------------------------------------
def _im2col_cmajor(a, KH, KW):
    """a: (C, N, H, W) activation (zero 'same' padding is valid post-activation).

    Returns the (KH*KW*C, N*H*W) patch matrix with row index
    (kh*KW + kw)*C + c, matching transpose(w_hwio,(3,0,1,2)).reshape(Cout, K).
    """
    C, N, H, W = a.shape
    ph, pw = KH // 2, KW // 2
    ap = jnp.pad(a, ((0, 0), (0, 0), (ph, ph), (pw, pw)))
    taps = [ap[:, :, kh:kh + H, kw:kw + W]
            for kh in range(KH) for kw in range(KW)]          # each (C, N, H, W)
    return jnp.stack(taps, axis=0).reshape(KH * KW * C, N * H * W)


def fused_conv_bn_act(a, w_hwio, conv_bias, gamma, beta, *, act, residual=None):
    """One generator stage: conv(stride 1, 'same') + BN(train) [+res] + act.

    a        : (Cin, N, H, W) f32 activation (channel-major).
    w_hwio   : (KH, KW, Cin, Cout) conv weight.
    conv_bias: (Cout,) or None.
    gamma/beta: (Cout,) BatchNorm affine parameters.
    residual : optional (Cout, N, H, W) f32, added after BN, before the act.
    Returns  : (Cout, N, H, W) f32.
    """
    Cin, N, H, W = a.shape
    KH, KW, _, Cout = w_hwio.shape
    NHW = N * H * W
    K = KH * KW * Cin

    # im2col patch + flattened weights, cast to bf16 for the MXU.
    patch = _im2col_cmajor(a, KH, KW).astype(jnp.bfloat16)            # (K, NHW)
    wf = jnp.transpose(w_hwio, (3, 0, 1, 2)).reshape(Cout, K)
    wf = wf.astype(jnp.bfloat16)                                      # (Cout, K)

    if conv_bias is None:
        conv_bias = jnp.zeros((Cout,), jnp.float32)

    # Pad output channels up to a multiple of 8 sublanes (handles Cout=1 for
    # the final stage; padded channels produce exact zeros and are sliced off).
    Cp = max(8, ((Cout + 7) // 8) * 8)
    if Cp != Cout:
        pad = Cp - Cout
        wf = jnp.pad(wf, ((0, pad), (0, 0)))
        conv_bias = jnp.pad(conv_bias, (0, pad))
        gamma = jnp.pad(gamma, (0, pad))
        beta = jnp.pad(beta, (0, pad))
    b2 = conv_bias.reshape(Cp, 1).astype(jnp.float32)
    g2 = gamma.reshape(Cp, 1).astype(jnp.float32)
    be2 = beta.reshape(Cp, 1).astype(jnp.float32)

    # Channel-tile grid: >=2 independent tiles when possible so the "parallel"
    # axis can spread across v7x's two TensorCores (per-channel BN stats make
    # tiles race-free); harmless on single-TC v5e/v6e.
    ct = Cp // 2 if (Cp >= 16 and (Cp // 2) % 8 == 0) else Cp
    grid = (Cp // ct,)

    use_res = residual is not None
    in_specs = [
        pl.BlockSpec((ct, K), lambda i: (i, 0)),     # weights   (per tile)
        pl.BlockSpec((K, NHW), lambda i: (0, 0)),    # patch     (shared block)
        pl.BlockSpec((ct, 1), lambda i: (i, 0)),     # conv bias
        pl.BlockSpec((ct, 1), lambda i: (i, 0)),     # bn gamma
        pl.BlockSpec((ct, 1), lambda i: (i, 0)),     # bn beta
    ]
    args = [wf, patch, b2, g2, be2]
    if use_res:
        r = residual.reshape(residual.shape[0], NHW).astype(jnp.float32)
        if r.shape[0] != Cp:
            r = jnp.pad(r, ((0, Cp - r.shape[0]), (0, 0)))
        in_specs.append(pl.BlockSpec((ct, NHW), lambda i: (i, 0)))
        args.append(r)

    out = pl.pallas_call(
        _make_stage_kernel(act, use_res),
        out_shape=jax.ShapeDtypeStruct((Cp, NHW), jnp.float32),
        grid=grid,
        in_specs=in_specs,
        out_specs=pl.BlockSpec((ct, NHW), lambda i: (i, 0)),
        compiler_params=pltpu.CompilerParams(
            dimension_semantics=("parallel",)),
    )(*args)

    return out[:Cout].reshape(Cout, N, H, W)


# ----------------------------------------------------------------------------
# Parameter construction (deterministic, PyTorch-default-style init)
# ----------------------------------------------------------------------------
def _conv_init(key, ksize, cin, cout, bias):
    fan_in = cin * ksize * ksize
    bound = 1.0 / jnp.sqrt(fan_in)
    kw, kb = jax.random.split(key)
    w = jax.random.uniform(kw, (ksize, ksize, cin, cout), jnp.float32, -bound, bound)
    b = (jax.random.uniform(kb, (cout,), jnp.float32, -bound, bound)
         if bias else None)
    return w, b


def init_generator_params(key, input_dim=32, num_blocks=2):
    keys = jax.random.split(key, 2 + 2 * num_blocks)
    params = {}

    # conv: Conv2d(1, input_dim, 7, stride=1, padding=3, bias=False) -> HWIO
    params["conv_w"], _ = _conv_init(keys[0], 7, 1, input_dim, bias=False)
    params["bn1_g"] = jnp.ones((input_dim,), jnp.float32)
    params["bn1_b"] = jnp.zeros((input_dim,), jnp.float32)

    blocks = []
    for i in range(num_blocks):
        k1, k2 = jax.random.split(keys[1 + i])
        w1, b1 = _conv_init(k1, 3, input_dim, input_dim, bias=True)
        w2, b2 = _conv_init(k2, 3, input_dim, input_dim, bias=True)
        blocks.append({
            "w1": w1, "b1": b1,
            "bn1_g": jnp.ones((input_dim,), jnp.float32),
            "bn1_b": jnp.zeros((input_dim,), jnp.float32),
            "w2": w2, "b2": b2,
            "bn2_g": jnp.ones((input_dim,), jnp.float32),
            "bn2_b": jnp.zeros((input_dim,), jnp.float32),
        })
    params["blocks"] = blocks

    # ConvTranspose2d(input_dim, 1, 7, stride=1, padding=3, bias=False).
    # PyTorch weight layout (Cin, Cout, KH, KW); rewrite as an equivalent
    # 'same' conv: flip spatially, move to HWIO.
    fan_in_t = input_dim * 7 * 7
    bound_t = 1.0 / jnp.sqrt(fan_in_t)
    wt = jax.random.uniform(keys[1 + num_blocks], (input_dim, 1, 7, 7),
                            jnp.float32, -bound_t, bound_t)
    params["convT_w_eq"] = jnp.transpose(jnp.flip(wt, axis=(2, 3)), (2, 3, 0, 1))

    params["bn2_g"] = jnp.ones((1,), jnp.float32)
    params["bn2_b"] = jnp.zeros((1,), jnp.float32)
    return params


# ----------------------------------------------------------------------------
# Generator forward (accepts/returns NCHW like the PyTorch module)
# ----------------------------------------------------------------------------
def generator_forward(params, x_nchw):
    # Internal layout is channel-major: (C, N, H, W).
    a = jnp.transpose(x_nchw, (1, 0, 2, 3)).astype(jnp.float32)   # (1, N, H, W)

    # conv7x7 -> bn1 -> relu
    a = fused_conv_bn_act(a, params["conv_w"], None,
                          params["bn1_g"], params["bn1_b"], act="relu")

    # residual blocks: relu(bn2(conv2(relu(bn1(conv1(x))))) + x) -- 2 calls each
    for blk in params["blocks"]:
        res = a
        h = fused_conv_bn_act(a, blk["w1"], blk["b1"],
                              blk["bn1_g"], blk["bn1_b"], act="relu")
        a = fused_conv_bn_act(h, blk["w2"], blk["b2"],
                              blk["bn2_g"], blk["bn2_b"], act="relu",
                              residual=res)

    # conv_transpose (as equivalent 'same' conv) -> bn2 -> tanh
    a = fused_conv_bn_act(a, params["convT_w_eq"], None,
                          params["bn2_g"], params["bn2_b"], act="tanh")

    return jnp.transpose(a, (1, 0, 2, 3))  # (1, N, H, W) -> (N, 1, H, W)


# TODO(synk): nn.BatchNorm2d running_mean/running_var buffer updates are not
# modeled (side-effect bookkeeping only; the training-mode forward output does
# not depend on them).

if __name__ == "__main__":
    key = jax.random.PRNGKey(0)
    k_x, k_p = jax.random.split(key)

    # Small shapes consistent with the module: batch=2, 1 input channel,
    # 16x16 spatial, input_dim=32, 2 resnet blocks.
    x = jax.random.normal(k_x, (2, 1, 16, 16), jnp.float32)   # NCHW, like PyTorch
    params = init_generator_params(k_p, input_dim=32, num_blocks=2)

    fwd = jax.jit(functools.partial(generator_forward, params))
    out = jax.block_until_ready(fwd(x))

    assert out.shape == (2, 1, 16, 16), out.shape
    assert bool(jnp.all(jnp.isfinite(out)))
    assert bool(jnp.all(jnp.abs(out) <= 1.0 + 1e-5))  # tanh range
    print("KERNEL_OK")
</pallas_src>

<mosaic_0001>
module attributes {stable_mosaic.version = 11 : i64} {
  func.func @kernel(%arg0: i32, %arg1: memref<16x49xbf16, #tpu.memory_space<vmem>>, %arg2: memref<49x512xbf16, #tpu.memory_space<vmem>>, %arg3: memref<16x1xf32, #tpu.memory_space<vmem>>, %arg4: memref<16x1xf32, #tpu.memory_space<vmem>>, %arg5: memref<16x1xf32, #tpu.memory_space<vmem>>, %arg6: memref<16x512xf32, #tpu.memory_space<vmem>>) attributes {dimension_semantics = [#tpu.dimension_semantics<parallel>], iteration_bounds = array<i64: 2>, scalar_prefetch = 0 : i64, scratch_operands = 0 : i64, tpu.core_type = #tpu.core_type<tc>, window_params = [{transform_indices = @transform_0, window_bounds = array<i64: 16, 49>}, {pipeline_mode = #tpu.pipeline_mode<synchronous>, transform_indices = @transform_1, window_bounds = array<i64: 49, 512>}, {transform_indices = @transform_2, window_bounds = array<i64: 16, 1>}, {transform_indices = @transform_3, window_bounds = array<i64: 16, 1>}, {transform_indices = @transform_4, window_bounds = array<i64: 16, 1>}, {transform_indices = @transform_5, window_bounds = array<i64: 16, 512>}]} {
    %c0 = arith.constant 0 : index
    %c0_0 = arith.constant 0 : index
    %0 = vector.load %arg1[%c0, %c0_0] : memref<16x49xbf16, #tpu.memory_space<vmem>>, vector<16x49xbf16>
    %c0_1 = arith.constant 0 : index
    %c0_2 = arith.constant 0 : index
    %1 = vector.load %arg2[%c0_1, %c0_2] : memref<49x512xbf16, #tpu.memory_space<vmem>>, vector<49x512xbf16>
    %cst = arith.constant dense<0.000000e+00> : vector<16x512xf32>
    %2 = tpu.matmul %0, %1, %cst {dimension_numbers = #tpu.dot_dimension_numbers<[1], [0], [0], [1], [0, 0, 1, 1], [], []>} : vector<16x49xbf16>, vector<49x512xbf16>, vector<16x512xf32> -> vector<16x512xf32>
    %c0_3 = arith.constant 0 : index
    %c0_4 = arith.constant 0 : index
    %3 = vector.load %arg3[%c0_3, %c0_4] : memref<16x1xf32, #tpu.memory_space<vmem>>, vector<16x1xf32>
    %4 = vector.broadcast %3 : vector<16x1xf32> to vector<16x512xf32>
    %5 = arith.addf %2, %4 : vector<16x512xf32>
    %cst_5 = arith.constant dense<0.000000e+00> : vector<16xf32>
    %6 = vector.multi_reduction <add>, %5, %cst_5 [1] : vector<16x512xf32> to vector<16xf32>
    %7 = vector.shape_cast %6 : vector<16xf32> to vector<16x1xf32>
    %cst_6 = arith.constant 0.001953125 : f32
    %8 = vector.broadcast %cst_6 : f32 to vector<16x1xf32>
    %9 = arith.mulf %7, %8 : vector<16x1xf32>
    %10 = vector.broadcast %9 : vector<16x1xf32> to vector<16x512xf32>
    %11 = arith.subf %5, %10 : vector<16x512xf32>
    %12 = arith.mulf %11, %11 : vector<16x512xf32>
    %cst_7 = arith.constant dense<0.000000e+00> : vector<16xf32>
    %13 = vector.multi_reduction <add>, %12, %cst_7 [1] : vector<16x512xf32> to vector<16xf32>
    %14 = vector.shape_cast %13 : vector<16xf32> to vector<16x1xf32>
    %cst_8 = arith.constant 0.001953125 : f32
    %15 = vector.broadcast %cst_8 : f32 to vector<16x1xf32>
    %16 = arith.mulf %14, %15 : vector<16x1xf32>
    %cst_9 = arith.constant 9.99999974E-6 : f32
    %17 = vector.broadcast %cst_9 : f32 to vector<16x1xf32>
    %18 = arith.addf %16, %17 : vector<16x1xf32>
    %19 = math.rsqrt %18 : vector<16x1xf32>
    %20 = vector.broadcast %19 : vector<16x1xf32> to vector<16x512xf32>
    %21 = arith.mulf %11, %20 : vector<16x512xf32>
    %c0_10 = arith.constant 0 : index
    %c0_11 = arith.constant 0 : index
    %22 = vector.load %arg4[%c0_10, %c0_11] : memref<16x1xf32, #tpu.memory_space<vmem>>, vector<16x1xf32>
    %23 = vector.broadcast %22 : vector<16x1xf32> to vector<16x512xf32>
    %24 = arith.mulf %21, %23 : vector<16x512xf32>
    %c0_12 = arith.constant 0 : index
    %c0_13 = arith.constant 0 : index
    %25 = vector.load %arg5[%c0_12, %c0_13] : memref<16x1xf32, #tpu.memory_space<vmem>>, vector<16x1xf32>
    %26 = vector.broadcast %25 : vector<16x1xf32> to vector<16x512xf32>
    %27 = arith.addf %24, %26 : vector<16x512xf32>
    %cst_14 = arith.constant 0.000000e+00 : f32
    %28 = vector.broadcast %cst_14 : f32 to vector<16x512xf32>
    %29 = arith.maximumf %27, %28 : vector<16x512xf32>
    %c0_15 = arith.constant 0 : index
    %c0_16 = arith.constant 0 : index
    %30 = vector.load %arg6[%c0_15, %c0_16] : memref<16x512xf32, #tpu.memory_space<vmem>>, vector<16x512xf32>
    tpu.vector_store %arg6[%c0_15, %c0_16], %29 {strides = array<i32>} : memref<16x512xf32, #tpu.memory_space<vmem>>, vector<16x512xf32>,
    return
  }
  func.func @transform_0(%arg0: i32) -> (i32, i32) {
    %c0_i32 = arith.constant 0 : i32
    %c0_i32_0 = arith.constant 0 : i32
    return %arg0, %c0_i32 : i32, i32
  }
  func.func @transform_1(%arg0: i32) -> (i32, i32) {
    %c0_i32 = arith.constant 0 : i32
    %c0_i32_0 = arith.constant 0 : i32
    %c0_i32_1 = arith.constant 0 : i32
    return %c0_i32, %c0_i32_0 : i32, i32
  }
  func.func @transform_2(%arg0: i32) -> (i32, i32) {
    %c0_i32 = arith.constant 0 : i32
    %c0_i32_0 = arith.constant 0 : i32
    return %arg0, %c0_i32 : i32, i32
  }
  func.func @transform_3(%arg0: i32) -> (i32, i32) {
    %c0_i32 = arith.constant 0 : i32
    %c0_i32_0 = arith.constant 0 : i32
    return %arg0, %c0_i32 : i32, i32
  }
  func.func @transform_4(%arg0: i32) -> (i32, i32) {
    %c0_i32 = arith.constant 0 : i32
    %c0_i32_0 = arith.constant 0 : i32
    return %arg0, %c0_i32 : i32, i32
  }
  func.func @transform_5(%arg0: i32) -> (i32, i32) {
    %c0_i32 = arith.constant 0 : i32
    %c0_i32_0 = arith.constant 0 : i32
    return %arg0, %c0_i32 : i32, i32
  }
}

module attributes {stable_mosaic.version = 11 : i64} {
  func.func @kernel(%arg0: i32, %arg1: memref<16x288xbf16, #tpu.memory_space<vmem>>, %arg2: memref<288x512xbf16, #tpu.memory_space<vmem>>, %arg3: memref<16x1xf32, #tpu.memory_space<vmem>>, %arg4: memref<16x1xf32, #tpu.memory_space<vmem>>, %arg5: memref<16x1xf32, #tpu.memory_space<vmem>>, %arg6: memref<16x512xf32, #tpu.memory_space<vmem>>) attributes {dimension_semantics = [#tpu.dimension_semantics<parallel>], iteration_bounds = array<i64: 2>, scalar_prefetch = 0 : i64, scratch_operands = 0 : i64, tpu.core_type = #tpu.core_type<tc>, window_params = [{transform_indices = @transform_0, window_bounds = array<i64: 16, 288>}, {pipeline_mode = #tpu.pipeline_mode<synchronous>, transform_indices = @transform_1, window_bounds = array<i64: 288, 512>}, {transform_indices = @transform_2, window_bounds = array<i64: 16, 1>}, {transform_indices = @transform_3, window_bounds = array<i64: 16, 1>}, {transform_indices = @transform_4, window_bounds = array<i64: 16, 1>}, {transform_indices = @transform_5, window_bounds = array<i64: 16, 512>}]} {
    %c0 = arith.constant 0 : index
    %c0_0 = arith.constant 0 : index
    %0 = vector.load %arg1[%c0, %c0_0] : memref<16x288xbf16, #tpu.memory_space<vmem>>, vector<16x288xbf16>
    %c0_1 = arith.constant 0 : index
    %c0_2 = arith.constant 0 : index
    %1 = vector.load %arg2[%c0_1, %c0_2] : memref<288x512xbf16, #tpu.memory_space<vmem>>, vector<288x512xbf16>
    %cst = arith.constant dense<0.000000e+00> : vector<16x512xf32>
    %2 = tpu.matmul %0, %1, %cst {dimension_numbers = #tpu.dot_dimension_numbers<[1], [0], [0], [1], [0, 0, 1, 1], [], []>} : vector<16x288xbf16>, vector<288x512xbf16>, vector<16x512xf32> -> vector<16x512xf32>
    %c0_3 = arith.constant 0 : index
    %c0_4 = arith.constant 0 : index
    %3 = vector.load %arg3[%c0_3, %c0_4] : memref<16x1xf32, #tpu.memory_space<vmem>>, vector<16x1xf32>
    %4 = vector.broadcast %3 : vector<16x1xf32> to vector<16x512xf32>
    %5 = arith.addf %2, %4 : vector<16x512xf32>
    %cst_5 = arith.constant dense<0.000000e+00> : vector<16xf32>
    %6 = vector.multi_reduction <add>, %5, %cst_5 [1] : vector<16x512xf32> to vector<16xf32>
    %7 = vector.shape_cast %6 : vector<16xf32> to vector<16x1xf32>
    %cst_6 = arith.constant 0.001953125 : f32
    %8 = vector.broadcast %cst_6 : f32 to vector<16x1xf32>
    %9 = arith.mulf %7, %8 : vector<16x1xf32>
    %10 = vector.broadcast %9 : vector<16x1xf32> to vector<16x512xf32>
    %11 = arith.subf %5, %10 : vector<16x512xf32>
    %12 = arith.mulf %11, %11 : vector<16x512xf32>
    %cst_7 = arith.constant dense<0.000000e+00> : vector<16xf32>
    %13 = vector.multi_reduction <add>, %12, %cst_7 [1] : vector<16x512xf32> to vector<16xf32>
    %14 = vector.shape_cast %13 : vector<16xf32> to vector<16x1xf32>
    %cst_8 = arith.constant 0.001953125 : f32
    %15 = vector.broadcast %cst_8 : f32 to vector<16x1xf32>
    %16 = arith.mulf %14, %15 : vector<16x1xf32>
    %cst_9 = arith.constant 9.99999974E-6 : f32
    %17 = vector.broadcast %cst_9 : f32 to vector<16x1xf32>
    %18 = arith.addf %16, %17 : vector<16x1xf32>
    %19 = math.rsqrt %18 : vector<16x1xf32>
    %20 = vector.broadcast %19 : vector<16x1xf32> to vector<16x512xf32>
    %21 = arith.mulf %11, %20 : vector<16x512xf32>
    %c0_10 = arith.constant 0 : index
    %c0_11 = arith.constant 0 : index
    %22 = vector.load %arg4[%c0_10, %c0_11] : memref<16x1xf32, #tpu.memory_space<vmem>>, vector<16x1xf32>
    %23 = vector.broadcast %22 : vector<16x1xf32> to vector<16x512xf32>
    %24 = arith.mulf %21, %23 : vector<16x512xf32>
    %c0_12 = arith.constant 0 : index
    %c0_13 = arith.constant 0 : index
    %25 = vector.load %arg5[%c0_12, %c0_13] : memref<16x1xf32, #tpu.memory_space<vmem>>, vector<16x1xf32>
    %26 = vector.broadcast %25 : vector<16x1xf32> to vector<16x512xf32>
    %27 = arith.addf %24, %26 : vector<16x512xf32>
    %cst_14 = arith.constant 0.000000e+00 : f32
    %28 = vector.broadcast %cst_14 : f32 to vector<16x512xf32>
    %29 = arith.maximumf %27, %28 : vector<16x512xf32>
    %c0_15 = arith.constant 0 : index
    %c0_16 = arith.constant 0 : index
    %30 = vector.load %arg6[%c0_15, %c0_16] : memref<16x512xf32, #tpu.memory_space<vmem>>, vector<16x512xf32>
    tpu.vector_store %arg6[%c0_15, %c0_16], %29 {strides = array<i32>} : memref<16x512xf32, #tpu.memory_space<vmem>>, vector<16x512xf32>,
    return
  }
  func.func @transform_0(%arg0: i32) -> (i32, i32) {
    %c0_i32 = arith.constant 0 : i32
    %c0_i32_0 = arith.constant 0 : i32
    return %arg0, %c0_i32 : i32, i32
  }
  func.func @transform_1(%arg0: i32) -> (i32, i32) {
    %c0_i32 = arith.constant 0 : i32
    %c0_i32_0 = arith.constant 0 : i32
    %c0_i32_1 = arith.constant 0 : i32
    return %c0_i32, %c0_i32_0 : i32, i32
  }
  func.func @transform_2(%arg0: i32) -> (i32, i32) {
    %c0_i32 = arith.constant 0 : i32
    %c0_i32_0 = arith.constant 0 : i32
    return %arg0, %c0_i32 : i32, i32
  }
  func.func @transform_3(%arg0: i32) -> (i32, i32) {
    %c0_i32 = arith.constant 0 : i32
    %c0_i32_0 = arith.constant 0 : i32
    return %arg0, %c0_i32 : i32, i32
  }
  func.func @transform_4(%arg0: i32) -> (i32, i32) {
    %c0_i32 = arith.constant 0 : i32
    %c0_i32_0 = arith.constant 0 : i32
    return %arg0, %c0_i32 : i32, i32
  }
  func.func @transform_5(%arg0: i32) -> (i32, i32) {
    %c0_i32 = arith.constant 0 : i32
    %c0_i32_0 = arith.constant 0 : i32
    return %arg0, %c0_i32 : i32, i32
  }
}

module attributes {stable_mosaic.version = 11 : i64} {
  func.func @kernel(%arg0: i32, %arg1: memref<16x288xbf16, #tpu.memory_space<vmem>>, %arg2: memref<288x512xbf16, #tpu.memory_space<vmem>>, %arg3: memref<16x1xf32, #tpu.memory_space<vmem>>, %arg4: memref<16x1xf32, #tpu.memory_space<vmem>>, %arg5: memref<16x1xf32, #tpu.memory_space<vmem>>, %arg6: memref<16x512xf32, #tpu.memory_space<vmem>>, %arg7: memref<16x512xf32, #tpu.memory_space<vmem>>) attributes {dimension_semantics = [#tpu.dimension_semantics<parallel>], iteration_bounds = array<i64: 2>, scalar_prefetch = 0 : i64, scratch_operands = 0 : i64, tpu.core_type = #tpu.core_type<tc>, window_params = [{transform_indices = @transform_0, window_bounds = array<i64: 16, 288>}, {pipeline_mode = #tpu.pipeline_mode<synchronous>, transform_indices = @transform_1, window_bounds = array<i64: 288, 512>}, {transform_indices = @transform_2, window_bounds = array<i64: 16, 1>}, {transform_indices = @transform_3, window_bounds = array<i64: 16, 1>}, {transform_indices = @transform_4, window_bounds = array<i64: 16, 1>}, {transform_indices = @transform_5, window_bounds = array<i64: 16, 512>}, {transform_indices = @transform_6, window_bounds = array<i64: 16, 512>}]} {
    %c0 = arith.constant 0 : index
    %c0_0 = arith.constant 0 : index
    %0 = vector.load %arg1[%c0, %c0_0] : memref<16x288xbf16, #tpu.memory_space<vmem>>, vector<16x288xbf16>
    %c0_1 = arith.constant 0 : index
    %c0_2 = arith.constant 0 : index
    %1 = vector.load %arg2[%c0_1, %c0_2] : memref<288x512xbf16, #tpu.memory_space<vmem>>, vector<288x512xbf16>
    %cst = arith.constant dense<0.000000e+00> : vector<16x512xf32>
    %2 = tpu.matmul %0, %1, %cst {dimension_numbers = #tpu.dot_dimension_numbers<[1], [0], [0], [1], [0, 0, 1, 1], [], []>} : vector<16x288xbf16>, vector<288x512xbf16>, vector<16x512xf32> -> vector<16x512xf32>
    %c0_3 = arith.constant 0 : index
    %c0_4 = arith.constant 0 : index
    %3 = vector.load %arg3[%c0_3, %c0_4] : memref<16x1xf32, #tpu.memory_space<vmem>>, vector<16x1xf32>
    %4 = vector.broadcast %3 : vector<16x1xf32> to vector<16x512xf32>
    %5 = arith.addf %2, %4 : vector<16x512xf32>
    %cst_5 = arith.constant dense<0.000000e+00> : vector<16xf32>
    %6 = vector.multi_reduction <add>, %5, %cst_5 [1] : vector<16x512xf32> to vector<16xf32>
    %7 = vector.shape_cast %6 : vector<16xf32> to vector<16x1xf32>
    %cst_6 = arith.constant 0.001953125 : f32
    %8 = vector.broadcast %cst_6 : f32 to vector<16x1xf32>
    %9 = arith.mulf %7, %8 : vector<16x1xf32>
    %10 = vector.broadcast %9 : vector<16x1xf32> to vector<16x512xf32>
    %11 = arith.subf %5, %10 : vector<16x512xf32>
    %12 = arith.mulf %11, %11 : vector<16x512xf32>
    %cst_7 = arith.constant dense<0.000000e+00> : vector<16xf32>
    %13 = vector.multi_reduction <add>, %12, %cst_7 [1] : vector<16x512xf32> to vector<16xf32>
    %14 = vector.shape_cast %13 : vector<16xf32> to vector<16x1xf32>
    %cst_8 = arith.constant 0.001953125 : f32
    %15 = vector.broadcast %cst_8 : f32 to vector<16x1xf32>
    %16 = arith.mulf %14, %15 : vector<16x1xf32>
    %cst_9 = arith.constant 9.99999974E-6 : f32
    %17 = vector.broadcast %cst_9 : f32 to vector<16x1xf32>
    %18 = arith.addf %16, %17 : vector<16x1xf32>
    %19 = math.rsqrt %18 : vector<16x1xf32>
    %20 = vector.broadcast %19 : vector<16x1xf32> to vector<16x512xf32>
    %21 = arith.mulf %11, %20 : vector<16x512xf32>
    %c0_10 = arith.constant 0 : index
    %c0_11 = arith.constant 0 : index
    %22 = vector.load %arg4[%c0_10, %c0_11] : memref<16x1xf32, #tpu.memory_space<vmem>>, vector<16x1xf32>
    %23 = vector.broadcast %22 : vector<16x1xf32> to vector<16x512xf32>
    %24 = arith.mulf %21, %23 : vector<16x512xf32>
    %c0_12 = arith.constant 0 : index
    %c0_13 = arith.constant 0 : index
    %25 = vector.load %arg5[%c0_12, %c0_13] : memref<16x1xf32, #tpu.memory_space<vmem>>, vector<16x1xf32>
    %26 = vector.broadcast %25 : vector<16x1xf32> to vector<16x512xf32>
    %27 = arith.addf %24, %26 : vector<16x512xf32>
    %c0_14 = arith.constant 0 : index
    %c0_15 = arith.constant 0 : index
    %28 = vector.load %arg6[%c0_14, %c0_15] : memref<16x512xf32, #tpu.memory_space<vmem>>, vector<16x512xf32>
    %29 = arith.addf %27, %28 : vector<16x512xf32>
    %cst_16 = arith.constant 0.000000e+00 : f32
    %30 = vector.broadcast %cst_16 : f32 to vector<16x512xf32>
    %31 = arith.maximumf %29, %30 : vector<16x512xf32>
    %c0_17 = arith.constant 0 : index
    %c0_18 = arith.constant 0 : index
    %32 = vector.load %arg7[%c0_17, %c0_18] : memref<16x512xf32, #tpu.memory_space<vmem>>, vector<16x512xf32>
    tpu.vector_store %arg7[%c0_17, %c0_18], %31 {strides = array<i32>} : memref<16x512xf32, #tpu.memory_space<vmem>>, vector<16x512xf32>,
    return
  }
  func.func @transform_0(%arg0: i32) -> (i32, i32) {
    %c0_i32 = arith.constant 0 : i32
    %c0_i32_0 = arith.constant 0 : i32
    return %arg0, %c0_i32 : i32, i32
  }
  func.func @transform_1(%arg0: i32) -> (i32, i32) {
    %c0_i32 = arith.constant 0 : i32
    %c0_i32_0 = arith.constant 0 : i32
    %c0_i32_1 = arith.constant 0 : i32
    return %c0_i32, %c0_i32_0 : i32, i32
  }
  func.func @transform_2(%arg0: i32) -> (i32, i32) {
    %c0_i32 = arith.constant 0 : i32
    %c0_i32_0 = arith.constant 0 : i32
    return %arg0, %c0_i32 : i32, i32
  }
  func.func @transform_3(%arg0: i32) -> (i32, i32) {
    %c0_i32 = arith.constant 0 : i32
    %c0_i32_0 = arith.constant 0 : i32
    return %arg0, %c0_i32 : i32, i32
  }
  func.func @transform_4(%arg0: i32) -> (i32, i32) {
    %c0_i32 = arith.constant 0 : i32
    %c0_i32_0 = arith.constant 0 : i32
    return %arg0, %c0_i32 : i32, i32
  }
  func.func @transform_5(%arg0: i32) -> (i32, i32) {
    %c0_i32 = arith.constant 0 : i32
    %c0_i32_0 = arith.constant 0 : i32
    return %arg0, %c0_i32 : i32, i32
  }
  func.func @transform_6(%arg0: i32) -> (i32, i32) {
    %c0_i32 = arith.constant 0 : i32
    %c0_i32_0 = arith.constant 0 : i32
    return %arg0, %c0_i32 : i32, i32
  }
}

module attributes {stable_mosaic.version = 11 : i64} {
  func.func @kernel(%arg0: i32, %arg1: memref<8x1568xbf16, #tpu.memory_space<vmem>>, %arg2: memref<1568x512xbf16, #tpu.memory_space<vmem>>, %arg3: memref<8x1xf32, #tpu.memory_space<vmem>>, %arg4: memref<8x1xf32, #tpu.memory_space<vmem>>, %arg5: memref<8x1xf32, #tpu.memory_space<vmem>>, %arg6: memref<8x512xf32, #tpu.memory_space<vmem>>) attributes {dimension_semantics = [#tpu.dimension_semantics<parallel>], iteration_bounds = array<i64: 1>, scalar_prefetch = 0 : i64, scratch_operands = 0 : i64, tpu.core_type = #tpu.core_type<tc>, window_params = [{transform_indices = @transform_0, window_bounds = array<i64: 8, 1568>}, {pipeline_mode = #tpu.pipeline_mode<synchronous>, transform_indices = @transform_1, window_bounds = array<i64: 1568, 512>}, {transform_indices = @transform_2, window_bounds = array<i64: 8, 1>}, {transform_indices = @transform_3, window_bounds = array<i64: 8, 1>}, {transform_indices = @transform_4, window_bounds = array<i64: 8, 1>}, {transform_indices = @transform_5, window_bounds = array<i64: 8, 512>}]} {
    %c0 = arith.constant 0 : index
    %c0_0 = arith.constant 0 : index
    %0 = vector.load %arg1[%c0, %c0_0] : memref<8x1568xbf16, #tpu.memory_space<vmem>>, vector<8x1568xbf16>
    %c0_1 = arith.constant 0 : index
    %c0_2 = arith.constant 0 : index
    %1 = vector.load %arg2[%c0_1, %c0_2] : memref<1568x512xbf16, #tpu.memory_space<vmem>>, vector<1568x512xbf16>
    %cst = arith.constant dense<0.000000e+00> : vector<8x512xf32>
    %2 = tpu.matmul %0, %1, %cst {dimension_numbers = #tpu.dot_dimension_numbers<[1], [0], [0], [1], [0, 0, 1, 1], [], []>} : vector<8x1568xbf16>, vector<1568x512xbf16>, vector<8x512xf32> -> vector<8x512xf32>
    %c0_3 = arith.constant 0 : index
    %c0_4 = arith.constant 0 : index
    %3 = vector.load %arg3[%c0_3, %c0_4] : memref<8x1xf32, #tpu.memory_space<vmem>>, vector<8x1xf32>
    %4 = vector.broadcast %3 : vector<8x1xf32> to vector<8x512xf32>
    %5 = arith.addf %2, %4 : vector<8x512xf32>
    %cst_5 = arith.constant dense<0.000000e+00> : vector<8xf32>
    %6 = vector.multi_reduction <add>, %5, %cst_5 [1] : vector<8x512xf32> to vector<8xf32>
    %7 = vector.shape_cast %6 : vector<8xf32> to vector<8x1xf32>
    %cst_6 = arith.constant 0.001953125 : f32
    %8 = vector.broadcast %cst_6 : f32 to vector<8x1xf32>
    %9 = arith.mulf %7, %8 : vector<8x1xf32>
    %10 = vector.broadcast %9 : vector<8x1xf32> to vector<8x512xf32>
    %11 = arith.subf %5, %10 : vector<8x512xf32>
    %12 = arith.mulf %11, %11 : vector<8x512xf32>
    %cst_7 = arith.constant dense<0.000000e+00> : vector<8xf32>
    %13 = vector.multi_reduction <add>, %12, %cst_7 [1] : vector<8x512xf32> to vector<8xf32>
    %14 = vector.shape_cast %13 : vector<8xf32> to vector<8x1xf32>
    %cst_8 = arith.constant 0.001953125 : f32
    %15 = vector.broadcast %cst_8 : f32 to vector<8x1xf32>
    %16 = arith.mulf %14, %15 : vector<8x1xf32>
    %cst_9 = arith.constant 9.99999974E-6 : f32
    %17 = vector.broadcast %cst_9 : f32 to vector<8x1xf32>
    %18 = arith.addf %16, %17 : vector<8x1xf32>
    %19 = math.rsqrt %18 : vector<8x1xf32>
    %20 = vector.broadcast %19 : vector<8x1xf32> to vector<8x512xf32>
    %21 = arith.mulf %11, %20 : vector<8x512xf32>
    %c0_10 = arith.constant 0 : index
    %c0_11 = arith.constant 0 : index
    %22 = vector.load %arg4[%c0_10, %c0_11] : memref<8x1xf32, #tpu.memory_space<vmem>>, vector<8x1xf32>
    %23 = vector.broadcast %22 : vector<8x1xf32> to vector<8x512xf32>
    %24 = arith.mulf %21, %23 : vector<8x512xf32>
    %c0_12 = arith.constant 0 : index
    %c0_13 = arith.constant 0 : index
    %25 = vector.load %arg5[%c0_12, %c0_13] : memref<8x1xf32, #tpu.memory_space<vmem>>, vector<8x1xf32>
    %26 = vector.broadcast %25 : vector<8x1xf32> to vector<8x512xf32>
    %27 = arith.addf %24, %26 : vector<8x512xf32>
    %28 = math.tanh %27 : vector<8x512xf32>
    %c0_14 = arith.constant 0 : index
    %c0_15 = arith.constant 0 : index
    %29 = vector.load %arg6[%c0_14, %c0_15] : memref<8x512xf32, #tpu.memory_space<vmem>>, vector<8x512xf32>
    tpu.vector_store %arg6[%c0_14, %c0_15], %28 {strides = array<i32>} : memref<8x512xf32, #tpu.memory_space<vmem>>, vector<8x512xf32>,
    return
  }
  func.func @transform_0(%arg0: i32) -> (i32, i32) {
    %c0_i32 = arith.constant 0 : i32
    %c0_i32_0 = arith.constant 0 : i32
    return %arg0, %c0_i32 : i32, i32
  }
  func.func @transform_1(%arg0: i32) -> (i32, i32) {
    %c0_i32 = arith.constant 0 : i32
    %c0_i32_0 = arith.constant 0 : i32
    %c0_i32_1 = arith.constant 0 : i32
    return %c0_i32, %c0_i32_0 : i32, i32
  }
  func.func @transform_2(%arg0: i32) -> (i32, i32) {
    %c0_i32 = arith.constant 0 : i32
    %c0_i32_0 = arith.constant 0 : i32
    return %arg0, %c0_i32 : i32, i32
  }
  func.func @transform_3(%arg0: i32) -> (i32, i32) {
    %c0_i32 = arith.constant 0 : i32
    %c0_i32_0 = arith.constant 0 : i32
    return %arg0, %c0_i32 : i32, i32
  }
  func.func @transform_4(%arg0: i32) -> (i32, i32) {
    %c0_i32 = arith.constant 0 : i32
    %c0_i32_0 = arith.constant 0 : i32
    return %arg0, %c0_i32 : i32, i32
  }
  func.func @transform_5(%arg0: i32) -> (i32, i32) {
    %c0_i32 = arith.constant 0 : i32
    %c0_i32_0 = arith.constant 0 : i32
    return %arg0, %c0_i32 : i32, i32
  }
}

</mosaic_0001>

<bundles_post_ra>
// kernel: generator_forward.6
= control target key start
LH: loop header
LB: loop body
LE: loop exit
PB: predicated region body
PF: predicated region fallthrough
CT: control target
= control target key end

     0   :  { %10 = vsyncpa [#allocation3], 0  ;;  %s1125_s0 = inlined_call_operand.hbm [shape: bf16[32,49], index: 0, kind: input, shape index: {}]   ;;  %s1126_s1 = inlined_call_operand.vmem [shape: bf16[49,512], index: 1, kind: input, shape index: {}]   ;;  %s1127_s2 = inlined_call_operand.vmem [shape: f32[32,1], index: 2, kind: input, shape index: {}, may-alias: {2,4}]   ;;  %s1128_s3 = inlined_call_operand.vmem [shape: f32[32,1], index: 3, kind: input, shape index: {}]   ;;  %s1129_s4 = inlined_call_operand.vmem [shape: f32[32,1], index: 4, kind: input, shape index: {}, may-alias: {2,4}]   ;;  %s1130_s5 = inlined_call_operand.vmem [shape: f32[32,512], index: 5, kind: output, shape index: {}]  }
   0x1   :  { %12 = vsyncpa [#allocation3 + $0x1], 0  ;;  %s949_s18 = smov 0   ;;  %s951_s19 = smov 0  }
   0x2   :  { %s953_s20 = smov 0   ;;  %s955_s21 = smov 0  }
   0x3 LB: > { %s737_s22 = sadd.s32 4294967295, %s913_s21   ;;  %s969_s23 = sadd.s32 1, %s913_s21   ;;  %s913_s21 = sphi %s955_s21, %s1137_s21   ;;  %s909_s20 = sphi %s953_s20, %s1136_s20   ;;  %s905_s19 = sphi %s951_s19, %s1135_s19   ;;  %s901_s18 = sphi %s949_s18, %s1134_s18  }
   0x4   : > { %s22_s24 = ssub.s32 %s913_s21, %s969_s23  ;;  %s25_s25 = sadd.s32 1, %s909_s20 }
   0x5   : > { %p23_p0 = scmp.eq.s32.totalorder %s22_s24, 0  ;;  %p32_p1 = scmp.ne.s32.totalorder %s909_s20, %s905_s19 }
   0x6   : > { %p33_p2 = scmp.eq.s32.totalorder %s913_s21, 0  ;;  %p38_p3 = scmp.ne.s32.totalorder %s905_s19, %s901_s18 }
   0x7   : > { %s979_s26 = scalar_select %p23_p0, %s909_s20, %s25_s25  }
   0x8   : > { %p34_p4 = por %p33_p2, %p32_p1  ;;  %p39_p5 = scmp.eq.s32.totalorder %s737_s22, 0 }
   0x9   : > { %p784_p6 = scmp.lt.s32.totalorder %s913_s21, 2  ;;  %s190_s28 = sand.u32 1, %s909_s20  }
   0xa   : > { %p984_p7 = por %p39_p5, %p38_p3  ;;  %s741_s29 = sshll.u32 %s190_s28, 3 }
   0xb   : > { %s776_s30 = sshll.u32 %s913_s21, 7  ;;  %s194_s9 = scalar_lea.vmem [#allocation2], %s741_s29 }
   0xc   : > { %s993_s8 = scalar_lea.hbm %s1125_s0, %s776_s30  ;;  %s201_s10 = sshll.u32 %s194_s9, 4  ;;  %s995_s10 = int_to_ptr.vmem [resolvable:$true] %s201_s10 }
   0xd   : > { %p997_p8 = pnand %p784_p6, %p34_p4  ;;  %s1002_s12 = scalar_lea.sflag [#allocation3], %s190_s28 }
   0xe   : > { %s849_s13 = scalar_lea.hbm %s993_s8, 128  ;;  %s854_s16 = scalar_lea.hbm %s1125_s0, 256 }
   0xf   : > { %p850_p10 = scmp.ne.s32.totalorder %s993_s8, %s849_s13  ;;  %p851_p11 = pneg %p997_p8 }
  0x10   : > { %p855_p0 = scmp.lt.u32.totalorder %s993_s8, %s1125_s0  ;;  %p856_p1 = scmp.lt.u32.totalorder %s854_s16, %s849_s13 }
  0x11   : > { %p852_p12 = pnand %p851_p11, %p850_p10  ;;  %p858_p3 = scmp.lt.u32.totalorder %s849_s13, %s993_s8 }
  0x12   : > { %p857_p2 = por %p856_p1, %p855_p0 }
  0x13   : > { %p853_p13 = pneg %p852_p12 }
  0x14   : > { %p859_p4 = por %p858_p3, %p857_p2 }
  0x16   : > { %p860_p5 = pnand %p859_p4, %p853_p13 }
  0x18   : > { %863 = shalt.err (!%p860_p5)
}
  0x19   : > { %s864_s24 = scalar_lea.vmem %s995_s10, 128  ;;  %s915_s25 = smov [#allocation2]  }
  0x1a   : > { %p865_p6 = scmp.ne.s32.totalorder %s995_s10, %s864_s24  ;;  %s869_s28 = sshll.u32 %s915_s25, 4  ;;  %s870_s28 = int_to_ptr.vmem [resolvable:$false] %s869_s28 }
  0x1b   : > { %s871_s29 = scalar_lea.vmem %s870_s28, 256  ;;  %p872_p9 = scmp.lt.s32.totalorder %s995_s10, %s870_s28 }
  0x1c   : > { %p867_p10 = pnand %p865_p6, %p851_p11  ;;  %p873_p0 = scmp.lt.s32.totalorder %s871_s29, %s864_s24 }
  0x1e   : > { %p868_p12 = pneg %p867_p10  ;;  %p874_p1 = por %p873_p0, %p872_p9 }
  0x20   : > { %p875_p2 = pnand %p874_p1, %p868_p12 }
  0x22   : > { %878 = shalt.err (!%p875_p2)
}
  0x23   : > { %s916_s30 = smov 64   ;;  %s917_s6 = smov 4  }
  0x24   : > { %783 = dma.hbm_to_vmem [thread:$0]  (!%p997_p8), %s993_s8, 128, %s995_s10, %s1002_s12, %s916_s30, %s916_s30, %s917_s6  }
  0x25   : > { %p236_p11 = scmp.lt.s32.totalorder %s913_s21, 3  ;;  %p1133_p13 = scmp.ge.s32.totalorder %s913_s21, 1 }
  0x27   : > { %p237_p3 = pnand %p1133_p13, %p236_p11 }
  0x28   : > { %s242_s7 = sand.u32 (!%p237_p3), 1, %s905_s19  }
  0x29   : > { %240 = sbr.rel (%p237_p3) target bundleno = 614 (0x266), region = 40  ;;  %s1034_s9 = sshll.u32 (!%p237_p3), %s242_s7, 3 }
  0x2a   : > { %s243_s13 = scalar_lea.sflag (!%p237_p3), [#allocation3], %s242_s7  ;;  %s246_s14 = scalar_lea.vmem (!%p237_p3), [#allocation2], %s1034_s9 }
  0x30   : > { %896 = dma.done.wait (%p984_p7), %s243_s13, 128  }
  0x31   : > { %898 = vsyncadd (%p984_p7), %s243_s13, 4294967168  ;;  %s746_s8 = sshll.u32 %s737_s22, 1  ;;  %v918_v0 = vmov 0   ;;  %v822_v1 = vld [vmem:[%s1126_s1 + $0x4] ss:$16 sps:$4 sm:$0xff]   ;;  %vm423_vm0 = vcmask 1040384  }
  0x32   : > { %470 = vmatprep.mubr.bf16.mxu0 %v918_v0  ;;  %513 = vmatprep.mubr.bf16.mxu1 %v918_v0  ;;  %p291_p8 = scmp.lt.s32.totalorder %s746_s8, 3  ;;  %v824_v2 = vld [vmem:[%s1126_s1 + $0xc] ss:$16 sps:$4 sm:$0xff]   ;;  %v826_v3 = vld [vmem:[%s1126_s1] ss:$16 sps:$4 sm:$0xff]   ;;  %v425_v10 = vsel %vm423_vm0, 65535, %v918_v0 }
  0x33   : > { %820 = vset.pattern.permute.xlu0 %v918_v0  ;;  %821 = vset.pattern.permute.xlu1 %v918_v0  ;;  %v827_v4 = vld [vmem:[%s1126_s1 + $0x8] ss:$16 sps:$4 sm:$0xff]   ;;  %v828_v5 = vld [vmem:[%s1126_s1 + $0x24] ss:$16 sps:$4 sm:$0xff]   ;;  %v830_v6 = vld [vmem:[%s1126_s1 + $0x2c] ss:$16 sps:$4 sm:$0xff]  }
  0x34   : > { %s1139_s8 = smov (!%p291_p8, %s746_s8), 3  ;;  %438 = vmatprep.subr.bf16.mxu0 %v822_v1  ;;  %481 = vmatprep.subr.bf16.mxu1 %v824_v2  ;;  %v832_v7 = vld [vmem:[%s1126_s1 + $0x20] ss:$16 sps:$4 sm:$0xff]   ;;  %v833_v8 = vld [vmem:[%s1126_s1 + $0x28] ss:$16 sps:$4 sm:$0xff]   ;;  %vm419_vm1 = vcmask 400384  }
  0x35   : > { %s1061_s24 = sshll.u32 %s1139_s8, 3  ;;  %439 = vmatpush1.bf16.msra.mxu0 %v826_v3  ;;  %482 = vmatpush1.bf16.msra.mxu1 %v827_v4  ;;  %v834_v9 = vld [vmem:[%s1126_s1 + $0x44] ss:$16 sps:$4 sm:$0xff]   ;;  %v836_v11 = vld [vmem:[%s1126_s1 + $0x4c] ss:$16 sps:$4 sm:$0xff]  }
  0x36   : > { %440 = vmatprep.subr.bf16.mxu0 %v828_v5  ;;  %483 = vmatprep.subr.bf16.mxu1 %v830_v6  ;;  %s294_s15 = scalar_lea.vmem %s1127_s2, %s1061_s24  ;;  %v838_v12 = vld [vmem:[%s1126_s1 + $0x40] ss:$16 sps:$4 sm:$0xff]   ;;  %v839_v13 = vld [vmem:[%s1126_s1 + $0x48] ss:$16 sps:$4 sm:$0xff]   ;;  %s300_s6 = scalar_lea.vmem %s1128_s3, %s1061_s24 }
  0x37   : > { %v330_v14 = vld [vmem:[%s1126_s1 + $0x60] sm:$0x11]  ;;  %v331_v15 = vld [vmem:[%s1126_s1 + $0x68] sm:$0x11]  ;;  %s1104_s10 = scalar_lea.vmem %s1129_s4, %s1061_s24  ;;  %s777_s24 = sshll.u32 %s1139_s8, 5 }
  0x38   : > { %v769_v16 = vcombine.high %v330_v14, %v330_v14  ;;  %v771_v17 = vcombine.high %v331_v15, %v331_v15  ;;  %v768_v18 = vcombine.low %v330_v14, %v330_v14  ;;  %v332_v19 = vld [vmem:[%s294_s15] sm:$0xff]  ;;  %v770_v20 = vcombine.low %v331_v15, %v331_v15  ;;  %v333_v23 = vld [vmem:[%s294_s15 + $0x8] sm:$0xff]  ;;  %s313_s15 = scalar_lea.vmem %s1130_s5, %s777_s24 }
  0x39   : > { %441 = vmatpush1.bf16.msra.mxu0 %v832_v7  ;;  %484 = vmatpush1.bf16.msra.mxu1 %v833_v8  ;;  %v844_v26 = vld [vmem:[%s246_s14] sm:$0xff]  }
  0x3a   : > { %442 = vmatprep.subr.bf16.mxu0 %v834_v9  ;;  %485 = vmatprep.subr.bf16.mxu1 %v836_v11  ;;  %v430_v21 = vand.u32 %v769_v16, %v425_v10  ;;  %v436_v22 = vand.u32 %v771_v17, %v425_v10  ;;  %v427_v24 = vand.u32 %v768_v18, %v425_v10  ;;  %v576_v51 = vld [vmem:[%s300_s6] sm:$0xff]  ;;  %v577_v52 = vld [vmem:[%s300_s6 + $0x8] sm:$0xff] }
  0x3b   : > { %336 = vperm.xlu0 %820, %v332_v19   ;;  %v433_v25 = vand.u32 %v770_v20, %v425_v10  ;;  %v596_v53 = vld [vmem:[%s1104_s10] sm:$0xff]  ;;  %v597_v16 = vld [vmem:[%s1104_s10 + $0x8] sm:$0xff] }
  0x3d   : > { %443 = vmatpush1.bf16.msra.mxu0 %v838_v12  ;;  %486 = vmatpush1.bf16.msra.mxu1 %v839_v13 }
  0x3e   : > { %444 = vmatprep.subr.bf16.mxu0 %v430_v21  ;;  %487 = vmatprep.subr.bf16.mxu1 %v436_v22 }
  0x3f   : > { %341 = vperm.xlu0 %820, %v333_v23  }
  0x41   : > { %445 = vmatpush1.bf16.msra.mxu0 %v427_v24  ;;  %488 = vmatpush1.bf16.msra.mxu1 %v433_v25 }
  0x44   : > { %772 = vmatmul.mubr.msk.bf16.vlgmr.msra.gmra.mrb[0].mxu0 %vm419_vm1, %v844_v26  ;;  %773 = vmatmul.mubr.msk.bf16.vlgmr.msra.gmra.mrb[0].mxu1 %vm419_vm1, %v844_v26 }
  0xba   : > { %v337_v27 = vpop.permute.xlu0 %336 }
  0xbe   : > { %v342_v28 = vpop.permute.xlu0 %341 }
 0x117   : > { %v472_v29 = vpop.f32.mrb[0].mxu0  ;;  %v515_v30 = vpop.f32.mrb[0].mxu1 }
 0x118   : > { %v473_v31 = vadd.f32 %v472_v29, %v337_v27  ;;  %v474_v32 = vpop.f32.mrb[1].mxu0  ;;  %v517_v33 = vpop.f32.mrb[1].mxu1  ;;  %v516_v40 = vadd.f32 %v515_v30, %v337_v27 }
 0x119   : > { %v475_v34 = vadd.f32 %v474_v32, %v337_v27  ;;  %v476_v35 = vpop.f32.mrb[2].mxu0  ;;  %v519_v36 = vpop.f32.mrb[2].mxu1  ;;  %v518_v43 = vadd.f32 %v517_v33, %v337_v27 }
 0x11a   : > { %v477_v37 = vadd.f32 %v476_v35, %v342_v28  ;;  %v478_v38 = vpop.f32.mrb[3].mxu0  ;;  %v521_v39 = vpop.f32.mrb[3].mxu1  ;;  %v520_v44 = vadd.f32 %v519_v36, %v342_v28 }
 0x11b   : > { %v524_v41 = vadd.f32 %v475_v34, %v473_v31  ;;  %v479_v42 = vadd.f32 %v478_v38, %v342_v28  ;;  %v522_v49 = vadd.f32 %v521_v39, %v342_v28 }
 0x11d   : > { %v529_v45 = vadd.f32 %v479_v42, %v477_v37  ;;  %v525_v46 = vadd.f32 %v524_v41, %v516_v40 }
 0x11f   : > { %v526_v47 = vadd.f32 %v525_v46, %v518_v43  ;;  %v530_v48 = vadd.f32 %v529_v45, %v520_v44 }
 0x121   : > { %527 = vadd.xlane.f32.xlu1 %v526_v47  ;;  %v531_v50 = vadd.f32 %v530_v48, %v522_v49 }
 0x125   : > { %532 = vadd.xlane.f32.xlu1 %v531_v50 }
 0x136   : > { %580 = vperm.xlu1 %821, %v576_v51  }
 0x13a   : > { %585 = vperm.xlu1 %821, %v577_v52  }
 0x13e   : > { %600 = vperm.xlu1 %821, %v596_v53  }
 0x1ae   : > { %v528_v54 = vpop.xlane.xlu1 %527 }
 0x1af   : > { %v534_v55 = vmul.f32 0.001953125, %v528_v54 }
 0x1b1   : > { %v536_v56 = vsub.f32 %v473_v31, %v534_v55  ;;  %v537_v57 = vsub.f32 %v475_v34, %v534_v55  ;;  %v538_v58 = vsub.f32 %v516_v40, %v534_v55  ;;  %v539_v60 = vsub.f32 %v518_v43, %v534_v55 }
 0x1b2   : > { %v533_v59 = vpop.xlane.xlu1 %532 }
 0x1b3   : > { %v535_v61 = vmul.f32 0.001953125, %v533_v59  ;;  %v544_v62 = vmul.f32 %v536_v56, %v536_v56  ;;  %v545_v63 = vmul.f32 %v537_v57, %v537_v57  ;;  %v546_v0 = vmul.f32 %v538_v58, %v538_v58 }
 0x1b4   : > { %v547_v5 = vmul.f32 %v539_v60, %v539_v60 }
 0x1b5   : > { %v540_v1 = vsub.f32 %v477_v37, %v535_v61  ;;  %v541_v2 = vsub.f32 %v479_v42, %v535_v61  ;;  %v552_v3 = vadd.f32 %v545_v63, %v544_v62  ;;  %v542_v4 = vsub.f32 %v520_v44, %v535_v61 }
 0x1b6   : > { %v543_v7 = vsub.f32 %v522_v49, %v535_v61  ;;  %v581_v17 = vpop.permute.xlu1 %580 }
 0x1b7   : > { %v553_v6 = vadd.f32 %v552_v3, %v546_v0  ;;  %v548_v8 = vmul.f32 %v540_v1, %v540_v1  ;;  %v549_v9 = vmul.f32 %v541_v2, %v541_v2  ;;  %v550_v11 = vmul.f32 %v542_v4, %v542_v4 }
 0x1b8   : > { %v551_v13 = vmul.f32 %v543_v7, %v543_v7 }
 0x1b9   : > { %v554_v10 = vadd.f32 %v553_v6, %v547_v5  ;;  %v557_v12 = vadd.f32 %v549_v9, %v548_v8 }
 0x1ba   : > { %v586_v18 = vpop.permute.xlu1 %585 }
 0x1bb   : > { %555 = vadd.xlane.f32.xlu0 %v554_v10  ;;  %v558_v14 = vadd.f32 %v557_v12, %v550_v11 }
 0x1bd   : > { %v559_v15 = vadd.f32 %v558_v14, %v551_v13 }
 0x1be   : > { %v601_v19 = vpop.permute.xlu1 %600 }
 0x1bf   : > { %560 = vadd.xlane.f32.xlu1 %v559_v15 }
 0x1d0   : > { %605 = vperm.xlu1 %821, %v597_v16  }
 0x248   : > { %v556_v20 = vpop.xlane.xlu0 %555 }
 0x249   : > { %v562_v21 = vmul.f32 0.001953125, %v556_v20 }
 0x24b   : > { %v564_v22 = vadd.f32 1e-05, %v562_v21 }
 0x24c   : > { %v561_v23 = vpop.xlane.xlu1 %560 }
 0x24d   : > { %845 = vrsqrt.f32 %v564_v22  ;;  %v563_v24 = vmul.f32 0.001953125, %v561_v23 }
 0x24f   : > { %v565_v25 = vadd.f32 1e-05, %v563_v24 }
 0x250   : > { %v606_v52 = vpop.permute.xlu1 %605 }
 0x251   : > { %847 = vrsqrt.f32 %v565_v25 }
 0x257   : > { %v846_v26 = vpop.eup %845 }
 0x258   : > { %v568_v27 = vmul.f32 %v846_v26, %v536_v56  ;;  %v569_v28 = vmul.f32 %v846_v26, %v537_v57  ;;  %v570_v29 = vmul.f32 %v846_v26, %v538_v58  ;;  %v571_v30 = vmul.f32 %v846_v26, %v539_v60 }
 0x25a   : > { %v588_v31 = vmul.f32 %v581_v17, %v568_v27  ;;  %v589_v32 = vmul.f32 %v581_v17, %v569_v28  ;;  %v590_v33 = vmul.f32 %v581_v17, %v570_v29  ;;  %v591_v34 = vmul.f32 %v581_v17, %v571_v30 }
 0x25b   : > { %v848_v35 = vpop.eup %847 }
 0x25c   : > { %v572_v36 = vmul.f32 %v848_v35, %v540_v1  ;;  %v573_v37 = vmul.f32 %v848_v35, %v541_v2  ;;  %v574_v38 = vmul.f32 %v848_v35, %v542_v4  ;;  %v575_v39 = vmul.f32 %v848_v35, %v543_v7 }
 0x25d   : > { %v608_v40 = vadd.f32 %v601_v19, %v588_v31  ;;  %v609_v41 = vadd.f32 %v601_v19, %v589_v32  ;;  %v610_v42 = vadd.f32 %v601_v19, %v590_v33  ;;  %v611_v43 = vadd.f32 %v601_v19, %v591_v34 }
 0x25e   : > { %v592_v44 = vmul.f32 %v586_v18, %v572_v36  ;;  %v593_v45 = vmul.f32 %v586_v18, %v573_v37  ;;  %v594_v46 = vmul.f32 %v586_v18, %v574_v38  ;;  %v595_v47 = vmul.f32 %v586_v18, %v575_v39 }
 0x25f   : > { %v616_v48 = vmax.f32 %v608_v40, 0.0  ;;  %v617_v49 = vmax.f32 %v609_v41, 0.0  ;;  %v618_v50 = vmax.f32 %v610_v42, 0.0  ;;  %v619_v51 = vmax.f32 %v611_v43, 0.0 }
 0x260   : > { %v612_v53 = vadd.f32 %v606_v52, %v592_v44  ;;  %v613_v54 = vadd.f32 %v606_v52, %v593_v45  ;;  %v614_v55 = vadd.f32 %v606_v52, %v594_v46  ;;  %v615_v56 = vadd.f32 %v606_v52, %v595_v47 }
 0x261   : > { %624 = vst [vmem:[%s313_s15] sm:$0xff] %v616_v48  ;;  %625 = vst [vmem:[%s313_s15 + $0x8] sm:$0xff] %v617_v49 }
 0x262   : > { %626 = vst [vmem:[%s313_s15 + $0x10] sm:$0xff] %v618_v50  ;;  %627 = vst [vmem:[%s313_s15 + $0x18] sm:$0xff] %v619_v51  ;;  %v620_v57 = vmax.f32 %v612_v53, 0.0  ;;  %v621_v58 = vmax.f32 %v613_v54, 0.0  ;;  %v622_v59 = vmax.f32 %v614_v55, 0.0  ;;  %v623_v60 = vmax.f32 %v615_v56, 0.0 }
 0x264   : > { %628 = vst [vmem:[%s313_s15 + $0x20] sm:$0xff] %v620_v57  ;;  %629 = vst [vmem:[%s313_s15 + $0x28] sm:$0xff] %v621_v58 }
 0x265   : > { %630 = vst [vmem:[%s313_s15 + $0x30] sm:$0xff] %v622_v59  ;;  %631 = vst [vmem:[%s313_s15 + $0x38] sm:$0xff] %v623_v60 }
 0x266 PF: > { %p15_p7 = scmp.ge.s32.totalorder %s969_s23, 4   ;;  %s1134_s18 = smov %s905_s19 }
 0x267   : > { %s1135_s19 = smov %s909_s20  ;;  %s1136_s20 = smov %s979_s26 }
 0x268   : > { %s1137_s21 = smov %s969_s23  ;;  %17 = sbr.rel (!%p15_p7) target bundleno = 3 (0x3), region = 89 }
 0x26f   :  { %656 = vsyncpa [#allocation3], 1 }
 0x270   :  { %658 = vsyncpa [#allocation3 + $0x1], 1 }

// kernel: generator_forward.7
= control target key start
LH: loop header
LB: loop body
LE: loop exit
PB: predicated region body
PF: predicated region fallthrough
CT: control target
= control target key end

     0   :  { %s1420_s18 = smov 0   ;;  %s1687_s0 = inlined_call_operand.vmem [shape: bf16[32,288], index: 0, kind: input, shape index: {}]   ;;  %s1688_s1 = inlined_call_operand.vmem [shape: bf16[288,512], index: 1, kind: input, shape index: {}]   ;;  %s1689_s2 = inlined_call_operand.vmem [shape: f32[32,1], index: 2, kind: input, shape index: {}]   ;;  %s1690_s3 = inlined_call_operand.vmem [shape: f32[32,1], index: 3, kind: input, shape index: {}]   ;;  %s1691_s4 = inlined_call_operand.vmem [shape: f32[32,1], index: 4, kind: input, shape index: {}]   ;;  %s1692_s5 = inlined_call_operand.vmem [shape: f32[32,512], index: 5, kind: output, shape index: {}]  }
   0x1 LB: > { %s1141_s19 = sadd.s32 4294967295, %s1387_s18   ;;  %p1145_p0 = scmp.ge.s32.totalorder %s1387_s18, 1  ;;  %s1387_s18 = sphi %s1420_s18, %s15_s18  }
   0x2   : > { %p222_p1 = scmp.lt.s32.totalorder %s1387_s18, 3 }
   0x4   : > { %p223_p2 = pnand %p1145_p0, %p222_p1 }
   0x5   : > { %v1265_v0 = vld [vmem:[%s1688_s1 + $0x4] ss:$16 sps:$4 sm:$0xff] (!%p223_p2)   ;;  %v1267_v1 = vld [vmem:[%s1688_s1 + $0xc] ss:$16 sps:$4 sm:$0xff] (!%p223_p2)   ;;  %v1389_v2 = vmov (!%p223_p2), 0   ;;  %s1146_s9 = sshll.u32 (!%p223_p2), %s1141_s19, 1 }
   0x6   : > { %226 = sbr.rel (%p223_p2) target bundleno = 629 (0x275), region = 40  ;;  %1263 = vset.pattern.permute.xlu0 (!%p223_p2), %v1389_v2  ;;  %1264 = vset.pattern.permute.xlu1 (!%p223_p2), %v1389_v2  ;;  %v1269_v3 = vld [vmem:[%s1688_s1] ss:$16 sps:$4 sm:$0xff] (!%p223_p2)   ;;  %v1270_v4 = vld [vmem:[%s1688_s1 + $0x8] ss:$16 sps:$4 sm:$0xff] (!%p223_p2)   ;;  %p268_p3 = scmp.lt.s32.totalorder (!%p223_p2), %s1146_s9, 3 }
   0x7   : > { %767 = vmatprep.subr.bf16.mxu0 (!%p223_p2), %v1265_v0  ;;  %853 = vmatprep.subr.bf16.mxu1 (!%p223_p2), %v1267_v1  ;;  %v1271_v5 = vld [vmem:[%s1688_s1 + $0x24] ss:$16 sps:$4 sm:$0xff] (!%p223_p2)   ;;  %v1273_v6 = vld [vmem:[%s1688_s1 + $0x2c] ss:$16 sps:$4 sm:$0xff] (!%p223_p2)   ;;  %v1275_v7 = vld [vmem:[%s1688_s1 + $0x20] ss:$16 sps:$4 sm:$0xff] (!%p223_p2)  }
   0x8   : > { %768 = vmatpush1.bf16.msra.mxu0 (!%p223_p2), %v1269_v3  ;;  %854 = vmatpush1.bf16.msra.mxu1 (!%p223_p2), %v1270_v4  ;;  %v1276_v8 = vld [vmem:[%s1688_s1 + $0x28] ss:$16 sps:$4 sm:$0xff] (!%p223_p2)   ;;  %v1277_v9 = vld [vmem:[%s1688_s1 + $0x44] ss:$16 sps:$4 sm:$0xff] (!%p223_p2)   ;;  %v1279_v10 = vld [vmem:[%s1688_s1 + $0x4c] ss:$16 sps:$4 sm:$0xff] (!%p223_p2)  }
   0x9   : > { %769 = vmatprep.subr.bf16.mxu0 (!%p223_p2), %v1271_v5  ;;  %855 = vmatprep.subr.bf16.mxu1 (!%p223_p2), %v1273_v6  ;;  %v1281_v11 = vld [vmem:[%s1688_s1 + $0x40] ss:$16 sps:$4 sm:$0xff] (!%p223_p2)   ;;  %v1282_v12 = vld [vmem:[%s1688_s1 + $0x48] ss:$16 sps:$4 sm:$0xff] (!%p223_p2)   ;;  %v1283_v13 = vld [vmem:[%s1688_s1 + $0x64] ss:$16 sps:$4 sm:$0xff] (!%p223_p2)  }
   0xa   : > { %v1285_v14 = vld [vmem:[%s1688_s1 + $0x6c] ss:$16 sps:$4 sm:$0xff] (!%p223_p2)   ;;  %v1287_v15 = vld [vmem:[%s1688_s1 + $0x60] ss:$16 sps:$4 sm:$0xff] (!%p223_p2)   ;;  %v1288_v16 = vld [vmem:[%s1688_s1 + $0x68] ss:$16 sps:$4 sm:$0xff] (!%p223_p2)  }
   0xb   : > { %v1289_v17 = vld [vmem:[%s1688_s1 + $0x84] ss:$16 sps:$4 sm:$0xff] (!%p223_p2)   ;;  %v1291_v18 = vld [vmem:[%s1688_s1 + $0x8c] ss:$16 sps:$4 sm:$0xff] (!%p223_p2)   ;;  %v1293_v19 = vld [vmem:[%s1688_s1 + $0x80] ss:$16 sps:$4 sm:$0xff] (!%p223_p2)  }
   0xc   : > { %770 = vmatpush1.bf16.msra.mxu0 (!%p223_p2), %v1275_v7  ;;  %856 = vmatpush1.bf16.msra.mxu1 (!%p223_p2), %v1276_v8  ;;  %v1294_v20 = vld [vmem:[%s1688_s1 + $0x88] ss:$16 sps:$4 sm:$0xff] (!%p223_p2)   ;;  %v1295_v21 = vld [vmem:[%s1688_s1 + $0xa4] ss:$16 sps:$4 sm:$0xff] (!%p223_p2)   ;;  %v1297_v22 = vld [vmem:[%s1688_s1 + $0xac] ss:$16 sps:$4 sm:$0xff] (!%p223_p2)  }
   0xd   : > { %771 = vmatprep.subr.bf16.mxu0 %v1277_v9  ;;  %857 = vmatprep.subr.bf16.mxu1 %v1279_v10  ;;  %v1299_v23 = vld [vmem:[%s1688_s1 + $0xa0] ss:$16 sps:$4 sm:$0xff]   ;;  %v1300_v24 = vld [vmem:[%s1688_s1 + $0xa8] ss:$16 sps:$4 sm:$0xff]   ;;  %v1301_v25 = vld [vmem:[%s1688_s1 + $0xc4] ss:$16 sps:$4 sm:$0xff]  }
   0xe   : > { %v1303_v26 = vld [vmem:[%s1688_s1 + $0xcc] ss:$16 sps:$4 sm:$0xff]   ;;  %v1305_v27 = vld [vmem:[%s1688_s1 + $0xc0] ss:$16 sps:$4 sm:$0xff]   ;;  %v1306_v28 = vld [vmem:[%s1688_s1 + $0xc8] ss:$16 sps:$4 sm:$0xff]  }
   0xf   : > { %v1307_v29 = vld [vmem:[%s1688_s1 + $0xe4] ss:$16 sps:$4 sm:$0xff]   ;;  %v1309_v30 = vld [vmem:[%s1688_s1 + $0xec] ss:$16 sps:$4 sm:$0xff]   ;;  %v1311_v31 = vld [vmem:[%s1688_s1 + $0xe0] ss:$16 sps:$4 sm:$0xff]  }
  0x10   : > { %772 = vmatpush1.bf16.msra.mxu0 %v1281_v11  ;;  %858 = vmatpush1.bf16.msra.mxu1 %v1282_v12  ;;  %v1312_v32 = vld [vmem:[%s1688_s1 + $0xe8] ss:$16 sps:$4 sm:$0xff]   ;;  %v1313_v33 = vld [vmem:[%s1688_s1 + $0x104] ss:$16 sps:$4 sm:$0xff]   ;;  %v1315_v34 = vld [vmem:[%s1688_s1 + $0x10c] ss:$16 sps:$4 sm:$0xff]  }
  0x11   : > { %773 = vmatprep.subr.bf16.mxu0 %v1283_v13  ;;  %859 = vmatprep.subr.bf16.mxu1 %v1285_v14  ;;  %v1317_v35 = vld [vmem:[%s1688_s1 + $0x100] ss:$16 sps:$4 sm:$0xff]   ;;  %v1318_v36 = vld [vmem:[%s1688_s1 + $0x108] ss:$16 sps:$4 sm:$0xff]   ;;  %v1319_v37 = vld [vmem:[%s1688_s1 + $0x124] ss:$16 sps:$4 sm:$0xff]  }
  0x12   : > { %v1321_v38 = vld [vmem:[%s1688_s1 + $0x12c] ss:$16 sps:$4 sm:$0xff]   ;;  %s1694_s9 = smov (!%p268_p3, %s1146_s9), 3  ;;  %v1323_v39 = vld [vmem:[%s1688_s1 + $0x120] ss:$16 sps:$4 sm:$0xff]   ;;  %vm763_vm0 = vcmask 261120  }
  0x13   : > { %v1324_v40 = vld [vmem:[%s1688_s1 + $0x128] ss:$16 sps:$4 sm:$0xff]   ;;  %v1325_v41 = vld [vmem:[%s1688_s1 + $0x144] ss:$16 sps:$4 sm:$0xff]   ;;  %v1327_v42 = vld [vmem:[%s1688_s1 + $0x14c] ss:$16 sps:$4 sm:$0xff]  }
  0x14   : > { %774 = vmatpush1.bf16.msra.mxu0 %v1287_v15  ;;  %860 = vmatpush1.bf16.msra.mxu1 %v1288_v16  ;;  %s1253_s11 = smul.u32 12, %s1694_s9  ;;  %v1329_v43 = vld [vmem:[%s1688_s1 + $0x140] ss:$16 sps:$4 sm:$0xff]   ;;  %v1330_v44 = vld [vmem:[%s1688_s1 + $0x148] ss:$16 sps:$4 sm:$0xff]   ;;  %s1582_s26 = sshll.u32 %s1694_s9, 3 }
  0x15   : > { %775 = vmatprep.subr.bf16.mxu0 %v1289_v17  ;;  %861 = vmatprep.subr.bf16.mxu1 %v1291_v18  ;;  %v1331_v45 = vld [vmem:[%s1688_s1 + $0x164] ss:$16 sps:$4 sm:$0xff]   ;;  %v1333_v46 = vld [vmem:[%s1688_s1 + $0x16c] ss:$16 sps:$4 sm:$0xff]   ;;  %v1335_v47 = vld [vmem:[%s1688_s1 + $0x160] ss:$16 sps:$4 sm:$0xff]   ;;  %s278_s13 = scalar_lea.vmem %s1689_s2, %s1582_s26  ;;  %s284_s15 = scalar_lea.vmem %s1690_s3, %s1582_s26 }
  0x16   : > { %s1576_s23 = scalar_lea.vmem %s1687_s0, %s1253_s11  ;;  %v1336_v48 = vld [vmem:[%s1688_s1 + $0x168] ss:$16 sps:$4 sm:$0xff]   ;;  %v1337_v49 = vld [vmem:[%s1688_s1 + $0x184] ss:$16 sps:$4 sm:$0xff]   ;;  %v1339_v51 = vld [vmem:[%s1688_s1 + $0x18c] ss:$16 sps:$4 sm:$0xff]   ;;  %s1676_s19 = scalar_lea.vmem %s1691_s4, %s1582_s26 }
  0x17   : > { %v1363_v50 = vld [vmem:[%s1576_s23 + $0x4] ss:$12 sps:$4 sm:$0xff]   ;;  %v1342_v53 = vld [vmem:[%s1688_s1 + $0x188] ss:$16 sps:$4 sm:$0xff]   ;;  %v1345_v55 = vld [vmem:[%s1688_s1 + $0x1ac] ss:$16 sps:$4 sm:$0xff]  }
  0x18   : > { %776 = vmatpush1.bf16.msra.mxu0 %v1293_v19  ;;  %862 = vmatpush1.bf16.msra.mxu1 %v1294_v20  ;;  %v1341_v52 = vld [vmem:[%s1688_s1 + $0x180] ss:$16 sps:$4 sm:$0xff]   ;;  %v1343_v54 = vld [vmem:[%s1688_s1 + $0x1a4] ss:$16 sps:$4 sm:$0xff]   ;;  %v1348_v58 = vld [vmem:[%s1688_s1 + $0x1a8] ss:$16 sps:$4 sm:$0xff]  }
  0x19   : > { %777 = vmatprep.subr.bf16.mxu0 %v1295_v21  ;;  %863 = vmatprep.subr.bf16.mxu1 %v1297_v22  ;;  %v376_v56 = vld [vmem:[%s278_s13] sm:$0xff]  ;;  %v377_v59 = vld [vmem:[%s278_s13 + $0x8] sm:$0xff]  ;;  %s1236_s26 = sshll.u32 %s1694_s9, 5 }
  0x1a   : > { %799 = vmatprep.mubr.bf16.mxu0 %v1363_v50  ;;  %885 = vmatprep.mubr.bf16.mxu1 %v1363_v50  ;;  %v1347_v57 = vld [vmem:[%s1688_s1 + $0x1a0] ss:$16 sps:$4 sm:$0xff]   ;;  %v1349_v60 = vld [vmem:[%s1688_s1 + $0x1c4] ss:$16 sps:$4 sm:$0xff]   ;;  %v1351_v61 = vld [vmem:[%s1688_s1 + $0x1cc] ss:$16 sps:$4 sm:$0xff]   ;;  %s297_s22 = scalar_lea.vmem %s1692_s5, %s1236_s26 }
  0x1b   : > { %380 = vperm.xlu0 %1263, %v376_v56   ;;  %v1353_v62 = vld [vmem:[%s1688_s1 + $0x1c0] ss:$16 sps:$4 sm:$0xff]   ;;  %v1354_v63 = vld [vmem:[%s1688_s1 + $0x1c8] ss:$16 sps:$4 sm:$0xff]   ;;  %v1355_v0 = vld [vmem:[%s1688_s1 + $0x1e4] ss:$16 sps:$4 sm:$0xff]  }
  0x1c   : > { %778 = vmatpush1.bf16.msra.mxu0 %v1299_v23  ;;  %864 = vmatpush1.bf16.msra.mxu1 %v1300_v24  ;;  %v1357_v1 = vld [vmem:[%s1688_s1 + $0x1ec] ss:$16 sps:$4 sm:$0xff]   ;;  %v1359_v3 = vld [vmem:[%s1688_s1 + $0x1e0] ss:$16 sps:$4 sm:$0xff]   ;;  %v1360_v4 = vld [vmem:[%s1688_s1 + $0x1e8] ss:$16 sps:$4 sm:$0xff]  }
  0x1d   : > { %779 = vmatprep.subr.bf16.mxu0 %v1301_v25  ;;  %865 = vmatprep.subr.bf16.mxu1 %v1303_v26  ;;  %v1367_v5 = vld [vmem:[%s1688_s1 + $0x204] ss:$16 sps:$4 sm:$0xff]   ;;  %v1370_v6 = vld [vmem:[%s1688_s1 + $0x20c] ss:$16 sps:$4 sm:$0xff]   ;;  %v1365_v8 = vld [vmem:[%s1688_s1 + $0x200] ss:$16 sps:$4 sm:$0xff]  }
  0x1e   : > { %v1361_v7 = vld [vmem:[%s1576_s23] ss:$12 sps:$4 sm:$0xff]   ;;  %v1368_v9 = vld [vmem:[%s1688_s1 + $0x208] ss:$16 sps:$4 sm:$0xff]   ;;  %v1373_v10 = vld [vmem:[%s1688_s1 + $0x224] ss:$16 sps:$4 sm:$0xff]  }
  0x1f   : > { %385 = vperm.xlu0 %1263, %v377_v59   ;;  %v1376_v11 = vld [vmem:[%s1688_s1 + $0x22c] ss:$16 sps:$4 sm:$0xff]   ;;  %v1371_v12 = vld [vmem:[%s1688_s1 + $0x220] ss:$16 sps:$4 sm:$0xff]   ;;  %v1374_v13 = vld [vmem:[%s1688_s1 + $0x228] ss:$16 sps:$4 sm:$0xff]  }
  0x20   : > { %780 = vmatpush1.bf16.msra.mxu0 %v1305_v27  ;;  %866 = vmatpush1.bf16.msra.mxu1 %v1306_v28  ;;  %v1364_v14 = vld [vmem:[%s1576_s23 + $0x8] ss:$12 sps:$4 sm:$0xff]  }
  0x21   : > { %781 = vmatprep.subr.bf16.mxu0 %v1307_v29  ;;  %867 = vmatprep.subr.bf16.mxu1 %v1309_v30 }
  0x24   : > { %782 = vmatpush1.bf16.msra.mxu0 %v1311_v31  ;;  %868 = vmatpush1.bf16.msra.mxu1 %v1312_v32 }
  0x25   : > { %783 = vmatprep.subr.bf16.mxu0 %v1313_v33  ;;  %869 = vmatprep.subr.bf16.mxu1 %v1315_v34 }
  0x28   : > { %784 = vmatpush1.bf16.msra.mxu0 %v1317_v35  ;;  %870 = vmatpush1.bf16.msra.mxu1 %v1318_v36 }
  0x29   : > { %785 = vmatprep.subr.bf16.mxu0 %v1319_v37  ;;  %871 = vmatprep.subr.bf16.mxu1 %v1321_v38  ;;  %v991_v38 = vld [vmem:[%s284_s15] sm:$0xff] }
  0x2c   : > { %786 = vmatpush1.bf16.msra.mxu0 %v1323_v39  ;;  %872 = vmatpush1.bf16.msra.mxu1 %v1324_v40  ;;  %v992_v39 = vld [vmem:[%s284_s15 + $0x8] sm:$0xff]  ;;  %v1011_v40 = vld [vmem:[%s1676_s19] sm:$0xff] }
  0x2d   : > { %787 = vmatprep.subr.bf16.mxu0 %v1325_v41  ;;  %873 = vmatprep.subr.bf16.mxu1 %v1327_v42 }
  0x30   : > { %788 = vmatpush1.bf16.msra.mxu0 %v1329_v43  ;;  %874 = vmatpush1.bf16.msra.mxu1 %v1330_v44 }
  0x31   : > { %789 = vmatprep.subr.bf16.mxu0 %v1331_v45  ;;  %875 = vmatprep.subr.bf16.mxu1 %v1333_v46 }
  0x34   : > { %790 = vmatpush1.bf16.msra.mxu0 %v1335_v47  ;;  %876 = vmatpush1.bf16.msra.mxu1 %v1336_v48 }
  0x35   : > { %791 = vmatprep.subr.bf16.mxu0 %v1337_v49  ;;  %877 = vmatprep.subr.bf16.mxu1 %v1339_v51 }
  0x38   : > { %792 = vmatpush1.bf16.msra.mxu0 %v1341_v52  ;;  %878 = vmatpush1.bf16.msra.mxu1 %v1342_v53 }
  0x39   : > { %793 = vmatprep.subr.bf16.mxu0 %v1343_v54  ;;  %879 = vmatprep.subr.bf16.mxu1 %v1345_v55 }
  0x3c   : > { %794 = vmatpush1.bf16.msra.mxu0 %v1347_v57  ;;  %880 = vmatpush1.bf16.msra.mxu1 %v1348_v58 }
  0x3d   : > { %795 = vmatprep.subr.bf16.mxu0 %v1349_v60  ;;  %881 = vmatprep.subr.bf16.mxu1 %v1351_v61 }
  0x40   : > { %796 = vmatpush1.bf16.msra.mxu0 %v1353_v62  ;;  %882 = vmatpush1.bf16.msra.mxu1 %v1354_v63 }
  0x41   : > { %797 = vmatprep.subr.bf16.mxu0 %v1355_v0  ;;  %883 = vmatprep.subr.bf16.mxu1 %v1357_v1 }
  0x44   : > { %798 = vmatpush1.bf16.msra.mxu0 %v1359_v3  ;;  %884 = vmatpush1.bf16.msra.mxu1 %v1360_v4  ;;  %v1012_v4 = vld [vmem:[%s1676_s19 + $0x8] sm:$0xff] }
  0x45   : > { %810 = vmatprep.subr.bf16.mxu0 %v1367_v5  ;;  %896 = vmatprep.subr.bf16.mxu1 %v1370_v6 }
  0x47   : > { %800 = vmatmul.mubr.bf16.vlgmr.msra.gmra.mrb[0].mxu0 %v1361_v7  ;;  %886 = vmatmul.mubr.bf16.vlgmr.msra.gmra.mrb[0].mxu1 %v1361_v7 }
  0x48   : > { %811 = vmatpush1.bf16.msra.mxu0 %v1365_v8  ;;  %897 = vmatpush1.bf16.msra.mxu1 %v1368_v9 }
  0x49   : > { %812 = vmatprep.subr.bf16.mxu0 %v1373_v10  ;;  %898 = vmatprep.subr.bf16.mxu1 %v1376_v11 }
  0x4a   : > { %842 = vmatprep.mubr.bf16.mxu0 %v1389_v2  ;;  %928 = vmatprep.mubr.bf16.mxu1 %v1389_v2 }
  0x4c   : > { %813 = vmatpush1.bf16.msra.mxu0 %v1371_v12  ;;  %899 = vmatpush1.bf16.msra.mxu1 %v1374_v13 }
  0x53   : > { %1232 = vmatmul.mubr.msk.bf16.vlgmr.msra.gmra.mrb[0].mxu0 %vm763_vm0, %v1364_v14  ;;  %1233 = vmatmul.mubr.msk.bf16.vlgmr.msra.gmra.mrb[0].mxu1 %vm763_vm0, %v1364_v14 }
  0x9a   : > { %v381_v15 = vpop.permute.xlu0 %380 }
  0x9e   : > { %v386_v16 = vpop.permute.xlu0 %385 }
 0x126   : > { %v844_v17 = vpop.f32.mrb[0].mxu0  ;;  %v930_v18 = vpop.f32.mrb[0].mxu1 }
 0x127   : > { %v1237_v19 = vadd.f32 %v844_v17, %v381_v15  ;;  %v846_v20 = vpop.f32.mrb[1].mxu0  ;;  %v932_v21 = vpop.f32.mrb[1].mxu1  ;;  %v1241_v27 = vadd.f32 %v930_v18, %v381_v15 }
 0x128   : > { %v1238_v22 = vadd.f32 %v846_v20, %v381_v15  ;;  %v848_v23 = vpop.f32.mrb[2].mxu0  ;;  %v934_v24 = vpop.f32.mrb[2].mxu1  ;;  %v1242_v30 = vadd.f32 %v932_v21, %v381_v15 }
 0x129   : > { %v1239_v25 = vadd.f32 %v848_v23, %v386_v16  ;;  %v850_v26 = vpop.f32.mrb[3].mxu0  ;;  %v936_v2 = vpop.f32.mrb[3].mxu1  ;;  %v1243_v31 = vadd.f32 %v934_v24, %v386_v16 }
 0x12a   : > { %v939_v28 = vadd.f32 %v1238_v22, %v1237_v19  ;;  %v1240_v29 = vadd.f32 %v850_v26, %v386_v16  ;;  %v1244_v36 = vadd.f32 %v936_v2, %v386_v16 }
 0x12c   : > { %v944_v32 = vadd.f32 %v1240_v29, %v1239_v25  ;;  %v940_v33 = vadd.f32 %v1241_v27, %v939_v28 }
 0x12e   : > { %v941_v34 = vadd.f32 %v1242_v30, %v940_v33  ;;  %v945_v35 = vadd.f32 %v1243_v31, %v944_v32 }
 0x130   : > { %942 = vadd.xlane.f32.xlu1 %v941_v34  ;;  %v946_v37 = vadd.f32 %v1244_v36, %v945_v35 }
 0x134   : > { %947 = vadd.xlane.f32.xlu1 %v946_v37 }
 0x145   : > { %995 = vperm.xlu1 %1264, %v991_v38  }
 0x149   : > { %1000 = vperm.xlu1 %1264, %v992_v39  }
 0x14d   : > { %1015 = vperm.xlu1 %1264, %v1011_v40  }
 0x1bd   : > { %v943_v41 = vpop.xlane.xlu1 %942 }
 0x1be   : > { %v949_v42 = vmul.f32 0.001953125, %v943_v41 }
 0x1c0   : > { %v951_v43 = vsub.f32 %v1237_v19, %v949_v42  ;;  %v952_v44 = vsub.f32 %v1238_v22, %v949_v42  ;;  %v953_v45 = vsub.f32 %v1241_v27, %v949_v42  ;;  %v954_v47 = vsub.f32 %v1242_v30, %v949_v42 }
 0x1c1   : > { %v948_v46 = vpop.xlane.xlu1 %947 }
 0x1c2   : > { %v950_v48 = vmul.f32 0.001953125, %v948_v46  ;;  %v959_v49 = vmul.f32 %v951_v43, %v951_v43  ;;  %v960_v50 = vmul.f32 %v952_v44, %v952_v44  ;;  %v961_v51 = vmul.f32 %v953_v45, %v953_v45 }
 0x1c3   : > { %v962_v56 = vmul.f32 %v954_v47, %v954_v47 }
 0x1c4   : > { %v955_v52 = vsub.f32 %v1239_v25, %v950_v48  ;;  %v956_v53 = vsub.f32 %v1240_v29, %v950_v48  ;;  %v967_v54 = vadd.f32 %v960_v50, %v959_v49  ;;  %v957_v55 = vsub.f32 %v1243_v31, %v950_v48 }
 0x1c5   : > { %v958_v58 = vsub.f32 %v1244_v36, %v950_v48  ;;  %v996_v5 = vpop.permute.xlu1 %995 }
 0x1c6   : > { %v968_v57 = vadd.f32 %v967_v54, %v961_v51  ;;  %v963_v59 = vmul.f32 %v955_v52, %v955_v52  ;;  %v964_v60 = vmul.f32 %v956_v53, %v956_v53  ;;  %v965_v62 = vmul.f32 %v957_v55, %v957_v55 }
 0x1c7   : > { %v966_v0 = vmul.f32 %v958_v58, %v958_v58 }
 0x1c8   : > { %v969_v61 = vadd.f32 %v968_v57, %v962_v56  ;;  %v972_v63 = vadd.f32 %v964_v60, %v963_v59 }
 0x1c9   : > { %v1001_v6 = vpop.permute.xlu1 %1000 }
 0x1ca   : > { %970 = vadd.xlane.f32.xlu0 %v969_v61  ;;  %v973_v1 = vadd.f32 %v972_v63, %v965_v62 }
 0x1cc   : > { %v974_v3 = vadd.f32 %v973_v1, %v966_v0 }
 0x1cd   : > { %v1016_v7 = vpop.permute.xlu1 %1015 }
 0x1ce   : > { %975 = vadd.xlane.f32.xlu1 %v974_v3 }
 0x1df   : > { %1020 = vperm.xlu1 %1264, %v1012_v4  }
 0x257   : > { %v971_v8 = vpop.xlane.xlu0 %970 }
 0x258   : > { %v977_v9 = vmul.f32 0.001953125, %v971_v8 }
 0x25a   : > { %v979_v10 = vadd.f32 1e-05, %v977_v9 }
 0x25b   : > { %v976_v11 = vpop.xlane.xlu1 %975 }
 0x25c   : > { %1377 = vrsqrt.f32 %v979_v10  ;;  %v978_v12 = vmul.f32 0.001953125, %v976_v11 }
 0x25e   : > { %v980_v13 = vadd.f32 1e-05, %v978_v12 }
 0x25f   : > { %v1021_v39 = vpop.permute.xlu1 %1020 }
 0x260   : > { %1379 = vrsqrt.f32 %v980_v13 }
 0x266   : > { %v1378_v14 = vpop.eup %1377 }
 0x267   : > { %v983_v15 = vmul.f32 %v1378_v14, %v951_v43  ;;  %v984_v16 = vmul.f32 %v1378_v14, %v952_v44  ;;  %v985_v17 = vmul.f32 %v1378_v14, %v953_v45  ;;  %v986_v18 = vmul.f32 %v1378_v14, %v954_v47 }
 0x269   : > { %v1003_v19 = vmul.f32 %v996_v5, %v983_v15  ;;  %v1004_v20 = vmul.f32 %v996_v5, %v984_v16  ;;  %v1005_v21 = vmul.f32 %v996_v5, %v985_v17  ;;  %v1006_v22 = vmul.f32 %v996_v5, %v986_v18 }
 0x26a   : > { %v1380_v23 = vpop.eup %1379 }
 0x26b   : > { %v987_v24 = vmul.f32 %v1380_v23, %v955_v52  ;;  %v988_v25 = vmul.f32 %v1380_v23, %v956_v53  ;;  %v989_v26 = vmul.f32 %v1380_v23, %v957_v55  ;;  %v990_v2 = vmul.f32 %v1380_v23, %v958_v58 }
 0x26c   : > { %v1023_v27 = vadd.f32 %v1016_v7, %v1003_v19  ;;  %v1024_v28 = vadd.f32 %v1016_v7, %v1004_v20  ;;  %v1025_v29 = vadd.f32 %v1016_v7, %v1005_v21  ;;  %v1026_v30 = vadd.f32 %v1016_v7, %v1006_v22 }
 0x26d   : > { %v1007_v31 = vmul.f32 %v1001_v6, %v987_v24  ;;  %v1008_v32 = vmul.f32 %v1001_v6, %v988_v25  ;;  %v1009_v33 = vmul.f32 %v1001_v6, %v989_v26  ;;  %v1010_v34 = vmul.f32 %v1001_v6, %v990_v2 }
 0x26e   : > { %v1031_v35 = vmax.f32 %v1023_v27, 0.0  ;;  %v1032_v36 = vmax.f32 %v1024_v28, 0.0  ;;  %v1033_v37 = vmax.f32 %v1025_v29, 0.0  ;;  %v1034_v38 = vmax.f32 %v1026_v30, 0.0 }
 0x26f   : > { %v1027_v40 = vadd.f32 %v1021_v39, %v1007_v31  ;;  %v1028_v41 = vadd.f32 %v1021_v39, %v1008_v32  ;;  %v1029_v42 = vadd.f32 %v1021_v39, %v1009_v33  ;;  %v1030_v43 = vadd.f32 %v1021_v39, %v1010_v34 }
 0x270   : > { %1039 = vst [vmem:[%s297_s22] sm:$0xff] %v1031_v35  ;;  %1040 = vst [vmem:[%s297_s22 + $0x8] sm:$0xff] %v1032_v36 }
 0x271   : > { %1041 = vst [vmem:[%s297_s22 + $0x10] sm:$0xff] %v1033_v37  ;;  %1042 = vst [vmem:[%s297_s22 + $0x18] sm:$0xff] %v1034_v38  ;;  %v1035_v44 = vmax.f32 %v1027_v40, 0.0  ;;  %v1036_v45 = vmax.f32 %v1028_v41, 0.0  ;;  %v1037_v46 = vmax.f32 %v1029_v42, 0.0  ;;  %v1038_v47 = vmax.f32 %v1030_v43, 0.0 }
 0x273   : > { %1043 = vst [vmem:[%s297_s22 + $0x20] sm:$0xff] %v1035_v44  ;;  %1044 = vst [vmem:[%s297_s22 + $0x28] sm:$0xff] %v1036_v45 }
 0x274   : > { %1045 = vst [vmem:[%s297_s22 + $0x30] sm:$0xff] %v1037_v46  ;;  %1046 = vst [vmem:[%s297_s22 + $0x38] sm:$0xff] %v1038_v47 }
 0x275 PF: > { %s15_s18 = sadd.s32 1, %s1387_s18  }
 0x276   : > { %p12_p4 = scmp.ge.s32.totalorder %s15_s18, 4  }
 0x278   :  { %14 = sbr.rel (!%p12_p4) target bundleno = 1 (0x1), region = 79 }

// kernel: generator_forward.8
= control target key start
LH: loop header
LB: loop body
LE: loop exit
PB: predicated region body
PF: predicated region fallthrough
CT: control target
= control target key end

     0   :  { %s1509_s21 = smov 0   ;;  %s1783_s0 = inlined_call_operand.vmem [shape: bf16[32,288], index: 0, kind: input, shape index: {}]   ;;  %s1784_s1 = inlined_call_operand.vmem [shape: bf16[288,512], index: 1, kind: input, shape index: {}]   ;;  %s1785_s2 = inlined_call_operand.vmem [shape: f32[32,1], index: 2, kind: input, shape index: {}]   ;;  %s1786_s3 = inlined_call_operand.vmem [shape: f32[32,1], index: 3, kind: input, shape index: {}]   ;;  %s1787_s4 = inlined_call_operand.vmem [shape: f32[32,1], index: 4, kind: input, shape index: {}]   ;;  %s1788_s5 = inlined_call_operand.vmem [shape: f32[32,512], index: 5, kind: input, shape index: {}]   ;;  %s1789_s6 = inlined_call_operand.vmem [shape: f32[32,512], index: 6, kind: output, shape index: {}]  }
   0x1 LB: > { %s1221_s22 = sadd.s32 4294967295, %s1471_s21   ;;  %p1225_p0 = scmp.ge.s32.totalorder %s1471_s21, 1  ;;  %s1471_s21 = sphi %s1509_s21, %s16_s21  }
   0x2   : > { %p259_p1 = scmp.lt.s32.totalorder %s1471_s21, 3 }
   0x4   : > { %p260_p2 = pnand %p1225_p0, %p259_p1 }
   0x5   : > { %v1349_v0 = vld [vmem:[%s1784_s1 + $0x4] ss:$16 sps:$4 sm:$0xff] (!%p260_p2)   ;;  %v1351_v1 = vld [vmem:[%s1784_s1 + $0xc] ss:$16 sps:$4 sm:$0xff] (!%p260_p2)   ;;  %v1473_v2 = vmov (!%p260_p2), 0   ;;  %s1226_s15 = sshll.u32 (!%p260_p2), %s1221_s22, 1 }
   0x6   : > { %263 = sbr.rel (%p260_p2) target bundleno = 631 (0x277), region = 44  ;;  %1347 = vset.pattern.permute.xlu0 (!%p260_p2), %v1473_v2  ;;  %1348 = vset.pattern.permute.xlu1 (!%p260_p2), %v1473_v2  ;;  %v1353_v3 = vld [vmem:[%s1784_s1] ss:$16 sps:$4 sm:$0xff] (!%p260_p2)   ;;  %v1354_v4 = vld [vmem:[%s1784_s1 + $0x8] ss:$16 sps:$4 sm:$0xff] (!%p260_p2)   ;;  %p313_p3 = scmp.lt.s32.totalorder (!%p260_p2), %s1226_s15, 3 }
   0x7   : > { %819 = vmatprep.subr.bf16.mxu0 (!%p260_p2), %v1349_v0  ;;  %905 = vmatprep.subr.bf16.mxu1 (!%p260_p2), %v1351_v1  ;;  %v1355_v5 = vld [vmem:[%s1784_s1 + $0x24] ss:$16 sps:$4 sm:$0xff] (!%p260_p2)   ;;  %v1357_v6 = vld [vmem:[%s1784_s1 + $0x2c] ss:$16 sps:$4 sm:$0xff] (!%p260_p2)   ;;  %v1359_v7 = vld [vmem:[%s1784_s1 + $0x20] ss:$16 sps:$4 sm:$0xff] (!%p260_p2)  }
   0x8   : > { %820 = vmatpush1.bf16.msra.mxu0 (!%p260_p2), %v1353_v3  ;;  %906 = vmatpush1.bf16.msra.mxu1 (!%p260_p2), %v1354_v4  ;;  %v1360_v8 = vld [vmem:[%s1784_s1 + $0x28] ss:$16 sps:$4 sm:$0xff] (!%p260_p2)   ;;  %v1361_v9 = vld [vmem:[%s1784_s1 + $0x44] ss:$16 sps:$4 sm:$0xff] (!%p260_p2)   ;;  %v1363_v10 = vld [vmem:[%s1784_s1 + $0x4c] ss:$16 sps:$4 sm:$0xff] (!%p260_p2)  }
   0x9   : > { %821 = vmatprep.subr.bf16.mxu0 (!%p260_p2), %v1355_v5  ;;  %907 = vmatprep.subr.bf16.mxu1 (!%p260_p2), %v1357_v6  ;;  %v1365_v11 = vld [vmem:[%s1784_s1 + $0x40] ss:$16 sps:$4 sm:$0xff] (!%p260_p2)   ;;  %v1366_v12 = vld [vmem:[%s1784_s1 + $0x48] ss:$16 sps:$4 sm:$0xff] (!%p260_p2)   ;;  %v1367_v13 = vld [vmem:[%s1784_s1 + $0x64] ss:$16 sps:$4 sm:$0xff] (!%p260_p2)  }
   0xa   : > { %v1369_v14 = vld [vmem:[%s1784_s1 + $0x6c] ss:$16 sps:$4 sm:$0xff] (!%p260_p2)   ;;  %v1371_v15 = vld [vmem:[%s1784_s1 + $0x60] ss:$16 sps:$4 sm:$0xff] (!%p260_p2)   ;;  %v1372_v16 = vld [vmem:[%s1784_s1 + $0x68] ss:$16 sps:$4 sm:$0xff] (!%p260_p2)  }
   0xb   : > { %v1373_v17 = vld [vmem:[%s1784_s1 + $0x84] ss:$16 sps:$4 sm:$0xff] (!%p260_p2)   ;;  %v1375_v18 = vld [vmem:[%s1784_s1 + $0x8c] ss:$16 sps:$4 sm:$0xff] (!%p260_p2)   ;;  %v1377_v19 = vld [vmem:[%s1784_s1 + $0x80] ss:$16 sps:$4 sm:$0xff] (!%p260_p2)  }
   0xc   : > { %822 = vmatpush1.bf16.msra.mxu0 (!%p260_p2), %v1359_v7  ;;  %908 = vmatpush1.bf16.msra.mxu1 (!%p260_p2), %v1360_v8  ;;  %v1378_v20 = vld [vmem:[%s1784_s1 + $0x88] ss:$16 sps:$4 sm:$0xff] (!%p260_p2)   ;;  %v1379_v21 = vld [vmem:[%s1784_s1 + $0xa4] ss:$16 sps:$4 sm:$0xff] (!%p260_p2)   ;;  %v1381_v22 = vld [vmem:[%s1784_s1 + $0xac] ss:$16 sps:$4 sm:$0xff] (!%p260_p2)  }
   0xd   : > { %823 = vmatprep.subr.bf16.mxu0 %v1361_v9  ;;  %909 = vmatprep.subr.bf16.mxu1 %v1363_v10  ;;  %v1383_v23 = vld [vmem:[%s1784_s1 + $0xa0] ss:$16 sps:$4 sm:$0xff]   ;;  %v1384_v24 = vld [vmem:[%s1784_s1 + $0xa8] ss:$16 sps:$4 sm:$0xff]   ;;  %v1385_v25 = vld [vmem:[%s1784_s1 + $0xc4] ss:$16 sps:$4 sm:$0xff]  }
   0xe   : > { %v1387_v26 = vld [vmem:[%s1784_s1 + $0xcc] ss:$16 sps:$4 sm:$0xff]   ;;  %v1389_v27 = vld [vmem:[%s1784_s1 + $0xc0] ss:$16 sps:$4 sm:$0xff]   ;;  %v1390_v28 = vld [vmem:[%s1784_s1 + $0xc8] ss:$16 sps:$4 sm:$0xff]  }
   0xf   : > { %v1391_v29 = vld [vmem:[%s1784_s1 + $0xe4] ss:$16 sps:$4 sm:$0xff]   ;;  %v1393_v30 = vld [vmem:[%s1784_s1 + $0xec] ss:$16 sps:$4 sm:$0xff]   ;;  %v1395_v31 = vld [vmem:[%s1784_s1 + $0xe0] ss:$16 sps:$4 sm:$0xff]  }
  0x10   : > { %824 = vmatpush1.bf16.msra.mxu0 %v1365_v11  ;;  %910 = vmatpush1.bf16.msra.mxu1 %v1366_v12  ;;  %v1396_v32 = vld [vmem:[%s1784_s1 + $0xe8] ss:$16 sps:$4 sm:$0xff]   ;;  %v1397_v33 = vld [vmem:[%s1784_s1 + $0x104] ss:$16 sps:$4 sm:$0xff]   ;;  %v1399_v34 = vld [vmem:[%s1784_s1 + $0x10c] ss:$16 sps:$4 sm:$0xff]  }
  0x11   : > { %825 = vmatprep.subr.bf16.mxu0 %v1367_v13  ;;  %911 = vmatprep.subr.bf16.mxu1 %v1369_v14  ;;  %v1401_v35 = vld [vmem:[%s1784_s1 + $0x100] ss:$16 sps:$4 sm:$0xff]   ;;  %v1402_v36 = vld [vmem:[%s1784_s1 + $0x108] ss:$16 sps:$4 sm:$0xff]   ;;  %v1403_v37 = vld [vmem:[%s1784_s1 + $0x124] ss:$16 sps:$4 sm:$0xff]  }
  0x12   : > { %v1405_v38 = vld [vmem:[%s1784_s1 + $0x12c] ss:$16 sps:$4 sm:$0xff]   ;;  %s1791_s15 = smov (!%p313_p3, %s1226_s15), 3  ;;  %v1407_v39 = vld [vmem:[%s1784_s1 + $0x120] ss:$16 sps:$4 sm:$0xff]   ;;  %vm815_vm0 = vcmask 261120  }
  0x13   : > { %v1408_v40 = vld [vmem:[%s1784_s1 + $0x128] ss:$16 sps:$4 sm:$0xff]   ;;  %v1409_v41 = vld [vmem:[%s1784_s1 + $0x144] ss:$16 sps:$4 sm:$0xff]   ;;  %v1411_v42 = vld [vmem:[%s1784_s1 + $0x14c] ss:$16 sps:$4 sm:$0xff]  }
  0x14   : > { %826 = vmatpush1.bf16.msra.mxu0 %v1371_v15  ;;  %912 = vmatpush1.bf16.msra.mxu1 %v1372_v16  ;;  %s1337_s18 = smul.u32 12, %s1791_s15  ;;  %v1413_v43 = vld [vmem:[%s1784_s1 + $0x140] ss:$16 sps:$4 sm:$0xff]   ;;  %v1414_v44 = vld [vmem:[%s1784_s1 + $0x148] ss:$16 sps:$4 sm:$0xff]   ;;  %s1671_s9 = sshll.u32 %s1791_s15, 3 }
  0x15   : > { %827 = vmatprep.subr.bf16.mxu0 %v1373_v17  ;;  %913 = vmatprep.subr.bf16.mxu1 %v1375_v18  ;;  %v1415_v45 = vld [vmem:[%s1784_s1 + $0x164] ss:$16 sps:$4 sm:$0xff]   ;;  %v1417_v46 = vld [vmem:[%s1784_s1 + $0x16c] ss:$16 sps:$4 sm:$0xff]   ;;  %v1419_v47 = vld [vmem:[%s1784_s1 + $0x160] ss:$16 sps:$4 sm:$0xff]   ;;  %s323_s23 = scalar_lea.vmem %s1785_s2, %s1671_s9  ;;  %s329_s26 = scalar_lea.vmem %s1786_s3, %s1671_s9 }
  0x16   : > { %s1665_s30 = scalar_lea.vmem %s1783_s0, %s1337_s18  ;;  %v1420_v48 = vld [vmem:[%s1784_s1 + $0x168] ss:$16 sps:$4 sm:$0xff]   ;;  %v1421_v49 = vld [vmem:[%s1784_s1 + $0x184] ss:$16 sps:$4 sm:$0xff]   ;;  %v1423_v51 = vld [vmem:[%s1784_s1 + $0x18c] ss:$16 sps:$4 sm:$0xff]   ;;  %s1765_s29 = scalar_lea.vmem %s1787_s4, %s1671_s9 }
  0x17   : > { %v1447_v50 = vld [vmem:[%s1665_s30 + $0x4] ss:$12 sps:$4 sm:$0xff]   ;;  %v1426_v53 = vld [vmem:[%s1784_s1 + $0x188] ss:$16 sps:$4 sm:$0xff]   ;;  %v1429_v55 = vld [vmem:[%s1784_s1 + $0x1ac] ss:$16 sps:$4 sm:$0xff]  }
  0x18   : > { %828 = vmatpush1.bf16.msra.mxu0 %v1377_v19  ;;  %914 = vmatpush1.bf16.msra.mxu1 %v1378_v20  ;;  %v1425_v52 = vld [vmem:[%s1784_s1 + $0x180] ss:$16 sps:$4 sm:$0xff]   ;;  %v1427_v54 = vld [vmem:[%s1784_s1 + $0x1a4] ss:$16 sps:$4 sm:$0xff]   ;;  %v1432_v58 = vld [vmem:[%s1784_s1 + $0x1a8] ss:$16 sps:$4 sm:$0xff]  }
  0x19   : > { %829 = vmatprep.subr.bf16.mxu0 %v1379_v21  ;;  %915 = vmatprep.subr.bf16.mxu1 %v1381_v22  ;;  %v428_v56 = vld [vmem:[%s323_s23] sm:$0xff]  ;;  %v429_v59 = vld [vmem:[%s323_s23 + $0x8] sm:$0xff]  ;;  %s1319_s9 = sshll.u32 %s1791_s15, 5 }
  0x1a   : > { %851 = vmatprep.mubr.bf16.mxu0 %v1447_v50  ;;  %937 = vmatprep.mubr.bf16.mxu1 %v1447_v50  ;;  %v1431_v57 = vld [vmem:[%s1784_s1 + $0x1a0] ss:$16 sps:$4 sm:$0xff]   ;;  %v1433_v60 = vld [vmem:[%s1784_s1 + $0x1c4] ss:$16 sps:$4 sm:$0xff]   ;;  %v1435_v61 = vld [vmem:[%s1784_s1 + $0x1cc] ss:$16 sps:$4 sm:$0xff]   ;;  %s342_s10 = scalar_lea.vmem %s1788_s5, %s1319_s9  ;;  %s349_s13 = scalar_lea.vmem %s1789_s6, %s1319_s9 }
  0x1b   : > { %432 = vperm.xlu0 %1347, %v428_v56   ;;  %v1437_v62 = vld [vmem:[%s1784_s1 + $0x1c0] ss:$16 sps:$4 sm:$0xff]   ;;  %v1438_v63 = vld [vmem:[%s1784_s1 + $0x1c8] ss:$16 sps:$4 sm:$0xff]   ;;  %v1439_v0 = vld [vmem:[%s1784_s1 + $0x1e4] ss:$16 sps:$4 sm:$0xff]  }
  0x1c   : > { %830 = vmatpush1.bf16.msra.mxu0 %v1383_v23  ;;  %916 = vmatpush1.bf16.msra.mxu1 %v1384_v24  ;;  %v1441_v1 = vld [vmem:[%s1784_s1 + $0x1ec] ss:$16 sps:$4 sm:$0xff]   ;;  %v1443_v3 = vld [vmem:[%s1784_s1 + $0x1e0] ss:$16 sps:$4 sm:$0xff]   ;;  %v1444_v4 = vld [vmem:[%s1784_s1 + $0x1e8] ss:$16 sps:$4 sm:$0xff]  }
  0x1d   : > { %831 = vmatprep.subr.bf16.mxu0 %v1385_v25  ;;  %917 = vmatprep.subr.bf16.mxu1 %v1387_v26  ;;  %v1451_v5 = vld [vmem:[%s1784_s1 + $0x204] ss:$16 sps:$4 sm:$0xff]   ;;  %v1454_v6 = vld [vmem:[%s1784_s1 + $0x20c] ss:$16 sps:$4 sm:$0xff]   ;;  %v1449_v8 = vld [vmem:[%s1784_s1 + $0x200] ss:$16 sps:$4 sm:$0xff]  }
  0x1e   : > { %v1445_v7 = vld [vmem:[%s1665_s30] ss:$12 sps:$4 sm:$0xff]   ;;  %v1452_v9 = vld [vmem:[%s1784_s1 + $0x208] ss:$16 sps:$4 sm:$0xff]   ;;  %v1457_v10 = vld [vmem:[%s1784_s1 + $0x224] ss:$16 sps:$4 sm:$0xff]  }
  0x1f   : > { %437 = vperm.xlu0 %1347, %v429_v59   ;;  %v1460_v11 = vld [vmem:[%s1784_s1 + $0x22c] ss:$16 sps:$4 sm:$0xff]   ;;  %v1455_v12 = vld [vmem:[%s1784_s1 + $0x220] ss:$16 sps:$4 sm:$0xff]   ;;  %v1458_v13 = vld [vmem:[%s1784_s1 + $0x228] ss:$16 sps:$4 sm:$0xff]  }
  0x20   : > { %832 = vmatpush1.bf16.msra.mxu0 %v1389_v27  ;;  %918 = vmatpush1.bf16.msra.mxu1 %v1390_v28  ;;  %v1448_v14 = vld [vmem:[%s1665_s30 + $0x8] ss:$12 sps:$4 sm:$0xff]  }
  0x21   : > { %833 = vmatprep.subr.bf16.mxu0 %v1391_v29  ;;  %919 = vmatprep.subr.bf16.mxu1 %v1393_v30 }
  0x24   : > { %834 = vmatpush1.bf16.msra.mxu0 %v1395_v31  ;;  %920 = vmatpush1.bf16.msra.mxu1 %v1396_v32 }
  0x25   : > { %835 = vmatprep.subr.bf16.mxu0 %v1397_v33  ;;  %921 = vmatprep.subr.bf16.mxu1 %v1399_v34 }
  0x28   : > { %836 = vmatpush1.bf16.msra.mxu0 %v1401_v35  ;;  %922 = vmatpush1.bf16.msra.mxu1 %v1402_v36 }
  0x29   : > { %837 = vmatprep.subr.bf16.mxu0 %v1403_v37  ;;  %923 = vmatprep.subr.bf16.mxu1 %v1405_v38  ;;  %v1043_v38 = vld [vmem:[%s329_s26] sm:$0xff] }
  0x2c   : > { %838 = vmatpush1.bf16.msra.mxu0 %v1407_v39  ;;  %924 = vmatpush1.bf16.msra.mxu1 %v1408_v40  ;;  %v1044_v39 = vld [vmem:[%s329_s26 + $0x8] sm:$0xff]  ;;  %v1063_v40 = vld [vmem:[%s1765_s29] sm:$0xff] }
  0x2d   : > { %839 = vmatprep.subr.bf16.mxu0 %v1409_v41  ;;  %925 = vmatprep.subr.bf16.mxu1 %v1411_v42 }
  0x30   : > { %840 = vmatpush1.bf16.msra.mxu0 %v1413_v43  ;;  %926 = vmatpush1.bf16.msra.mxu1 %v1414_v44 }
  0x31   : > { %841 = vmatprep.subr.bf16.mxu0 %v1415_v45  ;;  %927 = vmatprep.subr.bf16.mxu1 %v1417_v46 }
  0x34   : > { %842 = vmatpush1.bf16.msra.mxu0 %v1419_v47  ;;  %928 = vmatpush1.bf16.msra.mxu1 %v1420_v48 }
  0x35   : > { %843 = vmatprep.subr.bf16.mxu0 %v1421_v49  ;;  %929 = vmatprep.subr.bf16.mxu1 %v1423_v51 }
  0x38   : > { %844 = vmatpush1.bf16.msra.mxu0 %v1425_v52  ;;  %930 = vmatpush1.bf16.msra.mxu1 %v1426_v53 }
  0x39   : > { %845 = vmatprep.subr.bf16.mxu0 %v1427_v54  ;;  %931 = vmatprep.subr.bf16.mxu1 %v1429_v55 }
  0x3c   : > { %846 = vmatpush1.bf16.msra.mxu0 %v1431_v57  ;;  %932 = vmatpush1.bf16.msra.mxu1 %v1432_v58 }
  0x3d   : > { %847 = vmatprep.subr.bf16.mxu0 %v1433_v60  ;;  %933 = vmatprep.subr.bf16.mxu1 %v1435_v61 }
  0x40   : > { %848 = vmatpush1.bf16.msra.mxu0 %v1437_v62  ;;  %934 = vmatpush1.bf16.msra.mxu1 %v1438_v63 }
  0x41   : > { %849 = vmatprep.subr.bf16.mxu0 %v1439_v0  ;;  %935 = vmatprep.subr.bf16.mxu1 %v1441_v1 }
  0x44   : > { %850 = vmatpush1.bf16.msra.mxu0 %v1443_v3  ;;  %936 = vmatpush1.bf16.msra.mxu1 %v1444_v4  ;;  %v1064_v4 = vld [vmem:[%s1765_s29 + $0x8] sm:$0xff] }
  0x45   : > { %862 = vmatprep.subr.bf16.mxu0 %v1451_v5  ;;  %948 = vmatprep.subr.bf16.mxu1 %v1454_v6 }
  0x47   : > { %852 = vmatmul.mubr.bf16.vlgmr.msra.gmra.mrb[0].mxu0 %v1445_v7  ;;  %938 = vmatmul.mubr.bf16.vlgmr.msra.gmra.mrb[0].mxu1 %v1445_v7 }
  0x48   : > { %863 = vmatpush1.bf16.msra.mxu0 %v1449_v8  ;;  %949 = vmatpush1.bf16.msra.mxu1 %v1452_v9 }
  0x49   : > { %864 = vmatprep.subr.bf16.mxu0 %v1457_v10  ;;  %950 = vmatprep.subr.bf16.mxu1 %v1460_v11 }
  0x4a   : > { %894 = vmatprep.mubr.bf16.mxu0 %v1473_v2  ;;  %980 = vmatprep.mubr.bf16.mxu1 %v1473_v2 }
  0x4c   : > { %865 = vmatpush1.bf16.msra.mxu0 %v1455_v12  ;;  %951 = vmatpush1.bf16.msra.mxu1 %v1458_v13 }
  0x53   : > { %1315 = vmatmul.mubr.msk.bf16.vlgmr.msra.gmra.mrb[0].mxu0 %vm815_vm0, %v1448_v14  ;;  %1316 = vmatmul.mubr.msk.bf16.vlgmr.msra.gmra.mrb[0].mxu1 %vm815_vm0, %v1448_v14 }
  0x9a   : > { %v433_v15 = vpop.permute.xlu0 %432 }
  0x9e   : > { %v438_v16 = vpop.permute.xlu0 %437 }
 0x126   : > { %v896_v17 = vpop.f32.mrb[0].mxu0  ;;  %v982_v18 = vpop.f32.mrb[0].mxu1 }
 0x127   : > { %v1321_v19 = vadd.f32 %v896_v17, %v433_v15  ;;  %v898_v20 = vpop.f32.mrb[1].mxu0  ;;  %v984_v21 = vpop.f32.mrb[1].mxu1  ;;  %v1325_v27 = vadd.f32 %v982_v18, %v433_v15 }
 0x128   : > { %v1322_v22 = vadd.f32 %v898_v20, %v433_v15  ;;  %v900_v23 = vpop.f32.mrb[2].mxu0  ;;  %v986_v24 = vpop.f32.mrb[2].mxu1  ;;  %v1326_v30 = vadd.f32 %v984_v21, %v433_v15 }
 0x129   : > { %v1323_v25 = vadd.f32 %v900_v23, %v438_v16  ;;  %v902_v26 = vpop.f32.mrb[3].mxu0  ;;  %v988_v2 = vpop.f32.mrb[3].mxu1  ;;  %v1327_v31 = vadd.f32 %v986_v24, %v438_v16  ;;  %v1083_v24 = vld [vmem:[%s342_s10] sm:$0xff] }
 0x12a   : > { %v991_v28 = vadd.f32 %v1322_v22, %v1321_v19  ;;  %v1324_v29 = vadd.f32 %v902_v26, %v438_v16  ;;  %v1328_v36 = vadd.f32 %v988_v2, %v438_v16 }
 0x12c   : > { %v996_v32 = vadd.f32 %v1324_v29, %v1323_v25  ;;  %v992_v33 = vadd.f32 %v1325_v27, %v991_v28  ;;  %v1084_v28 = vld [vmem:[%s342_s10 + $0x8] sm:$0xff] }
 0x12e   : > { %v993_v34 = vadd.f32 %v1326_v30, %v992_v33  ;;  %v997_v35 = vadd.f32 %v1327_v31, %v996_v32 }
 0x130   : > { %994 = vadd.xlane.f32.xlu1 %v993_v34  ;;  %v998_v37 = vadd.f32 %v1328_v36, %v997_v35 }
 0x134   : > { %999 = vadd.xlane.f32.xlu1 %v998_v37 }
 0x145   : > { %1047 = vperm.xlu1 %1348, %v1043_v38  }
 0x149   : > { %1052 = vperm.xlu1 %1348, %v1044_v39   ;;  %v1087_v39 = vld [vmem:[%s342_s10 + $0x20] sm:$0xff] }
 0x14d   : > { %1067 = vperm.xlu1 %1348, %v1063_v40   ;;  %v1088_v40 = vld [vmem:[%s342_s10 + $0x28] sm:$0xff] }
 0x1bd   : > { %v995_v41 = vpop.xlane.xlu1 %994 }
 0x1be   : > { %v1001_v42 = vmul.f32 0.001953125, %v995_v41  ;;  %v1089_v41 = vld [vmem:[%s342_s10 + $0x30] sm:$0xff] }
 0x1c0   : > { %v1003_v43 = vsub.f32 %v1321_v19, %v1001_v42  ;;  %v1004_v44 = vsub.f32 %v1322_v22, %v1001_v42  ;;  %v1005_v45 = vsub.f32 %v1325_v27, %v1001_v42  ;;  %v1006_v47 = vsub.f32 %v1326_v30, %v1001_v42  ;;  %v1086_v30 = vld [vmem:[%s342_s10 + $0x18] sm:$0xff] }
 0x1c1   : > { %v1000_v46 = vpop.xlane.xlu1 %999  ;;  %v1090_v42 = vld [vmem:[%s342_s10 + $0x38] sm:$0xff] }
 0x1c2   : > { %v1002_v48 = vmul.f32 0.001953125, %v1000_v46  ;;  %v1011_v49 = vmul.f32 %v1003_v43, %v1003_v43  ;;  %v1012_v50 = vmul.f32 %v1004_v44, %v1004_v44  ;;  %v1013_v51 = vmul.f32 %v1005_v45, %v1005_v45 }
 0x1c3   : > { %v1014_v56 = vmul.f32 %v1006_v47, %v1006_v47 }
 0x1c4   : > { %v1007_v52 = vsub.f32 %v1323_v25, %v1002_v48  ;;  %v1008_v53 = vsub.f32 %v1324_v29, %v1002_v48  ;;  %v1019_v54 = vadd.f32 %v1012_v50, %v1011_v49  ;;  %v1009_v55 = vsub.f32 %v1327_v31, %v1002_v48  ;;  %v1085_v29 = vld [vmem:[%s342_s10 + $0x10] sm:$0xff] }
 0x1c5   : > { %v1010_v58 = vsub.f32 %v1328_v36, %v1002_v48  ;;  %v1048_v5 = vpop.permute.xlu1 %1047 }
 0x1c6   : > { %v1020_v57 = vadd.f32 %v1019_v54, %v1013_v51  ;;  %v1015_v59 = vmul.f32 %v1007_v52, %v1007_v52  ;;  %v1016_v60 = vmul.f32 %v1008_v53, %v1008_v53  ;;  %v1017_v62 = vmul.f32 %v1009_v55, %v1009_v55 }
 0x1c7   : > { %v1018_v0 = vmul.f32 %v1010_v58, %v1010_v58 }
 0x1c8   : > { %v1021_v61 = vadd.f32 %v1020_v57, %v1014_v56  ;;  %v1024_v63 = vadd.f32 %v1016_v60, %v1015_v59 }
 0x1c9   : > { %v1053_v6 = vpop.permute.xlu1 %1052 }
 0x1ca   : > { %1022 = vadd.xlane.f32.xlu0 %v1021_v61  ;;  %v1025_v1 = vadd.f32 %v1024_v63, %v1017_v62 }
 0x1cc   : > { %v1026_v3 = vadd.f32 %v1025_v1, %v1018_v0 }
 0x1cd   : > { %v1068_v7 = vpop.permute.xlu1 %1067 }
 0x1ce   : > { %1027 = vadd.xlane.f32.xlu1 %v1026_v3 }
 0x1df   : > { %1072 = vperm.xlu1 %1348, %v1064_v4  }
 0x257   : > { %v1023_v8 = vpop.xlane.xlu0 %1022 }
 0x258   : > { %v1029_v9 = vmul.f32 0.001953125, %v1023_v8 }
 0x25a   : > { %v1031_v10 = vadd.f32 1e-05, %v1029_v9 }
 0x25b   : > { %v1028_v11 = vpop.xlane.xlu1 %1027 }
 0x25c   : > { %1461 = vrsqrt.f32 %v1031_v10  ;;  %v1030_v12 = vmul.f32 0.001953125, %v1028_v11 }
 0x25e   : > { %v1032_v13 = vadd.f32 1e-05, %v1030_v12 }
 0x260   : > { %1463 = vrsqrt.f32 %v1032_v13 }
 0x266   : > { %v1462_v14 = vpop.eup %1461 }
 0x267   : > { %v1035_v15 = vmul.f32 %v1462_v14, %v1003_v43  ;;  %v1036_v16 = vmul.f32 %v1462_v14, %v1004_v44  ;;  %v1037_v17 = vmul.f32 %v1462_v14, %v1005_v45  ;;  %v1038_v18 = vmul.f32 %v1462_v14, %v1006_v47  ;;  %v1073_v47 = vpop.permute.xlu1 %1072 }
 0x269   : > { %v1055_v19 = vmul.f32 %v1048_v5, %v1035_v15  ;;  %v1056_v20 = vmul.f32 %v1048_v5, %v1036_v16  ;;  %v1057_v21 = vmul.f32 %v1048_v5, %v1037_v17  ;;  %v1058_v22 = vmul.f32 %v1048_v5, %v1038_v18 }
 0x26a   : > { %v1464_v23 = vpop.eup %1463 }
 0x26b   : > { %v1039_v25 = vmul.f32 %v1464_v23, %v1007_v52  ;;  %v1040_v26 = vmul.f32 %v1464_v23, %v1008_v53  ;;  %v1041_v2 = vmul.f32 %v1464_v23, %v1009_v55  ;;  %v1042_v27 = vmul.f32 %v1464_v23, %v1010_v58 }
 0x26c   : > { %v1075_v31 = vadd.f32 %v1068_v7, %v1055_v19  ;;  %v1076_v32 = vadd.f32 %v1068_v7, %v1056_v20  ;;  %v1077_v33 = vadd.f32 %v1068_v7, %v1057_v21  ;;  %v1078_v34 = vadd.f32 %v1068_v7, %v1058_v22 }
 0x26d   : > { %v1059_v35 = vmul.f32 %v1053_v6, %v1039_v25  ;;  %v1060_v36 = vmul.f32 %v1053_v6, %v1040_v26  ;;  %v1061_v37 = vmul.f32 %v1053_v6, %v1041_v2  ;;  %v1062_v38 = vmul.f32 %v1053_v6, %v1042_v27 }
 0x26e   : > { %v1091_v43 = vadd.f32 %v1083_v24, %v1075_v31  ;;  %v1092_v44 = vadd.f32 %v1084_v28, %v1076_v32  ;;  %v1093_v45 = vadd.f32 %v1085_v29, %v1077_v33  ;;  %v1094_v46 = vadd.f32 %v1086_v30, %v1078_v34 }
 0x26f   : > { %v1079_v48 = vadd.f32 %v1073_v47, %v1059_v35  ;;  %v1080_v49 = vadd.f32 %v1073_v47, %v1060_v36  ;;  %v1081_v50 = vadd.f32 %v1073_v47, %v1061_v37  ;;  %v1082_v51 = vadd.f32 %v1073_v47, %v1062_v38 }
 0x270   : > { %v1099_v52 = vmax.f32 %v1091_v43, 0.0  ;;  %v1100_v53 = vmax.f32 %v1092_v44, 0.0  ;;  %v1101_v54 = vmax.f32 %v1093_v45, 0.0  ;;  %v1102_v55 = vmax.f32 %v1094_v46, 0.0 }
 0x271   : > { %v1095_v56 = vadd.f32 %v1087_v39, %v1079_v48  ;;  %v1096_v57 = vadd.f32 %v1088_v40, %v1080_v49  ;;  %v1097_v58 = vadd.f32 %v1089_v41, %v1081_v50  ;;  %v1098_v59 = vadd.f32 %v1090_v42, %v1082_v51 }
 0x272   : > { %1107 = vst [vmem:[%s349_s13] sm:$0xff] %v1099_v52  ;;  %1108 = vst [vmem:[%s349_s13 + $0x8] sm:$0xff] %v1100_v53 }
 0x273   : > { %1109 = vst [vmem:[%s349_s13 + $0x10] sm:$0xff] %v1101_v54  ;;  %1110 = vst [vmem:[%s349_s13 + $0x18] sm:$0xff] %v1102_v55  ;;  %v1103_v60 = vmax.f32 %v1095_v56, 0.0  ;;  %v1104_v61 = vmax.f32 %v1096_v57, 0.0  ;;  %v1105_v62 = vmax.f32 %v1097_v58, 0.0  ;;  %v1106_v63 = vmax.f32 %v1098_v59, 0.0 }
 0x275   : > { %1111 = vst [vmem:[%s349_s13 + $0x20] sm:$0xff] %v1103_v60  ;;  %1112 = vst [vmem:[%s349_s13 + $0x28] sm:$0xff] %v1104_v61 }
 0x276   : > { %1113 = vst [vmem:[%s349_s13 + $0x30] sm:$0xff] %v1105_v62  ;;  %1114 = vst [vmem:[%s349_s13 + $0x38] sm:$0xff] %v1106_v63 }
 0x277 PF: > { %s16_s21 = sadd.s32 1, %s1471_s21  }
 0x278   : > { %p13_p4 = scmp.ge.s32.totalorder %s16_s21, 4  }
 0x27a   :  { %15 = sbr.rel (!%p13_p4) target bundleno = 1 (0x1), region = 86 }

// kernel: generator_forward.11
= control target key start
LH: loop header
LB: loop body
LE: loop exit
PB: predicated region body
PF: predicated region fallthrough
CT: control target
= control target key end

     0   :  { %vm2431_vm0 = vcmask 261120   ;;  %s5423_s1 = inlined_call_operand.vmem [shape: bf16[1568,512], index: 1, kind: input, shape index: {}]   ;;  %s5424_s0 = inlined_call_operand.vmem [shape: bf16[8,1568], index: 0, kind: input, shape index: {}]   ;;  %s5425_s2 = inlined_call_operand.vmem [shape: f32[8,1], index: 2, kind: input, shape index: {}, may-alias: {2,4}]   ;;  %s5426_s3 = inlined_call_operand.vmem [shape: f32[8,1], index: 3, kind: input, shape index: {}]   ;;  %s5427_s4 = inlined_call_operand.vmem [shape: f32[8,1], index: 4, kind: input, shape index: {}, may-alias: {2,4}]   ;;  %s5428_s5 = inlined_call_operand.vmem [shape: f32[8,512], index: 5, kind: output, shape index: {}]  }
   0x1   :  { %v3529_v0 = vld [vmem:[%s5423_s1 + $0x4] ss:$16 sps:$4 sm:$0xff]   ;;  %v3531_v1 = vld [vmem:[%s5423_s1 + $0xc] ss:$16 sps:$4 sm:$0xff]   ;;  %v3533_v2 = vld [vmem:[%s5423_s1] ss:$16 sps:$4 sm:$0xff]  }
   0x2   :  { %2435 = vmatprep.subr.bf16.mxu0 %v3529_v0  ;;  %v3534_v3 = vld [vmem:[%s5423_s1 + $0x8] ss:$16 sps:$4 sm:$0xff]   ;;  %2722 = vmatprep.subr.bf16.mxu1 %v3531_v1  ;;  %v3535_v4 = vld [vmem:[%s5423_s1 + $0x24] ss:$16 sps:$4 sm:$0xff]   ;;  %v3537_v5 = vld [vmem:[%s5423_s1 + $0x2c] ss:$16 sps:$4 sm:$0xff]  }
   0x3   :  { %2436 = vmatpush1.bf16.msra.mxu0 %v3533_v2  ;;  %2723 = vmatpush1.bf16.msra.mxu1 %v3534_v3  ;;  %v3539_v6 = vld [vmem:[%s5423_s1 + $0x20] ss:$16 sps:$4 sm:$0xff]   ;;  %v3540_v7 = vld [vmem:[%s5423_s1 + $0x28] ss:$16 sps:$4 sm:$0xff]   ;;  %v3541_v8 = vld [vmem:[%s5423_s1 + $0x44] ss:$16 sps:$4 sm:$0xff]  }
   0x4   :  { %2437 = vmatprep.subr.bf16.mxu0 %v3535_v4  ;;  %2724 = vmatprep.subr.bf16.mxu1 %v3537_v5  ;;  %v3543_v9 = vld [vmem:[%s5423_s1 + $0x4c] ss:$16 sps:$4 sm:$0xff]   ;;  %v3545_v10 = vld [vmem:[%s5423_s1 + $0x40] ss:$16 sps:$4 sm:$0xff]   ;;  %v3546_v11 = vld [vmem:[%s5423_s1 + $0x48] ss:$16 sps:$4 sm:$0xff]  }
   0x5   :  { %v3547_v12 = vld [vmem:[%s5423_s1 + $0x64] ss:$16 sps:$4 sm:$0xff]   ;;  %v3549_v13 = vld [vmem:[%s5423_s1 + $0x6c] ss:$16 sps:$4 sm:$0xff]   ;;  %v3551_v14 = vld [vmem:[%s5423_s1 + $0x60] ss:$16 sps:$4 sm:$0xff]  }
   0x6   :  { %v3552_v15 = vld [vmem:[%s5423_s1 + $0x68] ss:$16 sps:$4 sm:$0xff]   ;;  %v3553_v16 = vld [vmem:[%s5423_s1 + $0x84] ss:$16 sps:$4 sm:$0xff]   ;;  %v3555_v17 = vld [vmem:[%s5423_s1 + $0x8c] ss:$16 sps:$4 sm:$0xff]  }
   0x7   :  { %2438 = vmatpush1.bf16.msra.mxu0 %v3539_v6  ;;  %2725 = vmatpush1.bf16.msra.mxu1 %v3540_v7  ;;  %v3557_v18 = vld [vmem:[%s5423_s1 + $0x80] ss:$16 sps:$4 sm:$0xff]   ;;  %v3558_v19 = vld [vmem:[%s5423_s1 + $0x88] ss:$16 sps:$4 sm:$0xff]   ;;  %v3559_v20 = vld [vmem:[%s5423_s1 + $0xa4] ss:$16 sps:$4 sm:$0xff]  }
   0x8   :  { %2439 = vmatprep.subr.bf16.mxu0 %v3541_v8  ;;  %2726 = vmatprep.subr.bf16.mxu1 %v3543_v9  ;;  %v3561_v21 = vld [vmem:[%s5423_s1 + $0xac] ss:$16 sps:$4 sm:$0xff]   ;;  %v3563_v22 = vld [vmem:[%s5423_s1 + $0xa0] ss:$16 sps:$4 sm:$0xff]   ;;  %v3564_v23 = vld [vmem:[%s5423_s1 + $0xa8] ss:$16 sps:$4 sm:$0xff]  }
   0x9   :  { %v3565_v24 = vld [vmem:[%s5423_s1 + $0xc4] ss:$16 sps:$4 sm:$0xff]   ;;  %v3567_v25 = vld [vmem:[%s5423_s1 + $0xcc] ss:$16 sps:$4 sm:$0xff]   ;;  %v3569_v26 = vld [vmem:[%s5423_s1 + $0xc0] ss:$16 sps:$4 sm:$0xff]  }
   0xa   :  { %v3570_v27 = vld [vmem:[%s5423_s1 + $0xc8] ss:$16 sps:$4 sm:$0xff]   ;;  %v3571_v28 = vld [vmem:[%s5423_s1 + $0xe4] ss:$16 sps:$4 sm:$0xff]   ;;  %v3573_v29 = vld [vmem:[%s5423_s1 + $0xec] ss:$16 sps:$4 sm:$0xff]  }
   0xb   :  { %2440 = vmatpush1.bf16.msra.mxu0 %v3545_v10  ;;  %2727 = vmatpush1.bf16.msra.mxu1 %v3546_v11  ;;  %v3575_v30 = vld [vmem:[%s5423_s1 + $0xe0] ss:$16 sps:$4 sm:$0xff]   ;;  %v3576_v31 = vld [vmem:[%s5423_s1 + $0xe8] ss:$16 sps:$4 sm:$0xff]   ;;  %v3577_v32 = vld [vmem:[%s5423_s1 + $0x104] ss:$16 sps:$4 sm:$0xff]  }
   0xc   :  { %2441 = vmatprep.subr.bf16.mxu0 %v3547_v12  ;;  %2728 = vmatprep.subr.bf16.mxu1 %v3549_v13  ;;  %v3579_v33 = vld [vmem:[%s5423_s1 + $0x10c] ss:$16 sps:$4 sm:$0xff]   ;;  %v3581_v34 = vld [vmem:[%s5423_s1 + $0x100] ss:$16 sps:$4 sm:$0xff]   ;;  %v3582_v35 = vld [vmem:[%s5423_s1 + $0x108] ss:$16 sps:$4 sm:$0xff]  }
   0xd   :  { %v3583_v36 = vld [vmem:[%s5423_s1 + $0x124] ss:$16 sps:$4 sm:$0xff]   ;;  %v3585_v37 = vld [vmem:[%s5423_s1 + $0x12c] ss:$16 sps:$4 sm:$0xff]   ;;  %v3587_v38 = vld [vmem:[%s5423_s1 + $0x120] ss:$16 sps:$4 sm:$0xff]  }
   0xe   :  { %v3588_v39 = vld [vmem:[%s5423_s1 + $0x128] ss:$16 sps:$4 sm:$0xff]   ;;  %v3589_v40 = vld [vmem:[%s5423_s1 + $0x144] ss:$16 sps:$4 sm:$0xff]   ;;  %v3591_v41 = vld [vmem:[%s5423_s1 + $0x14c] ss:$16 sps:$4 sm:$0xff]  }
   0xf   :  { %2442 = vmatpush1.bf16.msra.mxu0 %v3551_v14  ;;  %2729 = vmatpush1.bf16.msra.mxu1 %v3552_v15  ;;  %v3593_v42 = vld [vmem:[%s5423_s1 + $0x140] ss:$16 sps:$4 sm:$0xff]   ;;  %v3594_v43 = vld [vmem:[%s5423_s1 + $0x148] ss:$16 sps:$4 sm:$0xff]   ;;  %v3595_v44 = vld [vmem:[%s5423_s1 + $0x164] ss:$16 sps:$4 sm:$0xff]  }
  0x10   :  { %2443 = vmatprep.subr.bf16.mxu0 %v3553_v16  ;;  %2730 = vmatprep.subr.bf16.mxu1 %v3555_v17  ;;  %v3597_v45 = vld [vmem:[%s5423_s1 + $0x16c] ss:$16 sps:$4 sm:$0xff]   ;;  %v21_v46 = vld [vmem:[%s5424_s0] sm:$0xff]  ;;  %v3600_v49 = vld [vmem:[%s5423_s1 + $0x168] ss:$16 sps:$4 sm:$0xff]  }
  0x11   :  { %v3599_v47 = vld [vmem:[%s5423_s1 + $0x160] ss:$16 sps:$4 sm:$0xff]   ;;  %v3068_v48 = vcombine.high %v21_v46, %v21_v46  ;;  %v3601_v50 = vld [vmem:[%s5423_s1 + $0x184] ss:$16 sps:$4 sm:$0xff]   ;;  %v3603_v51 = vld [vmem:[%s5423_s1 + $0x18c] ss:$16 sps:$4 sm:$0xff]   ;;  %v3067_v4 = vcombine.low %v21_v46, %v21_v46 }
  0x12   :  { %v3605_v52 = vld [vmem:[%s5423_s1 + $0x180] ss:$16 sps:$4 sm:$0xff]   ;;  %v3606_v53 = vld [vmem:[%s5423_s1 + $0x188] ss:$16 sps:$4 sm:$0xff]   ;;  %v3607_v54 = vld [vmem:[%s5423_s1 + $0x1a4] ss:$16 sps:$4 sm:$0xff]  }
  0x13   :  { %2444 = vmatpush1.bf16.msra.mxu0 %v3557_v18  ;;  %2731 = vmatpush1.bf16.msra.mxu1 %v3558_v19  ;;  %v3609_v55 = vld [vmem:[%s5423_s1 + $0x1ac] ss:$16 sps:$4 sm:$0xff]   ;;  %v3611_v56 = vld [vmem:[%s5423_s1 + $0x1a0] ss:$16 sps:$4 sm:$0xff]   ;;  %v3612_v57 = vld [vmem:[%s5423_s1 + $0x1a8] ss:$16 sps:$4 sm:$0xff]  }
  0x14   :  { %2445 = vmatprep.subr.bf16.mxu0 %v3559_v20  ;;  %2732 = vmatprep.subr.bf16.mxu1 %v3561_v21  ;;  %v3613_v58 = vld [vmem:[%s5423_s1 + $0x1c4] ss:$16 sps:$4 sm:$0xff]   ;;  %v3615_v59 = vld [vmem:[%s5423_s1 + $0x1cc] ss:$16 sps:$4 sm:$0xff]   ;;  %v3617_v60 = vld [vmem:[%s5423_s1 + $0x1c0] ss:$16 sps:$4 sm:$0xff]  }
  0x15   :  { %2467 = vmatprep.mubr.bf16.mxu0 %v3068_v48  ;;  %2754 = vmatprep.mubr.bf16.mxu1 %v3068_v48  ;;  %v3618_v61 = vld [vmem:[%s5423_s1 + $0x1c8] ss:$16 sps:$4 sm:$0xff]   ;;  %v3619_v62 = vld [vmem:[%s5423_s1 + $0x1e4] ss:$16 sps:$4 sm:$0xff]   ;;  %v3621_v63 = vld [vmem:[%s5423_s1 + $0x1ec] ss:$16 sps:$4 sm:$0xff]  }
  0x16   :  { %v3623_v0 = vld [vmem:[%s5423_s1 + $0x1e0] ss:$16 sps:$4 sm:$0xff]   ;;  %v3624_v1 = vld [vmem:[%s5423_s1 + $0x1e8] ss:$16 sps:$4 sm:$0xff]   ;;  %v3629_v2 = vld [vmem:[%s5423_s1 + $0x204] ss:$16 sps:$4 sm:$0xff]  }
  0x17   :  { %2446 = vmatpush1.bf16.msra.mxu0 %v3563_v22  ;;  %2733 = vmatpush1.bf16.msra.mxu1 %v3564_v23  ;;  %v3632_v3 = vld [vmem:[%s5423_s1 + $0x20c] ss:$16 sps:$4 sm:$0xff]   ;;  %v3627_v5 = vld [vmem:[%s5423_s1 + $0x200] ss:$16 sps:$4 sm:$0xff]   ;;  %v3630_v6 = vld [vmem:[%s5423_s1 + $0x208] ss:$16 sps:$4 sm:$0xff]  }
  0x18   :  { %2447 = vmatprep.subr.bf16.mxu0 %v3565_v24  ;;  %2734 = vmatprep.subr.bf16.mxu1 %v3567_v25  ;;  %v3635_v7 = vld [vmem:[%s5423_s1 + $0x224] ss:$16 sps:$4 sm:$0xff]   ;;  %v3638_v8 = vld [vmem:[%s5423_s1 + $0x22c] ss:$16 sps:$4 sm:$0xff]   ;;  %v3633_v9 = vld [vmem:[%s5423_s1 + $0x220] ss:$16 sps:$4 sm:$0xff]  }
  0x19   :  { %v3636_v10 = vld [vmem:[%s5423_s1 + $0x228] ss:$16 sps:$4 sm:$0xff]   ;;  %v3641_v11 = vld [vmem:[%s5423_s1 + $0x244] ss:$16 sps:$4 sm:$0xff]   ;;  %v3644_v12 = vld [vmem:[%s5423_s1 + $0x24c] ss:$16 sps:$4 sm:$0xff]  }
  0x1a   :  { %v3639_v13 = vld [vmem:[%s5423_s1 + $0x240] ss:$16 sps:$4 sm:$0xff]   ;;  %v3642_v14 = vld [vmem:[%s5423_s1 + $0x248] ss:$16 sps:$4 sm:$0xff]   ;;  %v3647_v15 = vld [vmem:[%s5423_s1 + $0x264] ss:$16 sps:$4 sm:$0xff]  }
  0x1b   :  { %2448 = vmatpush1.bf16.msra.mxu0 %v3569_v26  ;;  %2735 = vmatpush1.bf16.msra.mxu1 %v3570_v27  ;;  %v3650_v16 = vld [vmem:[%s5423_s1 + $0x26c] ss:$16 sps:$4 sm:$0xff]   ;;  %v3645_v17 = vld [vmem:[%s5423_s1 + $0x260] ss:$16 sps:$4 sm:$0xff]   ;;  %v3648_v18 = vld [vmem:[%s5423_s1 + $0x268] ss:$16 sps:$4 sm:$0xff]  }
  0x1c   :  { %2449 = vmatprep.subr.bf16.mxu0 %v3571_v28  ;;  %2736 = vmatprep.subr.bf16.mxu1 %v3573_v29  ;;  %v3653_v19 = vld [vmem:[%s5423_s1 + $0x284] ss:$16 sps:$4 sm:$0xff]   ;;  %v3656_v20 = vld [vmem:[%s5423_s1 + $0x28c] ss:$16 sps:$4 sm:$0xff]   ;;  %v3651_v21 = vld [vmem:[%s5423_s1 + $0x280] ss:$16 sps:$4 sm:$0xff]  }
  0x1d   :  { %v3654_v22 = vld [vmem:[%s5423_s1 + $0x288] ss:$16 sps:$4 sm:$0xff]   ;;  %v3659_v23 = vld [vmem:[%s5423_s1 + $0x2a4] ss:$16 sps:$4 sm:$0xff]   ;;  %v3662_v24 = vld [vmem:[%s5423_s1 + $0x2ac] ss:$16 sps:$4 sm:$0xff]  }
  0x1e   :  { %v3657_v25 = vld [vmem:[%s5423_s1 + $0x2a0] ss:$16 sps:$4 sm:$0xff]   ;;  %v3660_v26 = vld [vmem:[%s5423_s1 + $0x2a8] ss:$16 sps:$4 sm:$0xff]   ;;  %v3665_v27 = vld [vmem:[%s5423_s1 + $0x2c4] ss:$16 sps:$4 sm:$0xff]  }
  0x1f   :  { %2450 = vmatpush1.bf16.msra.mxu0 %v3575_v30  ;;  %2737 = vmatpush1.bf16.msra.mxu1 %v3576_v31  ;;  %v3668_v28 = vld [vmem:[%s5423_s1 + $0x2cc] ss:$16 sps:$4 sm:$0xff]   ;;  %v3663_v31 = vld [vmem:[%s5423_s1 + $0x2c0] ss:$16 sps:$4 sm:$0xff]   ;;  %v3690_v48 = vld [vmem:[%s5423_s1 + $0x348] ss:$16 sps:$4 sm:$0xff]  }
  0x20   :  { %2451 = vmatprep.subr.bf16.mxu0 %v3577_v32  ;;  %2738 = vmatprep.subr.bf16.mxu1 %v3579_v33  ;;  %v4447_v29 = vld [vmem:[%s5424_s0 + $0x8] sm:$0xff]  ;;  %v3671_v33 = vld [vmem:[%s5423_s1 + $0x2e4] ss:$16 sps:$4 sm:$0xff]  }
  0x21   :  { %v3070_v30 = vcombine.high %v4447_v29, %v4447_v29  ;;  %v3666_v32 = vld [vmem:[%s5423_s1 + $0x2c8] ss:$16 sps:$4 sm:$0xff]   ;;  %v3692_v46 = vld [vmem:[%s5423_s1 + $0x34c] ss:$16 sps:$4 sm:$0xff]  }
  0x23   :  { %2452 = vmatpush1.bf16.msra.mxu0 %v3581_v34  ;;  %2739 = vmatpush1.bf16.msra.mxu1 %v3582_v35  ;;  %v3674_v34 = vld [vmem:[%s5423_s1 + $0x2ec] ss:$16 sps:$4 sm:$0xff]   ;;  %v3669_v35 = vld [vmem:[%s5423_s1 + $0x2e0] ss:$16 sps:$4 sm:$0xff]  }
  0x24   :  { %2453 = vmatprep.subr.bf16.mxu0 %v3583_v36  ;;  %2740 = vmatprep.subr.bf16.mxu1 %v3585_v37  ;;  %v3672_v36 = vld [vmem:[%s5423_s1 + $0x2e8] ss:$16 sps:$4 sm:$0xff]   ;;  %v3677_v37 = vld [vmem:[%s5423_s1 + $0x304] ss:$16 sps:$4 sm:$0xff]  }
  0x27   :  { %2454 = vmatpush1.bf16.msra.mxu0 %v3587_v38  ;;  %2741 = vmatpush1.bf16.msra.mxu1 %v3588_v39  ;;  %v3680_v38 = vld [vmem:[%s5423_s1 + $0x30c] ss:$16 sps:$4 sm:$0xff]   ;;  %v3675_v39 = vld [vmem:[%s5423_s1 + $0x300] ss:$16 sps:$4 sm:$0xff]  }
  0x28   :  { %2455 = vmatprep.subr.bf16.mxu0 %v3589_v40  ;;  %2742 = vmatprep.subr.bf16.mxu1 %v3591_v41  ;;  %v3678_v40 = vld [vmem:[%s5423_s1 + $0x308] ss:$16 sps:$4 sm:$0xff]   ;;  %v3683_v41 = vld [vmem:[%s5423_s1 + $0x324] ss:$16 sps:$4 sm:$0xff]  }
  0x2b   :  { %2456 = vmatpush1.bf16.msra.mxu0 %v3593_v42  ;;  %2743 = vmatpush1.bf16.msra.mxu1 %v3594_v43  ;;  %v3686_v42 = vld [vmem:[%s5423_s1 + $0x32c] ss:$16 sps:$4 sm:$0xff]   ;;  %v3681_v43 = vld [vmem:[%s5423_s1 + $0x320] ss:$16 sps:$4 sm:$0xff]  }
  0x2c   :  { %2457 = vmatprep.subr.bf16.mxu0 %v3595_v44  ;;  %2744 = vmatprep.subr.bf16.mxu1 %v3597_v45  ;;  %v3684_v44 = vld [vmem:[%s5423_s1 + $0x328] ss:$16 sps:$4 sm:$0xff]   ;;  %v3689_v45 = vld [vmem:[%s5423_s1 + $0x344] ss:$16 sps:$4 sm:$0xff]  }
  0x2f   :  { %2458 = vmatpush1.bf16.msra.mxu0 %v3599_v47  ;;  %2745 = vmatpush1.bf16.msra.mxu1 %v3600_v49  ;;  %v3687_v47 = vld [vmem:[%s5423_s1 + $0x340] ss:$16 sps:$4 sm:$0xff]   ;;  %v3695_v49 = vld [vmem:[%s5423_s1 + $0x364] ss:$16 sps:$4 sm:$0xff]  }
  0x30   :  { %2459 = vmatprep.subr.bf16.mxu0 %v3601_v50  ;;  %2746 = vmatprep.subr.bf16.mxu1 %v3603_v51  ;;  %v3698_v50 = vld [vmem:[%s5423_s1 + $0x36c] ss:$16 sps:$4 sm:$0xff]   ;;  %v3693_v51 = vld [vmem:[%s5423_s1 + $0x360] ss:$16 sps:$4 sm:$0xff]  }
  0x33   :  { %2460 = vmatpush1.bf16.msra.mxu0 %v3605_v52  ;;  %2747 = vmatpush1.bf16.msra.mxu1 %v3606_v53  ;;  %v3696_v52 = vld [vmem:[%s5423_s1 + $0x368] ss:$16 sps:$4 sm:$0xff]   ;;  %v3701_v53 = vld [vmem:[%s5423_s1 + $0x384] ss:$16 sps:$4 sm:$0xff]  }
  0x34   :  { %2461 = vmatprep.subr.bf16.mxu0 %v3607_v54  ;;  %2748 = vmatprep.subr.bf16.mxu1 %v3609_v55  ;;  %v3704_v54 = vld [vmem:[%s5423_s1 + $0x38c] ss:$16 sps:$4 sm:$0xff]   ;;  %v3699_v55 = vld [vmem:[%s5423_s1 + $0x380] ss:$16 sps:$4 sm:$0xff]  }
  0x37   :  { %2462 = vmatpush1.bf16.msra.mxu0 %v3611_v56  ;;  %2749 = vmatpush1.bf16.msra.mxu1 %v3612_v57  ;;  %v3702_v56 = vld [vmem:[%s5423_s1 + $0x388] ss:$16 sps:$4 sm:$0xff]   ;;  %v3707_v57 = vld [vmem:[%s5423_s1 + $0x3a4] ss:$16 sps:$4 sm:$0xff]  }
  0x38   :  { %2463 = vmatprep.subr.bf16.mxu0 %v3613_v58  ;;  %2750 = vmatprep.subr.bf16.mxu1 %v3615_v59  ;;  %v3710_v58 = vld [vmem:[%s5423_s1 + $0x3ac] ss:$16 sps:$4 sm:$0xff]   ;;  %v3705_v59 = vld [vmem:[%s5423_s1 + $0x3a0] ss:$16 sps:$4 sm:$0xff]  }
  0x3b   :  { %2464 = vmatpush1.bf16.msra.mxu0 %v3617_v60  ;;  %2751 = vmatpush1.bf16.msra.mxu1 %v3618_v61  ;;  %v3708_v60 = vld [vmem:[%s5423_s1 + $0x3a8] ss:$16 sps:$4 sm:$0xff]   ;;  %v3713_v61 = vld [vmem:[%s5423_s1 + $0x3c4] ss:$16 sps:$4 sm:$0xff]  }
  0x3c   :  { %2465 = vmatprep.subr.bf16.mxu0 %v3619_v62  ;;  %2752 = vmatprep.subr.bf16.mxu1 %v3621_v63  ;;  %v3716_v62 = vld [vmem:[%s5423_s1 + $0x3cc] ss:$16 sps:$4 sm:$0xff]   ;;  %v3711_v63 = vld [vmem:[%s5423_s1 + $0x3c0] ss:$16 sps:$4 sm:$0xff]  }
  0x3f   :  { %2466 = vmatpush1.bf16.msra.mxu0 %v3623_v0  ;;  %2753 = vmatpush1.bf16.msra.mxu1 %v3624_v1  ;;  %v3714_v0 = vld [vmem:[%s5423_s1 + $0x3c8] ss:$16 sps:$4 sm:$0xff]   ;;  %v3719_v1 = vld [vmem:[%s5423_s1 + $0x3e4] ss:$16 sps:$4 sm:$0xff]  }
  0x40   :  { %2476 = vmatprep.subr.bf16.mxu0 %v3629_v2  ;;  %2763 = vmatprep.subr.bf16.mxu1 %v3632_v3  ;;  %v3722_v2 = vld [vmem:[%s5423_s1 + $0x3ec] ss:$16 sps:$4 sm:$0xff]   ;;  %v3717_v3 = vld [vmem:[%s5423_s1 + $0x3e0] ss:$16 sps:$4 sm:$0xff]  }
  0x42   :  { %2468 = vmatmul.mubr.bf16.vlgmr.msra.gmra.mrb[0].mxu0 %v3067_v4  ;;  %2755 = vmatmul.mubr.bf16.vlgmr.msra.gmra.mrb[0].mxu1 %v3067_v4  ;;  %v3720_v4 = vld [vmem:[%s5423_s1 + $0x3e8] ss:$16 sps:$4 sm:$0xff]  }
  0x43   :  { %2477 = vmatpush1.bf16.msra.mxu0 %v3627_v5  ;;  %2764 = vmatpush1.bf16.msra.mxu1 %v3630_v6  ;;  %v3727_v5 = vld [vmem:[%s5423_s1 + $0x404] ss:$16 sps:$4 sm:$0xff]   ;;  %v3730_v6 = vld [vmem:[%s5423_s1 + $0x40c] ss:$16 sps:$4 sm:$0xff]  }
  0x44   :  { %2478 = vmatprep.subr.bf16.mxu0 %v3635_v7  ;;  %2765 = vmatprep.subr.bf16.mxu1 %v3638_v8  ;;  %v3069_v7 = vcombine.low %v4447_v29, %v4447_v29  ;;  %v3725_v8 = vld [vmem:[%s5423_s1 + $0x400] ss:$16 sps:$4 sm:$0xff]   ;;  %v3760_v29 = vld [vmem:[%s5423_s1 + $0x4ac] ss:$16 sps:$4 sm:$0xff]  }
  0x45   :  { %2508 = vmatprep.mubr.bf16.mxu0 %v3070_v30  ;;  %2795 = vmatprep.mubr.bf16.mxu1 %v3070_v30  ;;  %v3755_v30 = vld [vmem:[%s5423_s1 + $0x4a0] ss:$16 sps:$4 sm:$0xff]  }
  0x47   :  { %2479 = vmatpush1.bf16.msra.mxu0 %v3633_v9  ;;  %2766 = vmatpush1.bf16.msra.mxu1 %v3636_v10  ;;  %v3728_v9 = vld [vmem:[%s5423_s1 + $0x408] ss:$16 sps:$4 sm:$0xff]   ;;  %v3733_v10 = vld [vmem:[%s5423_s1 + $0x424] ss:$16 sps:$4 sm:$0xff]  }
  0x48   :  { %2480 = vmatprep.subr.bf16.mxu0 %v3641_v11  ;;  %2767 = vmatprep.subr.bf16.mxu1 %v3644_v12  ;;  %v4585_v11 = vld [vmem:[%s5424_s0 + $0x10] sm:$0xff]  ;;  %v3736_v12 = vld [vmem:[%s5423_s1 + $0x42c] ss:$16 sps:$4 sm:$0xff]  }
  0x4b   :  { %2481 = vmatpush1.bf16.msra.mxu0 %v3639_v13  ;;  %2768 = vmatpush1.bf16.msra.mxu1 %v3642_v14  ;;  %v3072_v13 = vcombine.high %v4585_v11, %v4585_v11  ;;  %v3731_v14 = vld [vmem:[%s5423_s1 + $0x420] ss:$16 sps:$4 sm:$0xff]  }
  0x4c   :  { %2482 = vmatprep.subr.bf16.mxu0 %v3647_v15  ;;  %2769 = vmatprep.subr.bf16.mxu1 %v3650_v16  ;;  %v3734_v15 = vld [vmem:[%s5423_s1 + $0x428] ss:$16 sps:$4 sm:$0xff]   ;;  %v3739_v16 = vld [vmem:[%s5423_s1 + $0x444] ss:$16 sps:$4 sm:$0xff]  }
  0x4f   :  { %2483 = vmatpush1.bf16.msra.mxu0 %v3645_v17  ;;  %2770 = vmatpush1.bf16.msra.mxu1 %v3648_v18  ;;  %v3742_v17 = vld [vmem:[%s5423_s1 + $0x44c] ss:$16 sps:$4 sm:$0xff]   ;;  %v3737_v18 = vld [vmem:[%s5423_s1 + $0x440] ss:$16 sps:$4 sm:$0xff]  }
  0x50   :  { %2484 = vmatprep.subr.bf16.mxu0 %v3653_v19  ;;  %2771 = vmatprep.subr.bf16.mxu1 %v3656_v20  ;;  %v3740_v19 = vld [vmem:[%s5423_s1 + $0x448] ss:$16 sps:$4 sm:$0xff]   ;;  %v3745_v20 = vld [vmem:[%s5423_s1 + $0x464] ss:$16 sps:$4 sm:$0xff]  }
  0x53   :  { %2485 = vmatpush1.bf16.msra.mxu0 %v3651_v21  ;;  %2772 = vmatpush1.bf16.msra.mxu1 %v3654_v22  ;;  %v3748_v21 = vld [vmem:[%s5423_s1 + $0x46c] ss:$16 sps:$4 sm:$0xff]   ;;  %v3743_v22 = vld [vmem:[%s5423_s1 + $0x460] ss:$16 sps:$4 sm:$0xff]  }
  0x54   :  { %2486 = vmatprep.subr.bf16.mxu0 %v3659_v23  ;;  %2773 = vmatprep.subr.bf16.mxu1 %v3662_v24  ;;  %v3746_v23 = vld [vmem:[%s5423_s1 + $0x468] ss:$16 sps:$4 sm:$0xff]   ;;  %v3751_v24 = vld [vmem:[%s5423_s1 + $0x484] ss:$16 sps:$4 sm:$0xff]  }
  0x57   :  { %2487 = vmatpush1.bf16.msra.mxu0 %v3657_v25  ;;  %2774 = vmatpush1.bf16.msra.mxu1 %v3660_v26  ;;  %v3754_v25 = vld [vmem:[%s5423_s1 + $0x48c] ss:$16 sps:$4 sm:$0xff]   ;;  %v3749_v26 = vld [vmem:[%s5423_s1 + $0x480] ss:$16 sps:$4 sm:$0xff]  }
  0x58   :  { %2488 = vmatprep.subr.bf16.mxu0 %v3665_v27  ;;  %2775 = vmatprep.subr.bf16.mxu1 %v3668_v28  ;;  %v3752_v27 = vld [vmem:[%s5423_s1 + $0x488] ss:$16 sps:$4 sm:$0xff]   ;;  %v3757_v28 = vld [vmem:[%s5423_s1 + $0x4a4] ss:$16 sps:$4 sm:$0xff]  }
  0x5b   :  { %2489 = vmatpush1.bf16.msra.mxu0 %v3663_v31  ;;  %2776 = vmatpush1.bf16.msra.mxu1 %v3666_v32  ;;  %v3758_v31 = vld [vmem:[%s5423_s1 + $0x4a8] ss:$16 sps:$4 sm:$0xff]   ;;  %v3763_v32 = vld [vmem:[%s5423_s1 + $0x4c4] ss:$16 sps:$4 sm:$0xff]  }
  0x5c   :  { %2490 = vmatprep.subr.bf16.mxu0 %v3671_v33  ;;  %2777 = vmatprep.subr.bf16.mxu1 %v3674_v34  ;;  %v3766_v33 = vld [vmem:[%s5423_s1 + $0x4cc] ss:$16 sps:$4 sm:$0xff]   ;;  %v3761_v34 = vld [vmem:[%s5423_s1 + $0x4c0] ss:$16 sps:$4 sm:$0xff]  }
  0x5f   :  { %2491 = vmatpush1.bf16.msra.mxu0 %v3669_v35  ;;  %2778 = vmatpush1.bf16.msra.mxu1 %v3672_v36  ;;  %v3764_v35 = vld [vmem:[%s5423_s1 + $0x4c8] ss:$16 sps:$4 sm:$0xff]   ;;  %v3769_v36 = vld [vmem:[%s5423_s1 + $0x4e4] ss:$16 sps:$4 sm:$0xff]  }
  0x60   :  { %2492 = vmatprep.subr.bf16.mxu0 %v3677_v37  ;;  %2779 = vmatprep.subr.bf16.mxu1 %v3680_v38  ;;  %v3772_v37 = vld [vmem:[%s5423_s1 + $0x4ec] ss:$16 sps:$4 sm:$0xff]   ;;  %v3767_v38 = vld [vmem:[%s5423_s1 + $0x4e0] ss:$16 sps:$4 sm:$0xff]  }
  0x63   :  { %2493 = vmatpush1.bf16.msra.mxu0 %v3675_v39  ;;  %2780 = vmatpush1.bf16.msra.mxu1 %v3678_v40  ;;  %v3770_v39 = vld [vmem:[%s5423_s1 + $0x4e8] ss:$16 sps:$4 sm:$0xff]   ;;  %v3775_v40 = vld [vmem:[%s5423_s1 + $0x504] ss:$16 sps:$4 sm:$0xff]  }
  0x64   :  { %2494 = vmatprep.subr.bf16.mxu0 %v3683_v41  ;;  %2781 = vmatprep.subr.bf16.mxu1 %v3686_v42  ;;  %v3778_v41 = vld [vmem:[%s5423_s1 + $0x50c] ss:$16 sps:$4 sm:$0xff]   ;;  %v3773_v42 = vld [vmem:[%s5423_s1 + $0x500] ss:$16 sps:$4 sm:$0xff]  }
  0x67   :  { %2495 = vmatpush1.bf16.msra.mxu0 %v3681_v43  ;;  %2782 = vmatpush1.bf16.msra.mxu1 %v3684_v44  ;;  %v3776_v43 = vld [vmem:[%s5423_s1 + $0x508] ss:$16 sps:$4 sm:$0xff]   ;;  %v3781_v44 = vld [vmem:[%s5423_s1 + $0x524] ss:$16 sps:$4 sm:$0xff]  }
  0x68   :  { %2496 = vmatprep.subr.bf16.mxu0 %v3689_v45  ;;  %2783 = vmatprep.subr.bf16.mxu1 %v3692_v46  ;;  %v3784_v45 = vld [vmem:[%s5423_s1 + $0x52c] ss:$16 sps:$4 sm:$0xff]   ;;  %v3779_v46 = vld [vmem:[%s5423_s1 + $0x520] ss:$16 sps:$4 sm:$0xff]  }
  0x6b   :  { %2497 = vmatpush1.bf16.msra.mxu0 %v3687_v47  ;;  %2784 = vmatpush1.bf16.msra.mxu1 %v3690_v48  ;;  %v3782_v47 = vld [vmem:[%s5423_s1 + $0x528] ss:$16 sps:$4 sm:$0xff]   ;;  %v3787_v48 = vld [vmem:[%s5423_s1 + $0x544] ss:$16 sps:$4 sm:$0xff]  }
  0x6c   :  { %2498 = vmatprep.subr.bf16.mxu0 %v3695_v49  ;;  %2785 = vmatprep.subr.bf16.mxu1 %v3698_v50  ;;  %v3790_v49 = vld [vmem:[%s5423_s1 + $0x54c] ss:$16 sps:$4 sm:$0xff]   ;;  %v3785_v50 = vld [vmem:[%s5423_s1 + $0x540] ss:$16 sps:$4 sm:$0xff]  }
  0x6f   :  { %2499 = vmatpush1.bf16.msra.mxu0 %v3693_v51  ;;  %2786 = vmatpush1.bf16.msra.mxu1 %v3696_v52  ;;  %v3788_v51 = vld [vmem:[%s5423_s1 + $0x548] ss:$16 sps:$4 sm:$0xff]   ;;  %v3793_v52 = vld [vmem:[%s5423_s1 + $0x564] ss:$16 sps:$4 sm:$0xff]  }
  0x70   :  { %2500 = vmatprep.subr.bf16.mxu0 %v3701_v53  ;;  %2787 = vmatprep.subr.bf16.mxu1 %v3704_v54  ;;  %v3796_v53 = vld [vmem:[%s5423_s1 + $0x56c] ss:$16 sps:$4 sm:$0xff]   ;;  %v3791_v54 = vld [vmem:[%s5423_s1 + $0x560] ss:$16 sps:$4 sm:$0xff]  }
  0x73   :  { %2501 = vmatpush1.bf16.msra.mxu0 %v3699_v55  ;;  %2788 = vmatpush1.bf16.msra.mxu1 %v3702_v56  ;;  %v3794_v55 = vld [vmem:[%s5423_s1 + $0x568] ss:$16 sps:$4 sm:$0xff]   ;;  %v3799_v56 = vld [vmem:[%s5423_s1 + $0x584] ss:$16 sps:$4 sm:$0xff]  }
  0x74   :  { %2502 = vmatprep.subr.bf16.mxu0 %v3707_v57  ;;  %2789 = vmatprep.subr.bf16.mxu1 %v3710_v58  ;;  %v3802_v57 = vld [vmem:[%s5423_s1 + $0x58c] ss:$16 sps:$4 sm:$0xff]   ;;  %v3797_v58 = vld [vmem:[%s5423_s1 + $0x580] ss:$16 sps:$4 sm:$0xff]  }
  0x77   :  { %2503 = vmatpush1.bf16.msra.mxu0 %v3705_v59  ;;  %2790 = vmatpush1.bf16.msra.mxu1 %v3708_v60  ;;  %v3800_v59 = vld [vmem:[%s5423_s1 + $0x588] ss:$16 sps:$4 sm:$0xff]   ;;  %v3805_v60 = vld [vmem:[%s5423_s1 + $0x5a4] ss:$16 sps:$4 sm:$0xff]  }
  0x78   :  { %2504 = vmatprep.subr.bf16.mxu0 %v3713_v61  ;;  %2791 = vmatprep.subr.bf16.mxu1 %v3716_v62  ;;  %v3808_v61 = vld [vmem:[%s5423_s1 + $0x5ac] ss:$16 sps:$4 sm:$0xff]   ;;  %v3803_v62 = vld [vmem:[%s5423_s1 + $0x5a0] ss:$16 sps:$4 sm:$0xff]  }
  0x7b   :  { %2505 = vmatpush1.bf16.msra.mxu0 %v3711_v63  ;;  %2792 = vmatpush1.bf16.msra.mxu1 %v3714_v0  ;;  %v3806_v63 = vld [vmem:[%s5423_s1 + $0x5a8] ss:$16 sps:$4 sm:$0xff]   ;;  %v3811_v0 = vld [vmem:[%s5423_s1 + $0x5c4] ss:$16 sps:$4 sm:$0xff]  }
  0x7c   :  { %2506 = vmatprep.subr.bf16.mxu0 %v3719_v1  ;;  %2793 = vmatprep.subr.bf16.mxu1 %v3722_v2  ;;  %v3814_v1 = vld [vmem:[%s5423_s1 + $0x5cc] ss:$16 sps:$4 sm:$0xff]   ;;  %v3809_v2 = vld [vmem:[%s5423_s1 + $0x5c0] ss:$16 sps:$4 sm:$0xff]  }
  0x7f   :  { %2507 = vmatpush1.bf16.msra.mxu0 %v3717_v3  ;;  %2794 = vmatpush1.bf16.msra.mxu1 %v3720_v4  ;;  %v3812_v3 = vld [vmem:[%s5423_s1 + $0x5c8] ss:$16 sps:$4 sm:$0xff]   ;;  %v3817_v4 = vld [vmem:[%s5423_s1 + $0x5e4] ss:$16 sps:$4 sm:$0xff]  }
  0x80   :  { %2517 = vmatprep.subr.bf16.mxu0 %v3727_v5  ;;  %2804 = vmatprep.subr.bf16.mxu1 %v3730_v6  ;;  %v3820_v5 = vld [vmem:[%s5423_s1 + $0x5ec] ss:$16 sps:$4 sm:$0xff]   ;;  %v3815_v6 = vld [vmem:[%s5423_s1 + $0x5e0] ss:$16 sps:$4 sm:$0xff]  }
  0x82   :  { %2509 = vmatmul.mubr.bf16.vlgmr.msra.gmra.mrb[0].mxu0 %v3069_v7  ;;  %2796 = vmatmul.mubr.bf16.vlgmr.msra.gmra.mrb[0].mxu1 %v3069_v7  ;;  %v3818_v7 = vld [vmem:[%s5423_s1 + $0x5e8] ss:$16 sps:$4 sm:$0xff]  }
  0x83   :  { %2518 = vmatpush1.bf16.msra.mxu0 %v3725_v8  ;;  %2805 = vmatpush1.bf16.msra.mxu1 %v3728_v9  ;;  %v3825_v8 = vld [vmem:[%s5423_s1 + $0x604] ss:$16 sps:$4 sm:$0xff]   ;;  %v3828_v9 = vld [vmem:[%s5423_s1 + $0x60c] ss:$16 sps:$4 sm:$0xff]  }
  0x84   :  { %2519 = vmatprep.subr.bf16.mxu0 %v3733_v10  ;;  %2806 = vmatprep.subr.bf16.mxu1 %v3736_v12  ;;  %v3823_v10 = vld [vmem:[%s5423_s1 + $0x600] ss:$16 sps:$4 sm:$0xff]   ;;  %v3071_v12 = vcombine.low %v4585_v11, %v4585_v11  ;;  %v3834_v11 = vld [vmem:[%s5423_s1 + $0x62c] ss:$16 sps:$4 sm:$0xff]  }
  0x85   :  { %2549 = vmatprep.mubr.bf16.mxu0 %v3072_v13  ;;  %2836 = vmatprep.mubr.bf16.mxu1 %v3072_v13  ;;  %v3826_v13 = vld [vmem:[%s5423_s1 + $0x608] ss:$16 sps:$4 sm:$0xff]  }
  0x87   :  { %2520 = vmatpush1.bf16.msra.mxu0 %v3731_v14  ;;  %2807 = vmatpush1.bf16.msra.mxu1 %v3734_v15  ;;  %v4783_v14 = vld [vmem:[%s5424_s0 + $0x18] sm:$0xff]  ;;  %v3831_v15 = vld [vmem:[%s5423_s1 + $0x624] ss:$16 sps:$4 sm:$0xff]  }
  0x88   :  { %2521 = vmatprep.subr.bf16.mxu0 %v3739_v16  ;;  %2808 = vmatprep.subr.bf16.mxu1 %v3742_v17  ;;  %v3074_v16 = vcombine.high %v4783_v14, %v4783_v14  ;;  %v3829_v17 = vld [vmem:[%s5423_s1 + $0x620] ss:$16 sps:$4 sm:$0xff]  }
  0x8b   :  { %2522 = vmatpush1.bf16.msra.mxu0 %v3737_v18  ;;  %2809 = vmatpush1.bf16.msra.mxu1 %v3740_v19  ;;  %v3832_v18 = vld [vmem:[%s5423_s1 + $0x628] ss:$16 sps:$4 sm:$0xff]   ;;  %v3837_v19 = vld [vmem:[%s5423_s1 + $0x644] ss:$16 sps:$4 sm:$0xff]  }
  0x8c   :  { %2523 = vmatprep.subr.bf16.mxu0 %v3745_v20  ;;  %2810 = vmatprep.subr.bf16.mxu1 %v3748_v21  ;;  %v3840_v20 = vld [vmem:[%s5423_s1 + $0x64c] ss:$16 sps:$4 sm:$0xff]   ;;  %v3835_v21 = vld [vmem:[%s5423_s1 + $0x640] ss:$16 sps:$4 sm:$0xff]  }
  0x8f   :  { %2524 = vmatpush1.bf16.msra.mxu0 %v3743_v22  ;;  %2811 = vmatpush1.bf16.msra.mxu1 %v3746_v23  ;;  %v3838_v22 = vld [vmem:[%s5423_s1 + $0x648] ss:$16 sps:$4 sm:$0xff]   ;;  %v3843_v23 = vld [vmem:[%s5423_s1 + $0x664] ss:$16 sps:$4 sm:$0xff]  }
  0x90   :  { %2525 = vmatprep.subr.bf16.mxu0 %v3751_v24  ;;  %2812 = vmatprep.subr.bf16.mxu1 %v3754_v25  ;;  %v3846_v24 = vld [vmem:[%s5423_s1 + $0x66c] ss:$16 sps:$4 sm:$0xff]   ;;  %v3841_v25 = vld [vmem:[%s5423_s1 + $0x660] ss:$16 sps:$4 sm:$0xff]  }
  0x93   :  { %2526 = vmatpush1.bf16.msra.mxu0 %v3749_v26  ;;  %2813 = vmatpush1.bf16.msra.mxu1 %v3752_v27  ;;  %v3844_v26 = vld [vmem:[%s5423_s1 + $0x668] ss:$16 sps:$4 sm:$0xff]   ;;  %v3849_v27 = vld [vmem:[%s5423_s1 + $0x684] ss:$16 sps:$4 sm:$0xff]  }
  0x94   :  { %2527 = vmatprep.subr.bf16.mxu0 %v3757_v28  ;;  %2814 = vmatprep.subr.bf16.mxu1 %v3760_v29  ;;  %v3852_v28 = vld [vmem:[%s5423_s1 + $0x68c] ss:$16 sps:$4 sm:$0xff]   ;;  %v3847_v29 = vld [vmem:[%s5423_s1 + $0x680] ss:$16 sps:$4 sm:$0xff]  }
  0x97   :  { %2528 = vmatpush1.bf16.msra.mxu0 %v3755_v30  ;;  %2815 = vmatpush1.bf16.msra.mxu1 %v3758_v31  ;;  %v3850_v30 = vld [vmem:[%s5423_s1 + $0x688] ss:$16 sps:$4 sm:$0xff]   ;;  %v3855_v31 = vld [vmem:[%s5423_s1 + $0x6a4] ss:$16 sps:$4 sm:$0xff]  }
  0x98   :  { %2529 = vmatprep.subr.bf16.mxu0 %v3763_v32  ;;  %2816 = vmatprep.subr.bf16.mxu1 %v3766_v33  ;;  %v3858_v32 = vld [vmem:[%s5423_s1 + $0x6ac] ss:$16 sps:$4 sm:$0xff]   ;;  %v3853_v33 = vld [vmem:[%s5423_s1 + $0x6a0] ss:$16 sps:$4 sm:$0xff]  }
  0x9b   :  { %2530 = vmatpush1.bf16.msra.mxu0 %v3761_v34  ;;  %2817 = vmatpush1.bf16.msra.mxu1 %v3764_v35  ;;  %v3856_v34 = vld [vmem:[%s5423_s1 + $0x6a8] ss:$16 sps:$4 sm:$0xff]   ;;  %v3861_v35 = vld [vmem:[%s5423_s1 + $0x6c4] ss:$16 sps:$4 sm:$0xff]  }
  0x9c   :  { %2531 = vmatprep.subr.bf16.mxu0 %v3769_v36  ;;  %2818 = vmatprep.subr.bf16.mxu1 %v3772_v37  ;;  %v3864_v36 = vld [vmem:[%s5423_s1 + $0x6cc] ss:$16 sps:$4 sm:$0xff]   ;;  %v3859_v37 = vld [vmem:[%s5423_s1 + $0x6c0] ss:$16 sps:$4 sm:$0xff]  }
  0x9f   :  { %2532 = vmatpush1.bf16.msra.mxu0 %v3767_v38  ;;  %2819 = vmatpush1.bf16.msra.mxu1 %v3770_v39  ;;  %v3862_v38 = vld [vmem:[%s5423_s1 + $0x6c8] ss:$16 sps:$4 sm:$0xff]   ;;  %v3867_v39 = vld [vmem:[%s5423_s1 + $0x6e4] ss:$16 sps:$4 sm:$0xff]  }
  0xa0   :  { %2533 = vmatprep.subr.bf16.mxu0 %v3775_v40  ;;  %2820 = vmatprep.subr.bf16.mxu1 %v3778_v41  ;;  %v3870_v40 = vld [vmem:[%s5423_s1 + $0x6ec] ss:$16 sps:$4 sm:$0xff]   ;;  %v3865_v41 = vld [vmem:[%s5423_s1 + $0x6e0] ss:$16 sps:$4 sm:$0xff]  }
  0xa3   :  { %2534 = vmatpush1.bf16.msra.mxu0 %v3773_v42  ;;  %2821 = vmatpush1.bf16.msra.mxu1 %v3776_v43  ;;  %v3868_v42 = vld [vmem:[%s5423_s1 + $0x6e8] ss:$16 sps:$4 sm:$0xff]   ;;  %v3873_v43 = vld [vmem:[%s5423_s1 + $0x704] ss:$16 sps:$4 sm:$0xff]  }
  0xa4   :  { %2535 = vmatprep.subr.bf16.mxu0 %v3781_v44  ;;  %2822 = vmatprep.subr.bf16.mxu1 %v3784_v45  ;;  %v3876_v44 = vld [vmem:[%s5423_s1 + $0x70c] ss:$16 sps:$4 sm:$0xff]   ;;  %v3871_v45 = vld [vmem:[%s5423_s1 + $0x700] ss:$16 sps:$4 sm:$0xff]  }
  0xa7   :  { %2536 = vmatpush1.bf16.msra.mxu0 %v3779_v46  ;;  %2823 = vmatpush1.bf16.msra.mxu1 %v3782_v47  ;;  %v3874_v46 = vld [vmem:[%s5423_s1 + $0x708] ss:$16 sps:$4 sm:$0xff]   ;;  %v3879_v47 = vld [vmem:[%s5423_s1 + $0x724] ss:$16 sps:$4 sm:$0xff]  }
  0xa8   :  { %2537 = vmatprep.subr.bf16.mxu0 %v3787_v48  ;;  %2824 = vmatprep.subr.bf16.mxu1 %v3790_v49  ;;  %v3882_v48 = vld [vmem:[%s5423_s1 + $0x72c] ss:$16 sps:$4 sm:$0xff]   ;;  %v3877_v49 = vld [vmem:[%s5423_s1 + $0x720] ss:$16 sps:$4 sm:$0xff]  }
  0xab   :  { %2538 = vmatpush1.bf16.msra.mxu0 %v3785_v50  ;;  %2825 = vmatpush1.bf16.msra.mxu1 %v3788_v51  ;;  %v3880_v50 = vld [vmem:[%s5423_s1 + $0x728] ss:$16 sps:$4 sm:$0xff]   ;;  %v3885_v51 = vld [vmem:[%s5423_s1 + $0x744] ss:$16 sps:$4 sm:$0xff]  }
  0xac   :  { %2539 = vmatprep.subr.bf16.mxu0 %v3793_v52  ;;  %2826 = vmatprep.subr.bf16.mxu1 %v3796_v53  ;;  %v3888_v52 = vld [vmem:[%s5423_s1 + $0x74c] ss:$16 sps:$4 sm:$0xff]   ;;  %v3883_v53 = vld [vmem:[%s5423_s1 + $0x740] ss:$16 sps:$4 sm:$0xff]  }
  0xaf   :  { %2540 = vmatpush1.bf16.msra.mxu0 %v3791_v54  ;;  %2827 = vmatpush1.bf16.msra.mxu1 %v3794_v55  ;;  %v3886_v54 = vld [vmem:[%s5423_s1 + $0x748] ss:$16 sps:$4 sm:$0xff]   ;;  %v3891_v55 = vld [vmem:[%s5423_s1 + $0x764] ss:$16 sps:$4 sm:$0xff]  }
  0xb0   :  { %2541 = vmatprep.subr.bf16.mxu0 %v3799_v56  ;;  %2828 = vmatprep.subr.bf16.mxu1 %v3802_v57  ;;  %v3894_v56 = vld [vmem:[%s5423_s1 + $0x76c] ss:$16 sps:$4 sm:$0xff]   ;;  %v3889_v57 = vld [vmem:[%s5423_s1 + $0x760] ss:$16 sps:$4 sm:$0xff]  }
  0xb3   :  { %2542 = vmatpush1.bf16.msra.mxu0 %v3797_v58  ;;  %2829 = vmatpush1.bf16.msra.mxu1 %v3800_v59  ;;  %v3892_v58 = vld [vmem:[%s5423_s1 + $0x768] ss:$16 sps:$4 sm:$0xff]   ;;  %v3897_v59 = vld [vmem:[%s5423_s1 + $0x784] ss:$16 sps:$4 sm:$0xff]  }
  0xb4   :  { %2543 = vmatprep.subr.bf16.mxu0 %v3805_v60  ;;  %2830 = vmatprep.subr.bf16.mxu1 %v3808_v61  ;;  %v3900_v60 = vld [vmem:[%s5423_s1 + $0x78c] ss:$16 sps:$4 sm:$0xff]   ;;  %v3895_v61 = vld [vmem:[%s5423_s1 + $0x780] ss:$16 sps:$4 sm:$0xff]  }
  0xb7   :  { %2544 = vmatpush1.bf16.msra.mxu0 %v3803_v62  ;;  %2831 = vmatpush1.bf16.msra.mxu1 %v3806_v63  ;;  %v3898_v62 = vld [vmem:[%s5423_s1 + $0x788] ss:$16 sps:$4 sm:$0xff]   ;;  %v3903_v63 = vld [vmem:[%s5423_s1 + $0x7a4] ss:$16 sps:$4 sm:$0xff]  }
  0xb8   :  { %2545 = vmatprep.subr.bf16.mxu0 %v3811_v0  ;;  %2832 = vmatprep.subr.bf16.mxu1 %v3814_v1  ;;  %v3906_v0 = vld [vmem:[%s5423_s1 + $0x7ac] ss:$16 sps:$4 sm:$0xff]   ;;  %v3901_v1 = vld [vmem:[%s5423_s1 + $0x7a0] ss:$16 sps:$4 sm:$0xff]  }
  0xbb   :  { %2546 = vmatpush1.bf16.msra.mxu0 %v3809_v2  ;;  %2833 = vmatpush1.bf16.msra.mxu1 %v3812_v3  ;;  %v3904_v2 = vld [vmem:[%s5423_s1 + $0x7a8] ss:$16 sps:$4 sm:$0xff]   ;;  %v3909_v3 = vld [vmem:[%s5423_s1 + $0x7c4] ss:$16 sps:$4 sm:$0xff]  }
  0xbc   :  { %2547 = vmatprep.subr.bf16.mxu0 %v3817_v4  ;;  %2834 = vmatprep.subr.bf16.mxu1 %v3820_v5  ;;  %v3912_v4 = vld [vmem:[%s5423_s1 + $0x7cc] ss:$16 sps:$4 sm:$0xff]   ;;  %v3907_v5 = vld [vmem:[%s5423_s1 + $0x7c0] ss:$16 sps:$4 sm:$0xff]  }
  0xbf   :  { %2548 = vmatpush1.bf16.msra.mxu0 %v3815_v6  ;;  %2835 = vmatpush1.bf16.msra.mxu1 %v3818_v7  ;;  %v3910_v6 = vld [vmem:[%s5423_s1 + $0x7c8] ss:$16 sps:$4 sm:$0xff]   ;;  %v3915_v7 = vld [vmem:[%s5423_s1 + $0x7e4] ss:$16 sps:$4 sm:$0xff]  }
  0xc0   :  { %2558 = vmatprep.subr.bf16.mxu0 %v3825_v8  ;;  %2845 = vmatprep.subr.bf16.mxu1 %v3828_v9  ;;  %v3918_v8 = vld [vmem:[%s5423_s1 + $0x7ec] ss:$16 sps:$4 sm:$0xff]   ;;  %v3913_v9 = vld [vmem:[%s5423_s1 + $0x7e0] ss:$16 sps:$4 sm:$0xff]  }
  0xc2   :  { %2550 = vmatmul.mubr.bf16.vlgmr.msra.gmra.mrb[0].mxu0 %v3071_v12  ;;  %2837 = vmatmul.mubr.bf16.vlgmr.msra.gmra.mrb[0].mxu1 %v3071_v12  ;;  %v3923_v12 = vld [vmem:[%s5423_s1 + $0x804] ss:$16 sps:$4 sm:$0xff]  }
  0xc3   :  { %2559 = vmatpush1.bf16.msra.mxu0 %v3823_v10  ;;  %2846 = vmatpush1.bf16.msra.mxu1 %v3826_v13  ;;  %v3916_v10 = vld [vmem:[%s5423_s1 + $0x7e8] ss:$16 sps:$4 sm:$0xff]   ;;  %v3926_v13 = vld [vmem:[%s5423_s1 + $0x80c] ss:$16 sps:$4 sm:$0xff]  }
  0xc4   :  { %2560 = vmatprep.subr.bf16.mxu0 %v3831_v15  ;;  %2847 = vmatprep.subr.bf16.mxu1 %v3834_v11  ;;  %v3921_v15 = vld [vmem:[%s5423_s1 + $0x800] ss:$16 sps:$4 sm:$0xff]   ;;  %v3073_v11 = vcombine.low %v4783_v14, %v4783_v14  ;;  %v3932_v14 = vld [vmem:[%s5423_s1 + $0x82c] ss:$16 sps:$4 sm:$0xff]  }
  0xc5   :  { %2590 = vmatprep.mubr.bf16.mxu0 %v3074_v16  ;;  %2877 = vmatprep.mubr.bf16.mxu1 %v3074_v16  ;;  %v4981_v16 = vld [vmem:[%s5424_s0 + $0x20] sm:$0xff] }
  0xc7   :  { %2561 = vmatpush1.bf16.msra.mxu0 %v3829_v17  ;;  %2848 = vmatpush1.bf16.msra.mxu1 %v3832_v18  ;;  %v3924_v17 = vld [vmem:[%s5423_s1 + $0x808] ss:$16 sps:$4 sm:$0xff]   ;;  %v3929_v18 = vld [vmem:[%s5423_s1 + $0x824] ss:$16 sps:$4 sm:$0xff]  }
  0xc8   :  { %2562 = vmatprep.subr.bf16.mxu0 %v3837_v19  ;;  %2849 = vmatprep.subr.bf16.mxu1 %v3840_v20  ;;  %v3076_v19 = vcombine.high %v4981_v16, %v4981_v16  ;;  %v3927_v20 = vld [vmem:[%s5423_s1 + $0x820] ss:$16 sps:$4 sm:$0xff]  }
  0xcb   :  { %2563 = vmatpush1.bf16.msra.mxu0 %v3835_v21  ;;  %2850 = vmatpush1.bf16.msra.mxu1 %v3838_v22  ;;  %v3930_v21 = vld [vmem:[%s5423_s1 + $0x828] ss:$16 sps:$4 sm:$0xff]   ;;  %v3935_v22 = vld [vmem:[%s5423_s1 + $0x844] ss:$16 sps:$4 sm:$0xff]  }
  0xcc   :  { %2564 = vmatprep.subr.bf16.mxu0 %v3843_v23  ;;  %2851 = vmatprep.subr.bf16.mxu1 %v3846_v24  ;;  %v3938_v23 = vld [vmem:[%s5423_s1 + $0x84c] ss:$16 sps:$4 sm:$0xff]   ;;  %v3933_v24 = vld [vmem:[%s5423_s1 + $0x840] ss:$16 sps:$4 sm:$0xff]  }
  0xcf   :  { %2565 = vmatpush1.bf16.msra.mxu0 %v3841_v25  ;;  %2852 = vmatpush1.bf16.msra.mxu1 %v3844_v26  ;;  %v3936_v25 = vld [vmem:[%s5423_s1 + $0x848] ss:$16 sps:$4 sm:$0xff]   ;;  %v3941_v26 = vld [vmem:[%s5423_s1 + $0x864] ss:$16 sps:$4 sm:$0xff]  }
  0xd0   :  { %2566 = vmatprep.subr.bf16.mxu0 %v3849_v27  ;;  %2853 = vmatprep.subr.bf16.mxu1 %v3852_v28  ;;  %v3944_v27 = vld [vmem:[%s5423_s1 + $0x86c] ss:$16 sps:$4 sm:$0xff]   ;;  %v4140_v28 = vmov 0  }
  0xd1   :  { %3527 = vset.pattern.permute.xlu0 %v4140_v28  ;;  %3528 = vset.pattern.permute.xlu1 %v4140_v28 }
  0xd3   :  { %2567 = vmatpush1.bf16.msra.mxu0 %v3847_v29  ;;  %2854 = vmatpush1.bf16.msra.mxu1 %v3850_v30  ;;  %v3939_v29 = vld [vmem:[%s5423_s1 + $0x860] ss:$16 sps:$4 sm:$0xff]   ;;  %v3942_v30 = vld [vmem:[%s5423_s1 + $0x868] ss:$16 sps:$4 sm:$0xff]  }
  0xd4   :  { %2568 = vmatprep.subr.bf16.mxu0 %v3855_v31  ;;  %2855 = vmatprep.subr.bf16.mxu1 %v3858_v32  ;;  %v3947_v31 = vld [vmem:[%s5423_s1 + $0x884] ss:$16 sps:$4 sm:$0xff]   ;;  %v3950_v32 = vld [vmem:[%s5423_s1 + $0x88c] ss:$16 sps:$4 sm:$0xff]  }
  0xd7   :  { %2569 = vmatpush1.bf16.msra.mxu0 %v3853_v33  ;;  %2856 = vmatpush1.bf16.msra.mxu1 %v3856_v34  ;;  %v3945_v33 = vld [vmem:[%s5423_s1 + $0x880] ss:$16 sps:$4 sm:$0xff]   ;;  %v3948_v34 = vld [vmem:[%s5423_s1 + $0x888] ss:$16 sps:$4 sm:$0xff]  }
  0xd8   :  { %2570 = vmatprep.subr.bf16.mxu0 %v3861_v35  ;;  %2857 = vmatprep.subr.bf16.mxu1 %v3864_v36  ;;  %v420_v35 = vld [vmem:[%s5425_s2] sm:$0xff] }
  0xd9   :  { %v3953_v36 = vld [vmem:[%s5423_s1 + $0x8a4] ss:$16 sps:$4 sm:$0xff]   ;;  %423 = vperm.xlu0 %3527, %v420_v35   ;;  %v4040_v35 = vld [vmem:[%s5423_s1 + $0xa68] ss:$16 sps:$4 sm:$0xff]  }
  0xdb   :  { %2571 = vmatpush1.bf16.msra.mxu0 %v3859_v37  ;;  %2858 = vmatpush1.bf16.msra.mxu1 %v3862_v38  ;;  %v3956_v37 = vld [vmem:[%s5423_s1 + $0x8ac] ss:$16 sps:$4 sm:$0xff]   ;;  %v3951_v38 = vld [vmem:[%s5423_s1 + $0x8a0] ss:$16 sps:$4 sm:$0xff]  }
  0xdc   :  { %2572 = vmatprep.subr.bf16.mxu0 %v3867_v39  ;;  %2859 = vmatprep.subr.bf16.mxu1 %v3870_v40  ;;  %v3954_v39 = vld [vmem:[%s5423_s1 + $0x8a8] ss:$16 sps:$4 sm:$0xff]   ;;  %v3959_v40 = vld [vmem:[%s5423_s1 + $0x8c4] ss:$16 sps:$4 sm:$0xff]  }
  0xdf   :  { %2573 = vmatpush1.bf16.msra.mxu0 %v3865_v41  ;;  %2860 = vmatpush1.bf16.msra.mxu1 %v3868_v42  ;;  %v3962_v41 = vld [vmem:[%s5423_s1 + $0x8cc] ss:$16 sps:$4 sm:$0xff]   ;;  %v3957_v42 = vld [vmem:[%s5423_s1 + $0x8c0] ss:$16 sps:$4 sm:$0xff]  }
  0xe0   :  { %2574 = vmatprep.subr.bf16.mxu0 %v3873_v43  ;;  %2861 = vmatprep.subr.bf16.mxu1 %v3876_v44  ;;  %v3960_v43 = vld [vmem:[%s5423_s1 + $0x8c8] ss:$16 sps:$4 sm:$0xff]   ;;  %v3965_v44 = vld [vmem:[%s5423_s1 + $0x8e4] ss:$16 sps:$4 sm:$0xff]  }
  0xe3   :  { %2575 = vmatpush1.bf16.msra.mxu0 %v3871_v45  ;;  %2862 = vmatpush1.bf16.msra.mxu1 %v3874_v46  ;;  %v3968_v45 = vld [vmem:[%s5423_s1 + $0x8ec] ss:$16 sps:$4 sm:$0xff]   ;;  %v3963_v46 = vld [vmem:[%s5423_s1 + $0x8e0] ss:$16 sps:$4 sm:$0xff]  }
  0xe4   :  { %2576 = vmatprep.subr.bf16.mxu0 %v3879_v47  ;;  %2863 = vmatprep.subr.bf16.mxu1 %v3882_v48  ;;  %v3966_v47 = vld [vmem:[%s5423_s1 + $0x8e8] ss:$16 sps:$4 sm:$0xff]   ;;  %v3971_v48 = vld [vmem:[%s5423_s1 + $0x904] ss:$16 sps:$4 sm:$0xff]  }
  0xe7   :  { %2577 = vmatpush1.bf16.msra.mxu0 %v3877_v49  ;;  %2864 = vmatpush1.bf16.msra.mxu1 %v3880_v50  ;;  %v3974_v49 = vld [vmem:[%s5423_s1 + $0x90c] ss:$16 sps:$4 sm:$0xff]   ;;  %v3969_v50 = vld [vmem:[%s5423_s1 + $0x900] ss:$16 sps:$4 sm:$0xff]  }
  0xe8   :  { %2578 = vmatprep.subr.bf16.mxu0 %v3885_v51  ;;  %2865 = vmatprep.subr.bf16.mxu1 %v3888_v52  ;;  %v3972_v51 = vld [vmem:[%s5423_s1 + $0x908] ss:$16 sps:$4 sm:$0xff]   ;;  %v3977_v52 = vld [vmem:[%s5423_s1 + $0x924] ss:$16 sps:$4 sm:$0xff]  }
  0xeb   :  { %2579 = vmatpush1.bf16.msra.mxu0 %v3883_v53  ;;  %2866 = vmatpush1.bf16.msra.mxu1 %v3886_v54  ;;  %v3980_v53 = vld [vmem:[%s5423_s1 + $0x92c] ss:$16 sps:$4 sm:$0xff]   ;;  %v3975_v54 = vld [vmem:[%s5423_s1 + $0x920] ss:$16 sps:$4 sm:$0xff]  }
  0xec   :  { %2580 = vmatprep.subr.bf16.mxu0 %v3891_v55  ;;  %2867 = vmatprep.subr.bf16.mxu1 %v3894_v56  ;;  %v3978_v55 = vld [vmem:[%s5423_s1 + $0x928] ss:$16 sps:$4 sm:$0xff]   ;;  %v3983_v56 = vld [vmem:[%s5423_s1 + $0x944] ss:$16 sps:$4 sm:$0xff]  }
  0xef   :  { %2581 = vmatpush1.bf16.msra.mxu0 %v3889_v57  ;;  %2868 = vmatpush1.bf16.msra.mxu1 %v3892_v58  ;;  %v3986_v57 = vld [vmem:[%s5423_s1 + $0x94c] ss:$16 sps:$4 sm:$0xff]   ;;  %v3981_v58 = vld [vmem:[%s5423_s1 + $0x940] ss:$16 sps:$4 sm:$0xff]  }
  0xf0   :  { %2582 = vmatprep.subr.bf16.mxu0 %v3897_v59  ;;  %2869 = vmatprep.subr.bf16.mxu1 %v3900_v60  ;;  %v3984_v59 = vld [vmem:[%s5423_s1 + $0x948] ss:$16 sps:$4 sm:$0xff]   ;;  %v3989_v60 = vld [vmem:[%s5423_s1 + $0x964] ss:$16 sps:$4 sm:$0xff]  }
  0xf3   :  { %2583 = vmatpush1.bf16.msra.mxu0 %v3895_v61  ;;  %2870 = vmatpush1.bf16.msra.mxu1 %v3898_v62  ;;  %v3992_v61 = vld [vmem:[%s5423_s1 + $0x96c] ss:$16 sps:$4 sm:$0xff]   ;;  %v3987_v62 = vld [vmem:[%s5423_s1 + $0x960] ss:$16 sps:$4 sm:$0xff]  }
  0xf4   :  { %2584 = vmatprep.subr.bf16.mxu0 %v3903_v63  ;;  %2871 = vmatprep.subr.bf16.mxu1 %v3906_v0  ;;  %v3990_v63 = vld [vmem:[%s5423_s1 + $0x968] ss:$16 sps:$4 sm:$0xff]   ;;  %v3995_v0 = vld [vmem:[%s5423_s1 + $0x984] ss:$16 sps:$4 sm:$0xff]  }
  0xf7   :  { %2585 = vmatpush1.bf16.msra.mxu0 %v3901_v1  ;;  %2872 = vmatpush1.bf16.msra.mxu1 %v3904_v2  ;;  %v3998_v1 = vld [vmem:[%s5423_s1 + $0x98c] ss:$16 sps:$4 sm:$0xff]   ;;  %v3993_v2 = vld [vmem:[%s5423_s1 + $0x980] ss:$16 sps:$4 sm:$0xff]  }
  0xf8   :  { %2586 = vmatprep.subr.bf16.mxu0 %v3909_v3  ;;  %2873 = vmatprep.subr.bf16.mxu1 %v3912_v4  ;;  %v3996_v3 = vld [vmem:[%s5423_s1 + $0x988] ss:$16 sps:$4 sm:$0xff]   ;;  %v4001_v4 = vld [vmem:[%s5423_s1 + $0x9a4] ss:$16 sps:$4 sm:$0xff]  }
  0xfb   :  { %2587 = vmatpush1.bf16.msra.mxu0 %v3907_v5  ;;  %2874 = vmatpush1.bf16.msra.mxu1 %v3910_v6  ;;  %v4004_v5 = vld [vmem:[%s5423_s1 + $0x9ac] ss:$16 sps:$4 sm:$0xff]   ;;  %v3999_v6 = vld [vmem:[%s5423_s1 + $0x9a0] ss:$16 sps:$4 sm:$0xff]  }
  0xfc   :  { %2588 = vmatprep.subr.bf16.mxu0 %v3915_v7  ;;  %2875 = vmatprep.subr.bf16.mxu1 %v3918_v8  ;;  %v4002_v7 = vld [vmem:[%s5423_s1 + $0x9a8] ss:$16 sps:$4 sm:$0xff]   ;;  %v4007_v8 = vld [vmem:[%s5423_s1 + $0x9c4] ss:$16 sps:$4 sm:$0xff]  }
  0xff   :  { %2589 = vmatpush1.bf16.msra.mxu0 %v3913_v9  ;;  %2876 = vmatpush1.bf16.msra.mxu1 %v3916_v10  ;;  %v4010_v9 = vld [vmem:[%s5423_s1 + $0x9cc] ss:$16 sps:$4 sm:$0xff]   ;;  %v4005_v10 = vld [vmem:[%s5423_s1 + $0x9c0] ss:$16 sps:$4 sm:$0xff]  }
 0x100   :  { %2599 = vmatprep.subr.bf16.mxu0 %v3923_v12  ;;  %2886 = vmatprep.subr.bf16.mxu1 %v3926_v13  ;;  %v4008_v12 = vld [vmem:[%s5423_s1 + $0x9c8] ss:$16 sps:$4 sm:$0xff]   ;;  %v4013_v13 = vld [vmem:[%s5423_s1 + $0x9e4] ss:$16 sps:$4 sm:$0xff]  }
 0x102   :  { %2591 = vmatmul.mubr.bf16.vlgmr.msra.gmra.mrb[0].mxu0 %v3073_v11  ;;  %2878 = vmatmul.mubr.bf16.vlgmr.msra.gmra.mrb[0].mxu1 %v3073_v11  ;;  %v4011_v11 = vld [vmem:[%s5423_s1 + $0x9e0] ss:$16 sps:$4 sm:$0xff]  }
 0x103   :  { %2600 = vmatpush1.bf16.msra.mxu0 %v3921_v15  ;;  %2887 = vmatpush1.bf16.msra.mxu1 %v3924_v17  ;;  %v4016_v15 = vld [vmem:[%s5423_s1 + $0x9ec] ss:$16 sps:$4 sm:$0xff]   ;;  %v4014_v17 = vld [vmem:[%s5423_s1 + $0x9e8] ss:$16 sps:$4 sm:$0xff]  }
 0x104   :  { %2601 = vmatprep.subr.bf16.mxu0 %v3929_v18  ;;  %2888 = vmatprep.subr.bf16.mxu1 %v3932_v14  ;;  %v4021_v18 = vld [vmem:[%s5423_s1 + $0xa04] ss:$16 sps:$4 sm:$0xff]   ;;  %v4024_v14 = vld [vmem:[%s5423_s1 + $0xa0c] ss:$16 sps:$4 sm:$0xff]  }
 0x105   :  { %2631 = vmatprep.mubr.bf16.mxu0 %v3076_v19  ;;  %2918 = vmatprep.mubr.bf16.mxu1 %v3076_v19  ;;  %v3075_v19 = vcombine.low %v4981_v16, %v4981_v16  ;;  %v4027_v16 = vld [vmem:[%s5423_s1 + $0xa24] ss:$16 sps:$4 sm:$0xff]  }
 0x107   :  { %2602 = vmatpush1.bf16.msra.mxu0 %v3927_v20  ;;  %2889 = vmatpush1.bf16.msra.mxu1 %v3930_v21  ;;  %v5184_v20 = vld [vmem:[%s5424_s0 + $0x28] sm:$0xff]  ;;  %v4019_v21 = vld [vmem:[%s5423_s1 + $0xa00] ss:$16 sps:$4 sm:$0xff]  }
 0x108   :  { %2603 = vmatprep.subr.bf16.mxu0 %v3935_v22  ;;  %2890 = vmatprep.subr.bf16.mxu1 %v3938_v23  ;;  %v4022_v22 = vld [vmem:[%s5423_s1 + $0xa08] ss:$16 sps:$4 sm:$0xff]   ;;  %v4030_v23 = vld [vmem:[%s5423_s1 + $0xa2c] ss:$16 sps:$4 sm:$0xff]  }
 0x10b   :  { %2604 = vmatpush1.bf16.msra.mxu0 %v3933_v24  ;;  %2891 = vmatpush1.bf16.msra.mxu1 %v3936_v25  ;;  %v3078_v24 = vcombine.high %v5184_v20, %v5184_v20  ;;  %v4025_v25 = vld [vmem:[%s5423_s1 + $0xa20] ss:$16 sps:$4 sm:$0xff]  }
 0x10c   :  { %2605 = vmatprep.subr.bf16.mxu0 %v3941_v26  ;;  %2892 = vmatprep.subr.bf16.mxu1 %v3944_v27  ;;  %v4028_v26 = vld [vmem:[%s5423_s1 + $0xa28] ss:$16 sps:$4 sm:$0xff]   ;;  %v4033_v27 = vld [vmem:[%s5423_s1 + $0xa44] ss:$16 sps:$4 sm:$0xff]  }
 0x10f   :  { %2606 = vmatpush1.bf16.msra.mxu0 %v3939_v29  ;;  %2893 = vmatpush1.bf16.msra.mxu1 %v3942_v30  ;;  %v4036_v29 = vld [vmem:[%s5423_s1 + $0xa4c] ss:$16 sps:$4 sm:$0xff]   ;;  %v4031_v30 = vld [vmem:[%s5423_s1 + $0xa40] ss:$16 sps:$4 sm:$0xff]  }
 0x110   :  { %2607 = vmatprep.subr.bf16.mxu0 %v3947_v31  ;;  %2894 = vmatprep.subr.bf16.mxu1 %v3950_v32  ;;  %v4034_v31 = vld [vmem:[%s5423_s1 + $0xa48] ss:$16 sps:$4 sm:$0xff]   ;;  %v4039_v32 = vld [vmem:[%s5423_s1 + $0xa64] ss:$16 sps:$4 sm:$0xff]  }
 0x113   :  { %2608 = vmatpush1.bf16.msra.mxu0 %v3945_v33  ;;  %2895 = vmatpush1.bf16.msra.mxu1 %v3948_v34  ;;  %v4042_v33 = vld [vmem:[%s5423_s1 + $0xa6c] ss:$16 sps:$4 sm:$0xff]   ;;  %v4037_v34 = vld [vmem:[%s5423_s1 + $0xa60] ss:$16 sps:$4 sm:$0xff]  }
 0x114   :  { %2609 = vmatprep.subr.bf16.mxu0 %v3953_v36  ;;  %2896 = vmatprep.subr.bf16.mxu1 %v3956_v37  ;;  %v4045_v36 = vld [vmem:[%s5423_s1 + $0xa84] ss:$16 sps:$4 sm:$0xff]   ;;  %v4048_v37 = vld [vmem:[%s5423_s1 + $0xa8c] ss:$16 sps:$4 sm:$0xff]  }
 0x117   :  { %2610 = vmatpush1.bf16.msra.mxu0 %v3951_v38  ;;  %2897 = vmatpush1.bf16.msra.mxu1 %v3954_v39  ;;  %v4043_v38 = vld [vmem:[%s5423_s1 + $0xa80] ss:$16 sps:$4 sm:$0xff]   ;;  %v4046_v39 = vld [vmem:[%s5423_s1 + $0xa88] ss:$16 sps:$4 sm:$0xff]  }
 0x118   :  { %2611 = vmatprep.subr.bf16.mxu0 %v3959_v40  ;;  %2898 = vmatprep.subr.bf16.mxu1 %v3962_v41  ;;  %v4051_v40 = vld [vmem:[%s5423_s1 + $0xaa4] ss:$16 sps:$4 sm:$0xff]   ;;  %v4054_v41 = vld [vmem:[%s5423_s1 + $0xaac] ss:$16 sps:$4 sm:$0xff]  }
 0x11b   :  { %2612 = vmatpush1.bf16.msra.mxu0 %v3957_v42  ;;  %2899 = vmatpush1.bf16.msra.mxu1 %v3960_v43  ;;  %v4049_v42 = vld [vmem:[%s5423_s1 + $0xaa0] ss:$16 sps:$4 sm:$0xff]   ;;  %v4052_v43 = vld [vmem:[%s5423_s1 + $0xaa8] ss:$16 sps:$4 sm:$0xff]  }
 0x11c   :  { %2613 = vmatprep.subr.bf16.mxu0 %v3965_v44  ;;  %2900 = vmatprep.subr.bf16.mxu1 %v3968_v45  ;;  %v4057_v44 = vld [vmem:[%s5423_s1 + $0xac4] ss:$16 sps:$4 sm:$0xff]   ;;  %v4060_v45 = vld [vmem:[%s5423_s1 + $0xacc] ss:$16 sps:$4 sm:$0xff]  }
 0x11f   :  { %2614 = vmatpush1.bf16.msra.mxu0 %v3963_v46  ;;  %2901 = vmatpush1.bf16.msra.mxu1 %v3966_v47  ;;  %v4055_v46 = vld [vmem:[%s5423_s1 + $0xac0] ss:$16 sps:$4 sm:$0xff]   ;;  %v4058_v47 = vld [vmem:[%s5423_s1 + $0xac8] ss:$16 sps:$4 sm:$0xff]  }
 0x120   :  { %2615 = vmatprep.subr.bf16.mxu0 %v3971_v48  ;;  %2902 = vmatprep.subr.bf16.mxu1 %v3974_v49  ;;  %v4063_v48 = vld [vmem:[%s5423_s1 + $0xae4] ss:$16 sps:$4 sm:$0xff]   ;;  %v4066_v49 = vld [vmem:[%s5423_s1 + $0xaec] ss:$16 sps:$4 sm:$0xff]  }
 0x123   :  { %2616 = vmatpush1.bf16.msra.mxu0 %v3969_v50  ;;  %2903 = vmatpush1.bf16.msra.mxu1 %v3972_v51  ;;  %v4061_v50 = vld [vmem:[%s5423_s1 + $0xae0] ss:$16 sps:$4 sm:$0xff]   ;;  %v4064_v51 = vld [vmem:[%s5423_s1 + $0xae8] ss:$16 sps:$4 sm:$0xff]  }
 0x124   :  { %2617 = vmatprep.subr.bf16.mxu0 %v3977_v52  ;;  %2904 = vmatprep.subr.bf16.mxu1 %v3980_v53  ;;  %v4069_v52 = vld [vmem:[%s5423_s1 + $0xb04] ss:$16 sps:$4 sm:$0xff]   ;;  %v4072_v53 = vld [vmem:[%s5423_s1 + $0xb0c] ss:$16 sps:$4 sm:$0xff]  }
 0x127   :  { %2618 = vmatpush1.bf16.msra.mxu0 %v3975_v54  ;;  %2905 = vmatpush1.bf16.msra.mxu1 %v3978_v55  ;;  %v4067_v54 = vld [vmem:[%s5423_s1 + $0xb00] ss:$16 sps:$4 sm:$0xff]   ;;  %v4070_v55 = vld [vmem:[%s5423_s1 + $0xb08] ss:$16 sps:$4 sm:$0xff]  }
 0x128   :  { %2619 = vmatprep.subr.bf16.mxu0 %v3983_v56  ;;  %2906 = vmatprep.subr.bf16.mxu1 %v3986_v57  ;;  %v4075_v56 = vld [vmem:[%s5423_s1 + $0xb24] ss:$16 sps:$4 sm:$0xff]   ;;  %v4078_v57 = vld [vmem:[%s5423_s1 + $0xb2c] ss:$16 sps:$4 sm:$0xff]  }
 0x12b   :  { %2620 = vmatpush1.bf16.msra.mxu0 %v3981_v58  ;;  %2907 = vmatpush1.bf16.msra.mxu1 %v3984_v59  ;;  %v4073_v58 = vld [vmem:[%s5423_s1 + $0xb20] ss:$16 sps:$4 sm:$0xff]   ;;  %v4076_v59 = vld [vmem:[%s5423_s1 + $0xb28] ss:$16 sps:$4 sm:$0xff]  }
 0x12c   :  { %2621 = vmatprep.subr.bf16.mxu0 %v3989_v60  ;;  %2908 = vmatprep.subr.bf16.mxu1 %v3992_v61  ;;  %v4081_v60 = vld [vmem:[%s5423_s1 + $0xb44] ss:$16 sps:$4 sm:$0xff]   ;;  %v4084_v61 = vld [vmem:[%s5423_s1 + $0xb4c] ss:$16 sps:$4 sm:$0xff]  }
 0x12f   :  { %2622 = vmatpush1.bf16.msra.mxu0 %v3987_v62  ;;  %2909 = vmatpush1.bf16.msra.mxu1 %v3990_v63  ;;  %v4079_v62 = vld [vmem:[%s5423_s1 + $0xb40] ss:$16 sps:$4 sm:$0xff]   ;;  %v4082_v63 = vld [vmem:[%s5423_s1 + $0xb48] ss:$16 sps:$4 sm:$0xff]  }
 0x130   :  { %2623 = vmatprep.subr.bf16.mxu0 %v3995_v0  ;;  %2910 = vmatprep.subr.bf16.mxu1 %v3998_v1  ;;  %v4087_v0 = vld [vmem:[%s5423_s1 + $0xb64] ss:$16 sps:$4 sm:$0xff]   ;;  %v4090_v1 = vld [vmem:[%s5423_s1 + $0xb6c] ss:$16 sps:$4 sm:$0xff]  }
 0x133   :  { %2624 = vmatpush1.bf16.msra.mxu0 %v3993_v2  ;;  %2911 = vmatpush1.bf16.msra.mxu1 %v3996_v3  ;;  %v4085_v2 = vld [vmem:[%s5423_s1 + $0xb60] ss:$16 sps:$4 sm:$0xff]   ;;  %v4088_v3 = vld [vmem:[%s5423_s1 + $0xb68] ss:$16 sps:$4 sm:$0xff]  }
 0x134   :  { %2625 = vmatprep.subr.bf16.mxu0 %v4001_v4  ;;  %2912 = vmatprep.subr.bf16.mxu1 %v4004_v5  ;;  %v4093_v4 = vld [vmem:[%s5423_s1 + $0xb84] ss:$16 sps:$4 sm:$0xff]   ;;  %v4096_v5 = vld [vmem:[%s5423_s1 + $0xb8c] ss:$16 sps:$4 sm:$0xff]  }
 0x137   :  { %2626 = vmatpush1.bf16.msra.mxu0 %v3999_v6  ;;  %2913 = vmatpush1.bf16.msra.mxu1 %v4002_v7  ;;  %v4091_v6 = vld [vmem:[%s5423_s1 + $0xb80] ss:$16 sps:$4 sm:$0xff]   ;;  %v4094_v7 = vld [vmem:[%s5423_s1 + $0xb88] ss:$16 sps:$4 sm:$0xff]  }
 0x138   :  { %2627 = vmatprep.subr.bf16.mxu0 %v4007_v8  ;;  %2914 = vmatprep.subr.bf16.mxu1 %v4010_v9  ;;  %v4099_v8 = vld [vmem:[%s5423_s1 + $0xba4] ss:$16 sps:$4 sm:$0xff]   ;;  %v4102_v9 = vld [vmem:[%s5423_s1 + $0xbac] ss:$16 sps:$4 sm:$0xff]  }
 0x13b   :  { %2628 = vmatpush1.bf16.msra.mxu0 %v4005_v10  ;;  %2915 = vmatpush1.bf16.msra.mxu1 %v4008_v12  ;;  %v4097_v10 = vld [vmem:[%s5423_s1 + $0xba0] ss:$16 sps:$4 sm:$0xff]   ;;  %v4100_v12 = vld [vmem:[%s5423_s1 + $0xba8] ss:$16 sps:$4 sm:$0xff]  }
 0x13c   :  { %2629 = vmatprep.subr.bf16.mxu0 %v4013_v13  ;;  %2916 = vmatprep.subr.bf16.mxu1 %v4016_v15  ;;  %v4105_v13 = vld [vmem:[%s5423_s1 + $0xbc4] ss:$16 sps:$4 sm:$0xff]   ;;  %v4108_v15 = vld [vmem:[%s5423_s1 + $0xbcc] ss:$16 sps:$4 sm:$0xff]  }
 0x13f   :  { %2630 = vmatpush1.bf16.msra.mxu0 %v4011_v11  ;;  %2917 = vmatpush1.bf16.msra.mxu1 %v4014_v17  ;;  %v4103_v11 = vld [vmem:[%s5423_s1 + $0xbc0] ss:$16 sps:$4 sm:$0xff]   ;;  %v4106_v17 = vld [vmem:[%s5423_s1 + $0xbc8] ss:$16 sps:$4 sm:$0xff]  }
 0x140   :  { %2640 = vmatprep.subr.bf16.mxu0 %v4021_v18  ;;  %2927 = vmatprep.subr.bf16.mxu1 %v4024_v14  ;;  %v4111_v18 = vld [vmem:[%s5423_s1 + $0xbe4] ss:$16 sps:$4 sm:$0xff]   ;;  %v4114_v14 = vld [vmem:[%s5423_s1 + $0xbec] ss:$16 sps:$4 sm:$0xff]  }
 0x142   :  { %2632 = vmatmul.mubr.bf16.vlgmr.msra.gmra.mrb[0].mxu0 %v3075_v19  ;;  %2919 = vmatmul.mubr.bf16.vlgmr.msra.gmra.mrb[0].mxu1 %v3075_v19  ;;  %v4109_v19 = vld [vmem:[%s5423_s1 + $0xbe0] ss:$16 sps:$4 sm:$0xff]  }
 0x143   :  { %2641 = vmatpush1.bf16.msra.mxu0 %v4019_v21  ;;  %2928 = vmatpush1.bf16.msra.mxu1 %v4022_v22  ;;  %v4112_v21 = vld [vmem:[%s5423_s1 + $0xbe8] ss:$16 sps:$4 sm:$0xff]   ;;  %v4119_v22 = vld [vmem:[%s5423_s1 + $0xc04] ss:$16 sps:$4 sm:$0xff]  }
 0x144   :  { %2642 = vmatprep.subr.bf16.mxu0 %v4027_v16  ;;  %2929 = vmatprep.subr.bf16.mxu1 %v4030_v23  ;;  %v4122_v16 = vld [vmem:[%s5423_s1 + $0xc0c] ss:$16 sps:$4 sm:$0xff]   ;;  %v3077_v23 = vcombine.low %v5184_v20, %v5184_v20 }
 0x145   :  { %2672 = vmatprep.mubr.bf16.mxu0 %v3078_v24  ;;  %2959 = vmatprep.mubr.bf16.mxu1 %v3078_v24  ;;  %v4117_v24 = vld [vmem:[%s5423_s1 + $0xc00] ss:$16 sps:$4 sm:$0xff]   ;;  %v4128_v20 = vld [vmem:[%s5423_s1 + $0xc2c] ss:$16 sps:$4 sm:$0xff]  }
 0x147   :  { %2643 = vmatpush1.bf16.msra.mxu0 %v4025_v25  ;;  %2930 = vmatpush1.bf16.msra.mxu1 %v4028_v26  ;;  %v4120_v25 = vld [vmem:[%s5423_s1 + $0xc08] ss:$16 sps:$4 sm:$0xff]   ;;  %v4125_v26 = vld [vmem:[%s5423_s1 + $0xc24] ss:$16 sps:$4 sm:$0xff]  }
 0x148   :  { %2644 = vmatprep.subr.bf16.mxu0 %v4033_v27  ;;  %2931 = vmatprep.subr.bf16.mxu1 %v4036_v29  ;;  %v4123_v27 = vld [vmem:[%s5423_s1 + $0xc20] ss:$16 sps:$4 sm:$0xff]   ;;  %v4126_v29 = vld [vmem:[%s5423_s1 + $0xc28] ss:$16 sps:$4 sm:$0xff]  }
 0x14b   :  { %2645 = vmatpush1.bf16.msra.mxu0 %v4031_v30  ;;  %2932 = vmatpush1.bf16.msra.mxu1 %v4034_v31  ;;  %v4129_v30 = vld [vmem:[%s5424_s0 + $0x30] ss:$0 sps:$4 sm:$0xff]   ;;  %v3035_v31 = vld [vmem:[%s5426_s3] sm:$0xff] }
 0x14c   :  { %2646 = vmatprep.subr.bf16.mxu0 %v4039_v32  ;;  %2933 = vmatprep.subr.bf16.mxu1 %v4042_v33 }
 0x14d   :  { %3038 = vperm.xlu1 %3528, %v3035_v31  }
 0x14f   :  { %2647 = vmatpush1.bf16.msra.mxu0 %v4037_v34  ;;  %2934 = vmatpush1.bf16.msra.mxu1 %v4040_v35 }
 0x150   :  { %2648 = vmatprep.subr.bf16.mxu0 %v4045_v36  ;;  %2935 = vmatprep.subr.bf16.mxu1 %v4048_v37 }
 0x153   :  { %2649 = vmatpush1.bf16.msra.mxu0 %v4043_v38  ;;  %2936 = vmatpush1.bf16.msra.mxu1 %v4046_v39 }
 0x154   :  { %2650 = vmatprep.subr.bf16.mxu0 %v4051_v40  ;;  %2937 = vmatprep.subr.bf16.mxu1 %v4054_v41 }
 0x157   :  { %2651 = vmatpush1.bf16.msra.mxu0 %v4049_v42  ;;  %2938 = vmatpush1.bf16.msra.mxu1 %v4052_v43 }
 0x158   :  { %2652 = vmatprep.subr.bf16.mxu0 %v4057_v44  ;;  %2939 = vmatprep.subr.bf16.mxu1 %v4060_v45  ;;  %v424_v32 = vpop.permute.xlu0 %423 }
 0x15b   :  { %2653 = vmatpush1.bf16.msra.mxu0 %v4055_v46  ;;  %2940 = vmatpush1.bf16.msra.mxu1 %v4058_v47 }
 0x15c   :  { %2654 = vmatprep.subr.bf16.mxu0 %v4063_v48  ;;  %2941 = vmatprep.subr.bf16.mxu1 %v4066_v49 }
 0x15f   :  { %2655 = vmatpush1.bf16.msra.mxu0 %v4061_v50  ;;  %2942 = vmatpush1.bf16.msra.mxu1 %v4064_v51 }
 0x160   :  { %2656 = vmatprep.subr.bf16.mxu0 %v4069_v52  ;;  %2943 = vmatprep.subr.bf16.mxu1 %v4072_v53 }
 0x163   :  { %2657 = vmatpush1.bf16.msra.mxu0 %v4067_v54  ;;  %2944 = vmatpush1.bf16.msra.mxu1 %v4070_v55 }
 0x164   :  { %2658 = vmatprep.subr.bf16.mxu0 %v4075_v56  ;;  %2945 = vmatprep.subr.bf16.mxu1 %v4078_v57 }
 0x167   :  { %2659 = vmatpush1.bf16.msra.mxu0 %v4073_v58  ;;  %2946 = vmatpush1.bf16.msra.mxu1 %v4076_v59 }
 0x168   :  { %2660 = vmatprep.subr.bf16.mxu0 %v4081_v60  ;;  %2947 = vmatprep.subr.bf16.mxu1 %v4084_v61  ;;  %v3045_v60 = vld [vmem:[%s5427_s4] sm:$0xff] }
 0x16b   :  { %2661 = vmatpush1.bf16.msra.mxu0 %v4079_v62  ;;  %2948 = vmatpush1.bf16.msra.mxu1 %v4082_v63 }
 0x16c   :  { %2662 = vmatprep.subr.bf16.mxu0 %v4087_v0  ;;  %2949 = vmatprep.subr.bf16.mxu1 %v4090_v1 }
 0x16f   :  { %2663 = vmatpush1.bf16.msra.mxu0 %v4085_v2  ;;  %2950 = vmatpush1.bf16.msra.mxu1 %v4088_v3 }
 0x170   :  { %2664 = vmatprep.subr.bf16.mxu0 %v4093_v4  ;;  %2951 = vmatprep.subr.bf16.mxu1 %v4096_v5 }
 0x173   :  { %2665 = vmatpush1.bf16.msra.mxu0 %v4091_v6  ;;  %2952 = vmatpush1.bf16.msra.mxu1 %v4094_v7 }
 0x174   :  { %2666 = vmatprep.subr.bf16.mxu0 %v4099_v8  ;;  %2953 = vmatprep.subr.bf16.mxu1 %v4102_v9 }
 0x177   :  { %2667 = vmatpush1.bf16.msra.mxu0 %v4097_v10  ;;  %2954 = vmatpush1.bf16.msra.mxu1 %v4100_v12 }
 0x178   :  { %2668 = vmatprep.subr.bf16.mxu0 %v4105_v13  ;;  %2955 = vmatprep.subr.bf16.mxu1 %v4108_v15 }
 0x17b   :  { %2669 = vmatpush1.bf16.msra.mxu0 %v4103_v11  ;;  %2956 = vmatpush1.bf16.msra.mxu1 %v4106_v17 }
 0x17c   :  { %2670 = vmatprep.subr.bf16.mxu0 %v4111_v18  ;;  %2957 = vmatprep.subr.bf16.mxu1 %v4114_v14 }
 0x17f   :  { %2671 = vmatpush1.bf16.msra.mxu0 %v4109_v19  ;;  %2958 = vmatpush1.bf16.msra.mxu1 %v4112_v21 }
 0x180   :  { %2681 = vmatprep.subr.bf16.mxu0 %v4119_v22  ;;  %2968 = vmatprep.subr.bf16.mxu1 %v4122_v16 }
 0x182   :  { %2673 = vmatmul.mubr.bf16.vlgmr.msra.gmra.mrb[0].mxu0 %v3077_v23  ;;  %2960 = vmatmul.mubr.bf16.vlgmr.msra.gmra.mrb[0].mxu1 %v3077_v23 }
 0x183   :  { %2682 = vmatpush1.bf16.msra.mxu0 %v4117_v24  ;;  %2969 = vmatpush1.bf16.msra.mxu1 %v4120_v25 }
 0x184   :  { %2683 = vmatprep.subr.bf16.mxu0 %v4125_v26  ;;  %2970 = vmatprep.subr.bf16.mxu1 %v4128_v20 }
 0x185   :  { %2713 = vmatprep.mubr.bf16.mxu0 %v4140_v28  ;;  %3000 = vmatprep.mubr.bf16.mxu1 %v4140_v28 }
 0x187   :  { %2684 = vmatpush1.bf16.msra.mxu0 %v4123_v27  ;;  %2971 = vmatpush1.bf16.msra.mxu1 %v4126_v29 }
 0x18e   :  { %3472 = vmatmul.mubr.msk.bf16.vlgmr.msra.gmra.mrb[0].mxu0 %vm2431_vm0, %v4129_v30  ;;  %3473 = vmatmul.mubr.msk.bf16.vlgmr.msra.gmra.mrb[0].mxu1 %vm2431_vm0, %v4129_v30 }
 0x1cc   :  { %v3039_v61 = vpop.permute.xlu1 %3038 }
 0x261   :  { %v2715_v33 = vpop.f32.mrb[0].mxu0  ;;  %v3002_v34 = vpop.f32.mrb[0].mxu1 }
 0x262   :  { %v3474_v35 = vadd.f32 %v2715_v33, %v424_v32  ;;  %v2717_v36 = vpop.f32.mrb[1].mxu0  ;;  %v3004_v28 = vpop.f32.mrb[1].mxu1  ;;  %v3476_v42 = vadd.f32 %v3002_v34, %v424_v32 }
 0x263   :  { %v3475_v37 = vadd.f32 %v2717_v36, %v424_v32  ;;  %v2719_v38 = vpop.f32.mrb[2].mxu0  ;;  %v3006_v39 = vpop.f32.mrb[2].mxu1  ;;  %v3477_v44 = vadd.f32 %v3004_v28, %v424_v32 }
 0x264   :  { %v2720_v40 = vpop.f32.mrb[3].mxu0  ;;  %v3007_v41 = vpop.f32.mrb[3].mxu1 }
 0x265   :  { %v3009_v43 = vadd.f32 %v3475_v37, %v3474_v35 }
 0x267   :  { %v3010_v45 = vadd.f32 %v3476_v42, %v3009_v43 }
 0x269   :  { %v3011_v46 = vadd.f32 %v3477_v44, %v3010_v45 }
 0x26b   :  { %3012 = vadd.xlane.f32.xlu0 %v3011_v46 }
 0x2f8   :  { %v3013_v47 = vpop.xlane.xlu0 %3012 }
 0x2f9   :  { %v3014_v48 = vmul.f32 0.001953125, %v3013_v47 }
 0x2fb   :  { %v3015_v49 = vsub.f32 %v3474_v35, %v3014_v48  ;;  %v3016_v50 = vsub.f32 %v3475_v37, %v3014_v48  ;;  %v3017_v51 = vsub.f32 %v3476_v42, %v3014_v48  ;;  %v3018_v52 = vsub.f32 %v3477_v44, %v3014_v48 }
 0x2fd   :  { %v3019_v53 = vmul.f32 %v3015_v49, %v3015_v49  ;;  %v3020_v54 = vmul.f32 %v3016_v50, %v3016_v50  ;;  %v3021_v55 = vmul.f32 %v3017_v51, %v3017_v51  ;;  %v3022_v57 = vmul.f32 %v3018_v52, %v3018_v52 }
 0x2ff   :  { %v3023_v56 = vadd.f32 %v3020_v54, %v3019_v53 }
 0x301   :  { %v3024_v58 = vadd.f32 %v3023_v56, %v3021_v55 }
 0x303   :  { %v3025_v59 = vadd.f32 %v3024_v58, %v3022_v57 }
 0x305   :  { %3026 = vadd.xlane.f32.xlu1 %v3025_v59 }
 0x316   :  { %3048 = vperm.xlu1 %3528, %v3045_v60  }
 0x392   :  { %v3027_v62 = vpop.xlane.xlu1 %3026 }
 0x393   :  { %v3028_v63 = vmul.f32 0.001953125, %v3027_v62 }
 0x395   :  { %v3029_v0 = vadd.f32 1e-05, %v3028_v63 }
 0x396   :  { %v3049_v10 = vpop.permute.xlu1 %3048 }
 0x397   :  { %4130 = vrsqrt.f32 %v3029_v0 }
 0x3a1   :  { %v4131_v1 = vpop.eup %4130 }
 0x3a2   :  { %v3031_v2 = vmul.f32 %v4131_v1, %v3015_v49  ;;  %v3032_v3 = vmul.f32 %v4131_v1, %v3016_v50  ;;  %v3033_v4 = vmul.f32 %v4131_v1, %v3017_v51  ;;  %v3034_v5 = vmul.f32 %v4131_v1, %v3018_v52 }
 0x3a4   :  { %v3041_v6 = vmul.f32 %v3039_v61, %v3031_v2  ;;  %v3042_v7 = vmul.f32 %v3039_v61, %v3032_v3  ;;  %v3043_v8 = vmul.f32 %v3039_v61, %v3033_v4  ;;  %v3044_v9 = vmul.f32 %v3039_v61, %v3034_v5 }
 0x3a6   :  { %v3051_v12 = vadd.f32 %v3049_v10, %v3041_v6  ;;  %v3052_v13 = vadd.f32 %v3049_v10, %v3042_v7  ;;  %v3053_v15 = vadd.f32 %v3049_v10, %v3043_v8  ;;  %v3054_v11 = vadd.f32 %v3049_v10, %v3044_v9 }
 0x3a8   :  { %4132 = vtanh.f32 %v3051_v12 }
 0x3a9   :  { %4134 = vtanh.f32 %v3052_v13 }
 0x3aa   :  { %4136 = vtanh.f32 %v3053_v15 }
 0x3ab   :  { %4138 = vtanh.f32 %v3054_v11 }
 0x3b2   :  { %v4133_v17 = vpop.eup %4132 }
 0x3b3   :  { %v4135_v18 = vpop.eup %4134  ;;  %3059 = vst [vmem:[%s5428_s5] sm:$0xff] %v4133_v17 }
 0x3b4   :  { %v4137_v14 = vpop.eup %4136  ;;  %3060 = vst [vmem:[%s5428_s5 + $0x8] sm:$0xff] %v4135_v18 }
 0x3b5   :  { %v4139_v19 = vpop.eup %4138  ;;  %3061 = vst [vmem:[%s5428_s5 + $0x10] sm:$0xff] %v4137_v14 }
 0x3b6   :  { %3062 = vst [vmem:[%s5428_s5 + $0x18] sm:$0xff] %v4139_v19 }

</bundles_post_ra>
